<compile_context>
chip_gen: v7x
topology: tpu7x:2x2x1
jax: 0.10.0
libtpu: 0.0.40
codegen_flags: <defaults>
</compile_context>

<pallas_src>
import functools

import jax
import jax.numpy as jnp
import numpy as np
from jax.experimental import pallas as pl
from jax.experimental.pallas import tpu as pltpu

EXPANSION = 4
BN_EPS = 1e-5


# ---------------------------------------------------------------------------
# Fused Bottleneck kernel
# ---------------------------------------------------------------------------
def _bottleneck_kernel(x_ref, xs_ref, mask_ref, w1_ref, b1_ref, w2_ref, b2_ref,
                       w3_ref, b3_ref, *rest, TH, W, Wp, stride, has_shortcut):
    # rest = ([ws_ref, bs_ref,] o_ref, h1_scratch, stacked_scratch)
    if has_shortcut:
        ws_ref, bs_ref, o_ref, h1_ref, stk_ref = rest
    else:
        o_ref, h1_ref, stk_ref = rest
        ws_ref = bs_ref = None

    planes = w3_ref.shape[0]
    out_planes = w3_ref.shape[1]
    THo, Wo = TH // stride, W // stride
    band_rows = (TH + 3) * Wp          # flat padded rows held for this band
    conv_rows = TH * Wp                # "wide" stride-1 conv rows (incl. junk cols/row)

    r = pl.program_id(1)
    start = r * conv_rows              # first flat padded row of this band
    for a in (16, 8):
        if conv_rows % a == 0:
            start = pl.multiple_of(start, a)
            break

    # ---- conv1 (1x1) + bn1 + relu over the padded band; mask zeroes the pad ring
    xb = x_ref[0, pl.ds(start, band_rows), :]                       # (band_rows, Cin) bf16
    h1 = jnp.dot(xb, w1_ref[...], preferred_element_type=jnp.float32)
    h1 = jnp.maximum(h1 + b1_ref[...], 0.0)
    h1_ref[...] = h1.astype(jnp.bfloat16) * mask_ref[pl.ds(start, band_rows), :]

    # ---- conv2 (3x3, pad=1) + bn2 + relu: 9 taps stacked along K, one MXU matmul
    for t in range(9):
        ky, kx = divmod(t, 3)
        off = ky * Wp + kx             # static, sublane-aligned when Wp % 8 == 0
        stk_ref[:, t * planes:(t + 1) * planes] = h1_ref[off:off + conv_rows, :]
    acc = jnp.dot(stk_ref[...], w2_ref[...], preferred_element_type=jnp.float32)
    h2 = jnp.maximum(acc + b2_ref[...], 0.0).astype(jnp.bfloat16)   # (conv_rows, planes)

    # ---- strip junk columns (and subsample for stride>1) BEFORE conv3 ------------
    if stride == 1:
        h2v = h2.reshape(TH, Wp, planes)[:, :W, :].reshape(TH * W, planes)
    else:
        # TODO(synk): compute the strided conv2 directly (skip non-strided rows/cols
        # in the stacked taps) instead of subsampling the stride-1 result in VMEM.
        s = stride
        h2v = (h2.reshape(TH, Wp, planes)[:, :W, :]
                  .reshape(THo, s, Wo, s, planes)[:, 0, :, 0, :]
                  .reshape(THo * Wo, planes))

    # ---- conv3 (1x1) + bn3 + shortcut + relu -------------------------------------
    out = jnp.dot(h2v, w3_ref[...], preferred_element_type=jnp.float32) + b3_ref[...]
    xs = xs_ref[0, :, :]               # (THo*Wo, Cin) bf16, pre-strided in wrapper
    if has_shortcut:
        out = out + jnp.dot(xs, ws_ref[...], preferred_element_type=jnp.float32) + bs_ref[...]
    else:
        out = out + xs.astype(jnp.float32)          # identity shortcut
    out = jnp.maximum(out, 0.0)

    # ---- lane-dense flat store ----------------------------------------------------
    o_ref[...] = out.reshape(1, THo * Wo, out_planes).astype(o_ref.dtype)


# ---------------------------------------------------------------------------
# Wrapper helpers
# ---------------------------------------------------------------------------
def _pick_wp(W):
    # Round the wide-row width up to a multiple of 8 (sublane-aligned tap
    # offsets) only when the extra junk columns are cheap.
    wp_min = W + 2
    wp_aligned = ((wp_min + 7) // 8) * 8
    if wp_aligned - wp_min <= max(2, W // 8):
        return wp_aligned
    return wp_min


def _interior_mask(H, W, Wp):
    Hpp = H + 3
    rows = jnp.arange(Hpp)
    cols = jnp.arange(Wp)
    m = ((rows[:, None] >= 1) & (rows[:, None] <= H)
         & (cols[None, :] >= 1) & (cols[None, :] <= W))
    return m.astype(jnp.bfloat16).reshape(Hpp * Wp, 1)


def _vmem_capacity_bytes():
    try:
        info = pltpu.get_tpu_info()
        cap = getattr(info, "vmem_capacity_bytes", None)
        if cap:
            return int(cap)
    except Exception:
        pass
    return 64 << 20   # conservative default (v7x per-TC capacity)


def _band_vmem_bytes(H, W, Wp, Cin, planes, out_planes, TH, stride, has_shortcut):
    Hpp = H + 3
    THo, Wo = TH // stride, W // stride
    band_rows = (TH + 3) * Wp
    conv_rows = TH * Wp
    bf, f32 = 2, 4
    b = 0
    b += 2 * Hpp * Wp * Cin * bf                 # x_pad block (double buffered)
    b += 2 * THo * Wo * Cin * bf                 # shortcut band block
    b += 2 * Hpp * Wp * bf                       # mask block
    b += 2 * THo * Wo * out_planes * bf          # output block
    wb = (Cin * planes + 9 * planes * planes + planes * out_planes) * bf
    wb += (2 * planes + out_planes) * f32
    if has_shortcut:
        wb += Cin * out_planes * bf + out_planes * f32
    b += 2 * wb                                  # weight blocks
    b += band_rows * planes * bf                 # h1 scratch
    b += conv_rows * 9 * planes * bf             # stacked-tap scratch
    # in-kernel temporaries (f32 conv1 result, conv2 acc, h2 strips, conv3 out)
    b += band_rows * planes * f32
    b += conv_rows * planes * f32
    b += 2 * conv_rows * planes * bf
    b += 2 * THo * Wo * out_planes * f32
    return b


def _pick_band(H, W, Wp, Cin, planes, out_planes, stride, budget, has_shortcut):
    # Largest band height that divides H, is a multiple of stride, keeps banded
    # block rows sublane-aligned, and fits the VMEM budget.
    Wo = W // stride
    fallback = H
    for th in range(H, 0, -1):
        if H % th or th % stride:
            continue
        if th != H and ((th // stride) * Wo) % 8 != 0:
            continue
        if _band_vmem_bytes(H, W, Wp, Cin, planes, out_planes, th, stride,
                            has_shortcut) <= budget:
            return th
        fallback = th
    return fallback


# ---------------------------------------------------------------------------
# Wrapper
# ---------------------------------------------------------------------------
def bottleneck_forward_nhwc(x_nhwc, params, stride=1):
    N, H, W, Cin = x_nhwc.shape
    planes = params["w1"].shape[1]
    out_planes = EXPANSION * planes
    has_shortcut = "ws" in params
    if not has_shortcut:
        assert stride == 1 and Cin == out_planes, \
            "identity shortcut requires stride==1 and Cin == 4*planes"
    assert H % stride == 0 and W % stride == 0, "H, W must be divisible by stride"

    Wp = _pick_wp(W)
    Hpp = H + 3
    Ho, Wo = H // stride, W // stride

    cap = _vmem_capacity_bytes()
    budget = int(0.45 * min(cap, 128 << 20))
    TH = _pick_band(H, W, Wp, Cin, planes, out_planes, stride, budget, has_shortcut)
    nb = H // TH
    THo = TH // stride

    est = _band_vmem_bytes(H, W, Wp, Cin, planes, out_planes, TH, stride, has_shortcut)
    vmem_limit = max(32 << 20, int(1.5 * est) + (4 << 20))
    vmem_limit = min(vmem_limit, cap - (4 << 20))

    x = x_nhwc.astype(jnp.bfloat16)
    # pad 1 top / 2 bottom / 1 left / (Wp-W-1) right, flatten spatial dims so the
    # kernel sees a flat row-major padded image (contiguous 3x3 tap slices).
    x_pad = jnp.pad(x, ((0, 0), (1, 2), (1, Wp - W - 1), (0, 0))).reshape(N, Hpp * Wp, Cin)
    # shortcut input: unpadded, pre-strided in XLA (cheap) — banded per grid step
    if stride == 1:
        x_sc = x.reshape(N, H * W, Cin)
    else:
        x_sc = x[:, ::stride, ::stride, :].reshape(N, Ho * Wo, Cin)
    mask = _interior_mask(H, W, Wp)                                 # (Hpp*Wp, 1) bf16
    w2f = params["w2"].reshape(9 * planes, planes)                  # taps stacked on K

    args = [x_pad, x_sc, mask, params["w1"], params["b1"], w2f, params["b2"],
            params["w3"], params["b3"]]
    in_specs = [
        pl.BlockSpec((1, Hpp * Wp, Cin), lambda n, r: (n, 0, 0)),   # resident per batch
        pl.BlockSpec((1, THo * Wo, Cin), lambda n, r: (n, r, 0)),   # banded shortcut in
        pl.BlockSpec((Hpp * Wp, 1), lambda n, r: (0, 0)),
        pl.BlockSpec((Cin, planes), lambda n, r: (0, 0)),
        pl.BlockSpec((1, planes), lambda n, r: (0, 0)),
        pl.BlockSpec((9 * planes, planes), lambda n, r: (0, 0)),
        pl.BlockSpec((1, planes), lambda n, r: (0, 0)),
        pl.BlockSpec((planes, out_planes), lambda n, r: (0, 0)),
        pl.BlockSpec((1, out_planes), lambda n, r: (0, 0)),
    ]
    if has_shortcut:
        args += [params["ws"], params["bs"]]
        in_specs += [pl.BlockSpec((Cin, out_planes), lambda n, r: (0, 0)),
                     pl.BlockSpec((1, out_planes), lambda n, r: (0, 0))]

    kern = functools.partial(_bottleneck_kernel, TH=TH, W=W, Wp=Wp,
                             stride=stride, has_shortcut=has_shortcut)
    out_flat = pl.pallas_call(
        kern,
        out_shape=jax.ShapeDtypeStruct((N, Ho * Wo, out_planes), jnp.bfloat16),
        grid=(N, nb),
        in_specs=in_specs,
        out_specs=pl.BlockSpec((1, THo * Wo, out_planes), lambda n, r: (n, r, 0)),
        scratch_shapes=[pltpu.VMEM(((TH + 3) * Wp, planes), jnp.bfloat16),
                        pltpu.VMEM((TH * Wp, 9 * planes), jnp.bfloat16)],
        compiler_params=pltpu.CompilerParams(
            # batch axis only is megacore-sharded: the whole padded image is the
            # per-batch resident block, so sharding bands would duplicate its DMA.
            dimension_semantics=("parallel", "arbitrary"),
            vmem_limit_bytes=int(vmem_limit)),
    )(*args)
    return out_flat.reshape(N, Ho, Wo, out_planes)


def bottleneck_forward(x_nchw, params, stride=1):
    # NCHW adapter matching the PyTorch module's layout.
    x = jnp.transpose(x_nchw, (0, 2, 3, 1))
    out = bottleneck_forward_nhwc(x, params, stride=stride)
    return jnp.transpose(out, (0, 3, 1, 2))


# ---------------------------------------------------------------------------
# Deterministic synthetic parameters (BN scale folded into conv weights)
# ---------------------------------------------------------------------------
def _bn_scale_bias(keys, c):
    kg, kb, km, kv = keys
    gamma = 1.0 + 0.1 * jax.random.normal(kg, (c,), jnp.float32)
    beta = 0.1 * jax.random.normal(kb, (c,), jnp.float32)
    mean = 0.1 * jax.random.normal(km, (c,), jnp.float32)
    var = jax.random.uniform(kv, (c,), jnp.float32, 0.5, 1.5)
    scale = gamma / jnp.sqrt(var + BN_EPS)
    bias = beta - mean * scale
    return scale, bias


def init_params(key, in_planes, planes, stride):
    out_planes = EXPANSION * planes
    ks = jax.random.split(key, 20)
    p = {}
    w1 = 0.1 * jax.random.normal(ks[0], (in_planes, planes), jnp.float32)
    s1, b1 = _bn_scale_bias(ks[1:5], planes)
    w2 = 0.1 * jax.random.normal(ks[5], (9, planes, planes), jnp.float32)
    s2, b2 = _bn_scale_bias(ks[6:10], planes)
    w3 = 0.1 * jax.random.normal(ks[10], (planes, out_planes), jnp.float32)
    s3, b3 = _bn_scale_bias(ks[11:15], out_planes)
    p["w1"] = (w1 * s1[None, :]).astype(jnp.bfloat16)
    p["b1"] = b1.reshape(1, planes)
    p["w2"] = (w2 * s2[None, None, :]).astype(jnp.bfloat16)
    p["b2"] = b2.reshape(1, planes)
    p["w3"] = (w3 * s3[None, :]).astype(jnp.bfloat16)
    p["b3"] = b3.reshape(1, out_planes)
    if stride != 1 or in_planes != out_planes:
        ws = 0.1 * jax.random.normal(ks[15], (in_planes, out_planes), jnp.float32)
        ss, bs = _bn_scale_bias(ks[16:20], out_planes)
        p["ws"] = (ws * ss[None, :]).astype(jnp.bfloat16)
        p["bs"] = bs.reshape(1, out_planes)
    return p


# ---------------------------------------------------------------------------
# Pure-JAX reference (lax.conv, f32) using the same folded weights
# ---------------------------------------------------------------------------
def reference_forward(x_nchw, params, stride=1):
    x = jnp.transpose(x_nchw, (0, 2, 3, 1)).astype(jnp.float32)
    Cin = x.shape[-1]
    planes = params["w1"].shape[1]
    out_planes = EXPANSION * planes

    def conv(inp, w_hwio, s, pad):
        return jax.lax.conv_general_dilated(
            inp, w_hwio, (s, s), pad,
            dimension_numbers=("NHWC", "HWIO", "NHWC"))

    w1 = params["w1"].astype(jnp.float32).reshape(1, 1, Cin, planes)
    w2 = params["w2"].astype(jnp.float32).reshape(3, 3, planes, planes)
    w3 = params["w3"].astype(jnp.float32).reshape(1, 1, planes, out_planes)

    h = jnp.maximum(conv(x, w1, 1, "VALID") + params["b1"], 0.0)
    h = jnp.maximum(conv(h, w2, stride, ((1, 1), (1, 1))) + params["b2"], 0.0)
    h = conv(h, w3, 1, "VALID") + params["b3"]
    if "ws" in params:
        ws = params["ws"].astype(jnp.float32).reshape(1, 1, Cin, out_planes)
        r = conv(x, ws, stride, "VALID") + params["bs"]
    else:
        r = x
    out = jnp.maximum(h + r, 0.0)
    return jnp.transpose(out, (0, 3, 1, 2))


# ---------------------------------------------------------------------------
if __name__ == "__main__":
    key = jax.random.PRNGKey(0)
    kx, kp = jax.random.split(key)

    in_planes, planes, stride = 8, 8, 1       # Bottleneck(8, 8, stride=1) -> 32 out channels
    N, H, W = 2, 16, 16
    x = jax.random.normal(kx, (N, in_planes, H, W), jnp.float32)
    # Round the input to bf16 up-front so kernel and reference see identical values.
    x = x.astype(jnp.bfloat16).astype(jnp.float32)
    params = init_params(kp, in_planes, planes, stride)

    out = bottleneck_forward(x, params, stride=stride)
    out = jax.block_until_ready(out)
    assert out.shape == (N, EXPANSION * planes, H, W), out.shape

    ref = reference_forward(x, params, stride=stride)
    out_f = np.asarray(out.astype(jnp.float32))
    ref_f = np.asarray(ref)
    err = float(np.max(np.abs(out_f - ref_f)))
    if not np.allclose(out_f, ref_f, atol=5e-2, rtol=5e-2):
        raise SystemExit(f"mismatch: max abs err = {err}")

    print("KERNEL_OK")
</pallas_src>

<mosaic_0001>
module attributes {stable_mosaic.version = 11 : i64} {
  func.func @_bottleneck_kernel(%arg0: i32, %arg1: i32, %arg2: memref<1x342x8xbf16, #tpu.memory_space<vmem>>, %arg3: memref<1x256x8xbf16, #tpu.memory_space<vmem>>, %arg4: memref<342x1xbf16, #tpu.memory_space<vmem>>, %arg5: memref<8x8xbf16, #tpu.memory_space<vmem>>, %arg6: memref<1x8xf32, #tpu.memory_space<vmem>>, %arg7: memref<72x8xbf16, #tpu.memory_space<vmem>>, %arg8: memref<1x8xf32, #tpu.memory_space<vmem>>, %arg9: memref<8x32xbf16, #tpu.memory_space<vmem>>, %arg10: memref<1x32xf32, #tpu.memory_space<vmem>>, %arg11: memref<8x32xbf16, #tpu.memory_space<vmem>>, %arg12: memref<1x32xf32, #tpu.memory_space<vmem>>, %arg13: memref<1x256x32xbf16, #tpu.memory_space<vmem>>, %arg14: memref<342x8xbf16, #tpu.memory_space<vmem>>, %arg15: memref<288x72xbf16, #tpu.memory_space<vmem>>) attributes {dimension_semantics = [#tpu.dimension_semantics<parallel>, #tpu.dimension_semantics<arbitrary>], iteration_bounds = array<i64: 2, 1>, scalar_prefetch = 0 : i64, scratch_operands = 2 : i64, tpu.core_type = #tpu.core_type<tc>, window_params = [{transform_indices = @transform_0, window_bounds = array<i64: 1, 342, 8>}, {transform_indices = @transform_1, window_bounds = array<i64: 1, 256, 8>}, {pipeline_mode = #tpu.pipeline_mode<synchronous>, transform_indices = @transform_2, window_bounds = array<i64: 342, 1>}, {pipeline_mode = #tpu.pipeline_mode<synchronous>, transform_indices = @transform_3, window_bounds = array<i64: 8, 8>}, {pipeline_mode = #tpu.pipeline_mode<synchronous>, transform_indices = @transform_4, window_bounds = array<i64: 1, 8>}, {pipeline_mode = #tpu.pipeline_mode<synchronous>, transform_indices = @transform_5, window_bounds = array<i64: 72, 8>}, {pipeline_mode = #tpu.pipeline_mode<synchronous>, transform_indices = @transform_6, window_bounds = array<i64: 1, 8>}, {pipeline_mode = #tpu.pipeline_mode<synchronous>, transform_indices = @transform_7, window_bounds = array<i64: 8, 32>}, {pipeline_mode = #tpu.pipeline_mode<synchronous>, transform_indices = @transform_8, window_bounds = array<i64: 1, 32>}, {pipeline_mode = #tpu.pipeline_mode<synchronous>, transform_indices = @transform_9, window_bounds = array<i64: 8, 32>}, {pipeline_mode = #tpu.pipeline_mode<synchronous>, transform_indices = @transform_10, window_bounds = array<i64: 1, 32>}, {transform_indices = @transform_11, window_bounds = array<i64: 1, 256, 32>}]} {
    %c288_i32 = arith.constant 288 : i32
    %0 = arith.muli %arg1, %c288_i32 : i32
    %1 = tpu.assume_multiple %0, 16 : i32
    %c0 = arith.constant 0 : index
    %2 = arith.index_cast %1 : i32 to index
    %c0_0 = arith.constant 0 : index
    %3 = vector.load %arg2[%c0, %2, %c0_0] : memref<1x342x8xbf16, #tpu.memory_space<vmem>>, vector<1x342x8xbf16>
    %4 = vector.shape_cast %3 : vector<1x342x8xbf16> to vector<342x8xbf16>
    %c0_1 = arith.constant 0 : index
    %c0_2 = arith.constant 0 : index
    %5 = vector.load %arg5[%c0_1, %c0_2] : memref<8x8xbf16, #tpu.memory_space<vmem>>, vector<8x8xbf16>
    %cst = arith.constant dense<0.000000e+00> : vector<342x8xf32>
    %6 = tpu.matmul %4, %5, %cst {dimension_numbers = #tpu.dot_dimension_numbers<[1], [0], [0], [1], [0, 0, 1, 1], [], []>} : vector<342x8xbf16>, vector<8x8xbf16>, vector<342x8xf32> -> vector<342x8xf32>
    %c0_3 = arith.constant 0 : index
    %c0_4 = arith.constant 0 : index
    %7 = vector.load %arg6[%c0_3, %c0_4] : memref<1x8xf32, #tpu.memory_space<vmem>>, vector<1x8xf32>
    %8 = vector.broadcast %7 : vector<1x8xf32> to vector<342x8xf32>
    %9 = arith.addf %6, %8 : vector<342x8xf32>
    %cst_5 = arith.constant 0.000000e+00 : f32
    %10 = vector.broadcast %cst_5 : f32 to vector<342x8xf32>
    %11 = arith.maximumf %9, %10 : vector<342x8xf32>
    %12 = arith.truncf %11 : vector<342x8xf32> to vector<342x8xbf16>
    %13 = arith.index_cast %1 : i32 to index
    %c0_6 = arith.constant 0 : index
    %14 = vector.load %arg4[%13, %c0_6] : memref<342x1xbf16, #tpu.memory_space<vmem>>, vector<342x1xbf16>
    %15 = vector.broadcast %14 : vector<342x1xbf16> to vector<342x8xbf16>
    %16 = arith.mulf %12, %15 : vector<342x8xbf16>
    %c0_7 = arith.constant 0 : index
    %c0_8 = arith.constant 0 : index
    %17 = vector.load %arg14[%c0_7, %c0_8] : memref<342x8xbf16, #tpu.memory_space<vmem>>, vector<342x8xbf16>
    tpu.vector_store %arg14[%c0_7, %c0_8], %16 {strides = array<i32>} : memref<342x8xbf16, #tpu.memory_space<vmem>>, vector<342x8xbf16>,
    %c0_9 = arith.constant 0 : index
    %c0_10 = arith.constant 0 : index
    %18 = vector.load %arg14[%c0_9, %c0_10] : memref<342x8xbf16, #tpu.memory_space<vmem>>, vector<288x8xbf16>
    %c0_11 = arith.constant 0 : index
    %c0_12 = arith.constant 0 : index
    %19 = vector.load %arg15[%c0_11, %c0_12] : memref<288x72xbf16, #tpu.memory_space<vmem>>, vector<288x8xbf16>
    tpu.vector_store %arg15[%c0_11, %c0_12], %18 {strides = array<i32>} : memref<288x72xbf16, #tpu.memory_space<vmem>>, vector<288x8xbf16>,
    %c1 = arith.constant 1 : index
    %c0_13 = arith.constant 0 : index
    %20 = vector.load %arg14[%c1, %c0_13] : memref<342x8xbf16, #tpu.memory_space<vmem>>, vector<288x8xbf16>
    %c0_14 = arith.constant 0 : index
    %c8 = arith.constant 8 : index
    %21 = vector.load %arg15[%c0_14, %c8] : memref<288x72xbf16, #tpu.memory_space<vmem>>, vector<288x8xbf16>
    tpu.vector_store %arg15[%c0_14, %c8], %20 {strides = array<i32>} : memref<288x72xbf16, #tpu.memory_space<vmem>>, vector<288x8xbf16>,
    %c2 = arith.constant 2 : index
    %c0_15 = arith.constant 0 : index
    %22 = vector.load %arg14[%c2, %c0_15] : memref<342x8xbf16, #tpu.memory_space<vmem>>, vector<288x8xbf16>
    %c0_16 = arith.constant 0 : index
    %c16 = arith.constant 16 : index
    %23 = vector.load %arg15[%c0_16, %c16] : memref<288x72xbf16, #tpu.memory_space<vmem>>, vector<288x8xbf16>
    tpu.vector_store %arg15[%c0_16, %c16], %22 {strides = array<i32>} : memref<288x72xbf16, #tpu.memory_space<vmem>>, vector<288x8xbf16>,
    %c18 = arith.constant 18 : index
    %c0_17 = arith.constant 0 : index
    %24 = vector.load %arg14[%c18, %c0_17] : memref<342x8xbf16, #tpu.memory_space<vmem>>, vector<288x8xbf16>
    %c0_18 = arith.constant 0 : index
    %c24 = arith.constant 24 : index
    %25 = vector.load %arg15[%c0_18, %c24] : memref<288x72xbf16, #tpu.memory_space<vmem>>, vector<288x8xbf16>
    tpu.vector_store %arg15[%c0_18, %c24], %24 {strides = array<i32>} : memref<288x72xbf16, #tpu.memory_space<vmem>>, vector<288x8xbf16>,
    %c19 = arith.constant 19 : index
    %c0_19 = arith.constant 0 : index
    %26 = vector.load %arg14[%c19, %c0_19] : memref<342x8xbf16, #tpu.memory_space<vmem>>, vector<288x8xbf16>
    %c0_20 = arith.constant 0 : index
    %c32 = arith.constant 32 : index
    %27 = vector.load %arg15[%c0_20, %c32] : memref<288x72xbf16, #tpu.memory_space<vmem>>, vector<288x8xbf16>
    tpu.vector_store %arg15[%c0_20, %c32], %26 {strides = array<i32>} : memref<288x72xbf16, #tpu.memory_space<vmem>>, vector<288x8xbf16>,
    %c20 = arith.constant 20 : index
    %c0_21 = arith.constant 0 : index
    %28 = vector.load %arg14[%c20, %c0_21] : memref<342x8xbf16, #tpu.memory_space<vmem>>, vector<288x8xbf16>
    %c0_22 = arith.constant 0 : index
    %c40 = arith.constant 40 : index
    %29 = vector.load %arg15[%c0_22, %c40] : memref<288x72xbf16, #tpu.memory_space<vmem>>, vector<288x8xbf16>
    tpu.vector_store %arg15[%c0_22, %c40], %28 {strides = array<i32>} : memref<288x72xbf16, #tpu.memory_space<vmem>>, vector<288x8xbf16>,
    %c36 = arith.constant 36 : index
    %c0_23 = arith.constant 0 : index
    %30 = vector.load %arg14[%c36, %c0_23] : memref<342x8xbf16, #tpu.memory_space<vmem>>, vector<288x8xbf16>
    %c0_24 = arith.constant 0 : index
    %c48 = arith.constant 48 : index
    %31 = vector.load %arg15[%c0_24, %c48] : memref<288x72xbf16, #tpu.memory_space<vmem>>, vector<288x8xbf16>
    tpu.vector_store %arg15[%c0_24, %c48], %30 {strides = array<i32>} : memref<288x72xbf16, #tpu.memory_space<vmem>>, vector<288x8xbf16>,
    %c37 = arith.constant 37 : index
    %c0_25 = arith.constant 0 : index
    %32 = vector.load %arg14[%c37, %c0_25] : memref<342x8xbf16, #tpu.memory_space<vmem>>, vector<288x8xbf16>
    %c0_26 = arith.constant 0 : index
    %c56 = arith.constant 56 : index
    %33 = vector.load %arg15[%c0_26, %c56] : memref<288x72xbf16, #tpu.memory_space<vmem>>, vector<288x8xbf16>
    tpu.vector_store %arg15[%c0_26, %c56], %32 {strides = array<i32>} : memref<288x72xbf16, #tpu.memory_space<vmem>>, vector<288x8xbf16>,
    %c38 = arith.constant 38 : index
    %c0_27 = arith.constant 0 : index
    %34 = vector.load %arg14[%c38, %c0_27] : memref<342x8xbf16, #tpu.memory_space<vmem>>, vector<288x8xbf16>
    %c0_28 = arith.constant 0 : index
    %c64 = arith.constant 64 : index
    %35 = vector.load %arg15[%c0_28, %c64] : memref<288x72xbf16, #tpu.memory_space<vmem>>, vector<288x8xbf16>
    tpu.vector_store %arg15[%c0_28, %c64], %34 {strides = array<i32>} : memref<288x72xbf16, #tpu.memory_space<vmem>>, vector<288x8xbf16>,
    %c0_29 = arith.constant 0 : index
    %c0_30 = arith.constant 0 : index
    %36 = vector.load %arg15[%c0_29, %c0_30] : memref<288x72xbf16, #tpu.memory_space<vmem>>, vector<288x72xbf16>
    %c0_31 = arith.constant 0 : index
    %c0_32 = arith.constant 0 : index
    %37 = vector.load %arg7[%c0_31, %c0_32] : memref<72x8xbf16, #tpu.memory_space<vmem>>, vector<72x8xbf16>
    %cst_33 = arith.constant dense<0.000000e+00> : vector<288x8xf32>
    %38 = tpu.matmul %36, %37, %cst_33 {dimension_numbers = #tpu.dot_dimension_numbers<[1], [0], [0], [1], [0, 0, 1, 1], [], []>} : vector<288x72xbf16>, vector<72x8xbf16>, vector<288x8xf32> -> vector<288x8xf32>
    %c0_34 = arith.constant 0 : index
    %c0_35 = arith.constant 0 : index
    %39 = vector.load %arg8[%c0_34, %c0_35] : memref<1x8xf32, #tpu.memory_space<vmem>>, vector<1x8xf32>
    %40 = vector.broadcast %39 : vector<1x8xf32> to vector<288x8xf32>
    %41 = arith.addf %38, %40 : vector<288x8xf32>
    %cst_36 = arith.constant 0.000000e+00 : f32
    %42 = vector.broadcast %cst_36 : f32 to vector<288x8xf32>
    %43 = arith.maximumf %41, %42 : vector<288x8xf32>
    %44 = arith.truncf %43 : vector<288x8xf32> to vector<288x8xbf16>
    %45 = vector.shape_cast %44 : vector<288x8xbf16> to vector<16x18x8xbf16>
    %46 = vector.extract_strided_slice %45 {offsets = [0, 0, 0], sizes = [16, 16, 8], strides = [1, 1, 1]} : vector<16x18x8xbf16> to vector<16x16x8xbf16>
    %47 = vector.shape_cast %46 : vector<16x16x8xbf16> to vector<256x8xbf16>
    %c0_37 = arith.constant 0 : index
    %c0_38 = arith.constant 0 : index
    %48 = vector.load %arg9[%c0_37, %c0_38] : memref<8x32xbf16, #tpu.memory_space<vmem>>, vector<8x32xbf16>
    %cst_39 = arith.constant dense<0.000000e+00> : vector<256x32xf32>
    %49 = tpu.matmul %47, %48, %cst_39 {dimension_numbers = #tpu.dot_dimension_numbers<[1], [0], [0], [1], [0, 0, 1, 1], [], []>} : vector<256x8xbf16>, vector<8x32xbf16>, vector<256x32xf32> -> vector<256x32xf32>
    %c0_40 = arith.constant 0 : index
    %c0_41 = arith.constant 0 : index
    %50 = vector.load %arg10[%c0_40, %c0_41] : memref<1x32xf32, #tpu.memory_space<vmem>>, vector<1x32xf32>
    %51 = vector.broadcast %50 : vector<1x32xf32> to vector<256x32xf32>
    %52 = arith.addf %49, %51 : vector<256x32xf32>
    %c0_42 = arith.constant 0 : index
    %c0_43 = arith.constant 0 : index
    %c0_44 = arith.constant 0 : index
    %53 = vector.load %arg3[%c0_42, %c0_43, %c0_44] : memref<1x256x8xbf16, #tpu.memory_space<vmem>>, vector<1x256x8xbf16>
    %54 = vector.shape_cast %53 : vector<1x256x8xbf16> to vector<256x8xbf16>
    %c0_45 = arith.constant 0 : index
    %c0_46 = arith.constant 0 : index
    %55 = vector.load %arg11[%c0_45, %c0_46] : memref<8x32xbf16, #tpu.memory_space<vmem>>, vector<8x32xbf16>
    %cst_47 = arith.constant dense<0.000000e+00> : vector<256x32xf32>
    %56 = tpu.matmul %54, %55, %cst_47 {dimension_numbers = #tpu.dot_dimension_numbers<[1], [0], [0], [1], [0, 0, 1, 1], [], []>} : vector<256x8xbf16>, vector<8x32xbf16>, vector<256x32xf32> -> vector<256x32xf32>
    %57 = arith.addf %52, %56 : vector<256x32xf32>
    %c0_48 = arith.constant 0 : index
    %c0_49 = arith.constant 0 : index
    %58 = vector.load %arg12[%c0_48, %c0_49] : memref<1x32xf32, #tpu.memory_space<vmem>>, vector<1x32xf32>
    %59 = vector.broadcast %58 : vector<1x32xf32> to vector<256x32xf32>
    %60 = arith.addf %57, %59 : vector<256x32xf32>
    %cst_50 = arith.constant 0.000000e+00 : f32
    %61 = vector.broadcast %cst_50 : f32 to vector<256x32xf32>
    %62 = arith.maximumf %60, %61 : vector<256x32xf32>
    %63 = vector.shape_cast %62 : vector<256x32xf32> to vector<1x256x32xf32>
    %64 = arith.truncf %63 : vector<1x256x32xf32> to vector<1x256x32xbf16>
    %c0_51 = arith.constant 0 : index
    %c0_52 = arith.constant 0 : index
    %c0_53 = arith.constant 0 : index
    %65 = vector.load %arg13[%c0_51, %c0_52, %c0_53] : memref<1x256x32xbf16, #tpu.memory_space<vmem>>, vector<1x256x32xbf16>
    tpu.vector_store %arg13[%c0_51, %c0_52, %c0_53], %64 {strides = array<i32>} : memref<1x256x32xbf16, #tpu.memory_space<vmem>>, vector<1x256x32xbf16>,
    return
  }
  func.func @transform_0(%arg0: i32, %arg1: i32) -> (i32, i32, i32) {
    %c0_i32 = arith.constant 0 : i32
    %c0_i32_0 = arith.constant 0 : i32
    %c0_i32_1 = arith.constant 0 : i32
    return %arg0, %c0_i32, %c0_i32_0 : i32, i32, i32
  }
  func.func @transform_1(%arg0: i32, %arg1: i32) -> (i32, i32, i32) {
    %c0_i32 = arith.constant 0 : i32
    %c0_i32_0 = arith.constant 0 : i32
    return %arg0, %arg1, %c0_i32 : i32, i32, i32
  }
  func.func @transform_2(%arg0: i32, %arg1: i32) -> (i32, i32) {
    %c0_i32 = arith.constant 0 : i32
    %c0_i32_0 = arith.constant 0 : i32
    %c0_i32_1 = arith.constant 0 : i32
    return %c0_i32, %c0_i32_0 : i32, i32
  }
  func.func @transform_3(%arg0: i32, %arg1: i32) -> (i32, i32) {
    %c0_i32 = arith.constant 0 : i32
    %c0_i32_0 = arith.constant 0 : i32
    %c0_i32_1 = arith.constant 0 : i32
    return %c0_i32, %c0_i32_0 : i32, i32
  }
  func.func @transform_4(%arg0: i32, %arg1: i32) -> (i32, i32) {
    %c0_i32 = arith.constant 0 : i32
    %c0_i32_0 = arith.constant 0 : i32
    %c0_i32_1 = arith.constant 0 : i32
    return %c0_i32, %c0_i32_0 : i32, i32
  }
  func.func @transform_5(%arg0: i32, %arg1: i32) -> (i32, i32) {
    %c0_i32 = arith.constant 0 : i32
    %c0_i32_0 = arith.constant 0 : i32
    %c0_i32_1 = arith.constant 0 : i32
    return %c0_i32, %c0_i32_0 : i32, i32
  }
  func.func @transform_6(%arg0: i32, %arg1: i32) -> (i32, i32) {
    %c0_i32 = arith.constant 0 : i32
    %c0_i32_0 = arith.constant 0 : i32
    %c0_i32_1 = arith.constant 0 : i32
    return %c0_i32, %c0_i32_0 : i32, i32
  }
  func.func @transform_7(%arg0: i32, %arg1: i32) -> (i32, i32) {
    %c0_i32 = arith.constant 0 : i32
    %c0_i32_0 = arith.constant 0 : i32
    %c0_i32_1 = arith.constant 0 : i32
    return %c0_i32, %c0_i32_0 : i32, i32
  }
  func.func @transform_8(%arg0: i32, %arg1: i32) -> (i32, i32) {
    %c0_i32 = arith.constant 0 : i32
    %c0_i32_0 = arith.constant 0 : i32
    %c0_i32_1 = arith.constant 0 : i32
    return %c0_i32, %c0_i32_0 : i32, i32
  }
  func.func @transform_9(%arg0: i32, %arg1: i32) -> (i32, i32) {
    %c0_i32 = arith.constant 0 : i32
    %c0_i32_0 = arith.constant 0 : i32
    %c0_i32_1 = arith.constant 0 : i32
    return %c0_i32, %c0_i32_0 : i32, i32
  }
  func.func @transform_10(%arg0: i32, %arg1: i32) -> (i32, i32) {
    %c0_i32 = arith.constant 0 : i32
    %c0_i32_0 = arith.constant 0 : i32
    %c0_i32_1 = arith.constant 0 : i32
    return %c0_i32, %c0_i32_0 : i32, i32
  }
  func.func @transform_11(%arg0: i32, %arg1: i32) -> (i32, i32, i32) {
    %c0_i32 = arith.constant 0 : i32
    %c0_i32_0 = arith.constant 0 : i32
    return %arg0, %arg1, %c0_i32 : i32, i32, i32
  }
}

</mosaic_0001>

<bundles_post_ra>
// kernel: tpu_custom_call.1
= control target key start
LH: loop header
LB: loop body
LE: loop exit
PB: predicated region body
PF: predicated region fallthrough
CT: control target
= control target key end

     0   :  { %s8393_s17 = smov 0   ;;  %s8395_s18 = smov 0   ;;  %s10559_s0 = inlined_call_operand.vmem [shape: bf16[2,342,8], index: 0, kind: input, shape index: {}]   ;;  %s10560_s1 = inlined_call_operand.vmem [shape: bf16[2,256,8], index: 1, kind: input, shape index: {}]   ;;  %s10561_s2 = inlined_call_operand.vmem [shape: bf16[342,1], index: 2, kind: input, shape index: {}]   ;;  %s10562_s3 = inlined_call_operand.vmem [shape: bf16[8,8], index: 3, kind: input, shape index: {}]   ;;  %s10563_s4 = inlined_call_operand.vmem [shape: f32[1,8], index: 4, kind: input, shape index: {}]   ;;  %s10564_s5 = inlined_call_operand.vmem [shape: bf16[72,8], index: 5, kind: input, shape index: {}]   ;;  %s10565_s6 = inlined_call_operand.vmem [shape: f32[1,8], index: 6, kind: input, shape index: {}]   ;;  %s10566_s7 = inlined_call_operand.vmem [shape: bf16[8,32], index: 7, kind: input, shape index: {}]   ;;  %s10567_s8 = inlined_call_operand.vmem [shape: f32[1,32], index: 8, kind: input, shape index: {}]   ;;  %s10568_s9 = inlined_call_operand.vmem [shape: bf16[8,32], index: 9, kind: input, shape index: {}]   ;;  %s10569_s10 = inlined_call_operand.vmem [shape: f32[1,32], index: 10, kind: input, shape index: {}]   ;;  %s10570_s11 = inlined_call_operand.vmem [shape: bf16[2,256,32], index: 11, kind: output, shape index: {}]  }
   0x1   :  { %s8397_s19 = smov 0  }
   0x2 LB: > { %s33_s20 = sadd.s32 1, %s8316_s18  ;;  %p7271_p0 = scmp.ge.s32.totalorder %s8320_s19, 1  ;;  %s8320_s19 = sphi %s8397_s19, %s21_s19   ;;  %s8316_s18 = sphi %s8395_s18, %s10610_s18   ;;  %s8312_s17 = sphi %s8393_s17, %s10609_s17  }
   0x3   : > { %p35_p1 = scmp.ge.s32.totalorder %s33_s20, 2  ;;  %p368_p2 = scmp.lt.s32.totalorder %s8320_s19, 3 }
   0x5   : > { %s10612_s20 = smov (%p35_p1, %s33_s20), 0  ;;  %p369_p3 = pnand %p7271_p0, %p368_p2 }
   0x6   : > { %v959_v0 = vld [vmem:[%s10561_s2 + $0x8] sm:$0xf] (!%p369_p3)  ;;  %v957_v1 = vld [vmem:[%s10561_s2] sm:$0xf] (!%p369_p3)  ;;  %vm678_vm0 = vcmask (!%p369_p3), 1043456   ;;  %v8322_v2 = vmov (!%p369_p3), 0  }
   0x7   : > { %372 = sbr.rel (%p369_p3) target bundleno = 1205 (0x4b5), region = 64  ;;  %8081 = vset.pattern.permute.xlu1 (!%p369_p3), %v8322_v2  ;;  %8080 = vset.pattern.permute.xlu0 (!%p369_p3), %v8322_v2  ;;  %v495_v3 = vld [vmem:[%s10562_s3] sm:$0xf] (!%p369_p3)  ;;  %p421_p4 = scmp.lt.s32.totalorder (!%p369_p3), %s8312_s17, 1  ;;  %v960_v5 = vld [vmem:[%s10561_s2 + $0xc] sm:$0xf] (!%p369_p3) }
   0x8   : > { %1026 = vperm.xlu1 (!%p369_p3), %8081, %v959_v0   ;;  %1002 = vperm.xlu0 (!%p369_p3), %8080, %v957_v1   ;;  %v680_v4 = vsel (!%p369_p3), %vm678_vm0, %v495_v3, 0  ;;  %v958_v6 = vld [vmem:[%s10561_s2 + $0x4] sm:$0xf] (!%p369_p3)  ;;  %v962_v7 = vld [vmem:[%s10561_s2 + $0x14] sm:$0xf] (!%p369_p3)  ;;  %vm10574_vm1 = vcmask (!%p369_p3), 64512  }
   0x9   : > { %8039 = vmatprep.subr.msk.bf16.mxu0 (!%p369_p3), %vm678_vm0, %v495_v3  ;;  %8040 = vmatprep.subr.msk.bf16.mxu1 (!%p369_p3), %vm678_vm0, %v495_v3  ;;  %v961_v8 = vld [vmem:[%s10561_s2 + $0x10] sm:$0xf] (!%p369_p3)  ;;  %v964_v10 = vld [vmem:[%s10561_s2 + $0x1c] sm:$0xf] (!%p369_p3)  ;;  %v963_v12 = vld [vmem:[%s10561_s2 + $0x18] sm:$0xf] (!%p369_p3) }
   0xa   : > { %7814 = vmatpush3.bf16.msra.mxu0 (!%p369_p3), %v680_v4  ;;  %7974 = vmatpush3.bf16.msra.mxu1 (!%p369_p3), %v680_v4  ;;  %v966_v17 = vld [vmem:[%s10561_s2 + $0x24] sm:$0xf] (!%p369_p3)  ;;  %v965_v18 = vld [vmem:[%s10561_s2 + $0x20] sm:$0xf] (!%p369_p3)  ;;  %v968_v20 = vld [vmem:[%s10561_s2 + $0x2c] sm:$0xf] (!%p369_p3) }
   0xb   : > { %v967_v23 = vld [vmem:[%s10561_s2 + $0x28] sm:$0xf] (!%p369_p3)  ;;  %v970_v24 = vld [vmem:[%s10561_s2 + $0x34] sm:$0xf] (!%p369_p3)  ;;  %v969_v25 = vld [vmem:[%s10561_s2 + $0x30] sm:$0xf] (!%p369_p3) }
   0xc   : > { %1038 = vperm.xlu1 (!%p369_p3), %8081, %v960_v5   ;;  %1014 = vperm.xlu0 (!%p369_p3), %8080, %v958_v6   ;;  %v972_v27 = vld [vmem:[%s10561_s2 + $0x3c] sm:$0xf] (!%p369_p3)  ;;  %v971_v29 = vld [vmem:[%s10561_s2 + $0x38] sm:$0xf] (!%p369_p3)  ;;  %v974_v30 = vld [vmem:[%s10561_s2 + $0x44] sm:$0xf] (!%p369_p3) }
   0xd   : > { %v973_v31 = vld [vmem:[%s10561_s2 + $0x40] sm:$0xf] (!%p369_p3)  ;;  %v976_v33 = vld [vmem:[%s10561_s2 + $0x4c] sm:$0xf] (!%p369_p3)  ;;  %v975_v35 = vld [vmem:[%s10561_s2 + $0x48] sm:$0xf] (!%p369_p3) }
   0xe   : > { %s10614_s17 = smov (!%p421_p4, %s8312_s17), 1  ;;  %v978_v36 = vld [vmem:[%s10561_s2 + $0x54] sm:$0xf]  ;;  %v977_v37 = vld [vmem:[%s10561_s2 + $0x50] sm:$0xf]  ;;  %vm1819_vm2 = vcmask 60416  }
   0xf   : > { %s8044_s12 = smul.u32 172, %s10614_s17  ;;  %v980_v39 = vld [vmem:[%s10561_s2 + $0x5c] sm:$0xf]  ;;  %v979_v41 = vld [vmem:[%s10561_s2 + $0x58] sm:$0xf]  ;;  %vm2508_vm3 = vcmask 1046528  }
  0x10   : > { %1062 = vperm.xlu1 %8081, %v962_v7   ;;  %1050 = vperm.xlu0 %8080, %v961_v8   ;;  %v982_v42 = vld [vmem:[%s10561_s2 + $0x64] sm:$0xf]  ;;  %v981_v43 = vld [vmem:[%s10561_s2 + $0x60] sm:$0xf]  ;;  %v984_v45 = vld [vmem:[%s10561_s2 + $0x6c] sm:$0xf] }
  0x11   : > { %s8441_s23 = scalar_lea.vmem %s10559_s0, %s8044_s12  ;;  %v983_v47 = vld [vmem:[%s10561_s2 + $0x68] sm:$0xf]  ;;  %v986_v48 = vld [vmem:[%s10561_s2 + $0x74] sm:$0xf]  ;;  %v985_v49 = vld [vmem:[%s10561_s2 + $0x70] sm:$0xf] }
  0x12   : > { %v8082_v9 = vld [vmem:[%s8441_s23] sm:$0xff]   ;;  %v8084_v13 = vld [vmem:[%s8441_s23 + $0x8] sm:$0xff]   ;;  %v8086_v15 = vld [vmem:[%s8441_s23 + $0x10] sm:$0xff]   ;;  %vm3363_vm4 = vcmask 1045504   ;;  %s8324_s27 = smov 24   ;;  %s8325_s28 = smov 16  }
  0x13   : > { %v8083_v11 = vld [vmem:[%s8441_s23 + $0x20] sm:$0xff]   ;;  %7815 = vmatprep.mubr.msk.bf16.mxu0 %vm10574_vm1, %v8082_v9  ;;  %v8085_v14 = vld [vmem:[%s8441_s23 + $0x28] sm:$0xff]   ;;  %v8087_v16 = vld [vmem:[%s8441_s23 + $0x30] sm:$0xff]   ;;  %vm2989_vm5 = vsmask.f32 6400  ;;  %vm4218_vm6 = vcmask 1044480  }
  0x14   : > { %7823 = vmatprep.mubr.msk.bf16.mxu1 %vm10574_vm1, %v8083_v11  ;;  %7816 = vmatmul.mubr.msk.bf16.vlgmr.msra.gmra.mrb[0].mxu0 %vm10574_vm1, %v8084_v13  ;;  %v8088_v19 = vld [vmem:[%s8441_s23 + $0x18] sm:$0xff]   ;;  %v8090_v22 = vld [vmem:[%s8441_s23 + $0x40] sm:$0xff]   ;;  %v8091_v26 = vld [vmem:[%s8441_s23 + $0x48] sm:$0xff]   ;;  %s8326_s29 = smov 40   ;;  %vm2156_vm7 = vsmask.f32 7424 }
  0x15   : > { %7824 = vmatmul.mubr.msk.bf16.vlgmr.msra.gmra.mrb[0].mxu1 %vm10574_vm1, %v8085_v14  ;;  %1086 = vperm.xlu1 %8081, %v964_v10   ;;  %v8089_v21 = vld [vmem:[%s8441_s23 + $0x38] sm:$0xff]   ;;  %v8092_v28 = vld [vmem:[%s8441_s23 + $0x50] sm:$0xff]   ;;  %v8094_v34 = vld [vmem:[%s8441_s23 + $0x60] sm:$0xff]   ;;  %s8327_s30 = smov 48   ;;  %s8328_s12 = smov 32   ;;  %vm2359_vm9 = vcmask 130112  }
  0x16   : > { %1074 = vperm.xlu0 %8080, %v963_v12   ;;  %7819 = vmatprep.mubr.msk.bf16.mxu0 %vm10574_vm1, %v8086_v15  ;;  %v8093_v32 = vld [vmem:[%s8441_s23 + $0x58] sm:$0xff]   ;;  %v8095_v38 = vld [vmem:[%s8441_s23 + $0x68] sm:$0xff]   ;;  %v8096_v40 = vld [vmem:[%s8441_s23 + $0x70] sm:$0xff]   ;;  %s8329_s13 = smov 64   ;;  %s8330_s14 = smov 8   ;;  %vm2600_vm10 = vcmask 195712  }
  0x17   : > { %7827 = vmatprep.mubr.msk.bf16.mxu1 %vm10574_vm1, %v8087_v16  ;;  %v8097_v44 = vld [vmem:[%s8441_s23 + $0x78] sm:$0xff]   ;;  %v8098_v46 = vld [vmem:[%s8441_s23 + $0x80] sm:$0xff]   ;;  %v8099_v50 = vld [vmem:[%s8441_s23 + $0x88] sm:$0xff]   ;;  %vm3844_vm8 = vsmask.f32 5376  ;;  %s8331_s15 = smov 56  }
  0x18   : > { %v988_v51 = vld [vmem:[%s10561_s2 + $0x7c] sm:$0xf]  ;;  %v8100_v52 = vld [vmem:[%s8441_s23 + $0x90] sm:$0xff]   ;;  %v987_v53 = vld [vmem:[%s10561_s2 + $0x78] sm:$0xf]  ;;  %vm2840_vm11 = vcmask 261312  }
  0x19   : > { %1110 = vperm.xlu1 %8081, %v966_v17   ;;  %v990_v54 = vld [vmem:[%s10561_s2 + $0x84] sm:$0xf]  ;;  %v989_v55 = vld [vmem:[%s10561_s2 + $0x80] sm:$0xf]  ;;  %v8101_v56 = vld [vmem:[%s8441_s23 + $0x98] sm:$0xff]   ;;  %vm3214_vm12 = vcmask 326912  }
  0x1a   : > { %1098 = vperm.xlu0 %8080, %v965_v18   ;;  %v992_v57 = vld [vmem:[%s10561_s2 + $0x8c] sm:$0xf]  ;;  %v8102_v58 = vld [vmem:[%s8441_s23 + $0xa0] sm:$0xff]   ;;  %v991_v59 = vld [vmem:[%s10561_s2 + $0x88] sm:$0xf]  ;;  %vm3455_vm13 = vcmask 392512  }
  0x1b   : > { %v994_v60 = vld [vmem:[%s10561_s2 + $0x94] sm:$0xf]  ;;  %v993_v61 = vld [vmem:[%s10561_s2 + $0x90] sm:$0xf]  ;;  %v996_v63 = vld [vmem:[%s10561_s2 + $0x9c] sm:$0xf] }
  0x1c   : > { %7820 = vmatmul.mubr.msk.bf16.gmra.mrb[4].mxu0 %vm10574_vm1, %v8088_v19  ;;  %v8103_v62 = vld [vmem:[%s8441_s23 + $0xa8] ss:$0 sps:$4 sm:$0x77]   ;;  %v995_v0 = vld [vmem:[%s10561_s2 + $0x98] sm:$0xf]  ;;  %vm3695_vm14 = vcmask 458112  }
  0x1d   : > { %7828 = vmatmul.mubr.msk.bf16.gmra.mrb[4].mxu1 %vm10574_vm1, %v8089_v21  ;;  %1134 = vperm.xlu1 %8081, %v968_v20   ;;  %v998_v1 = vld [vmem:[%s10561_s2 + $0xa4] sm:$0xf]  ;;  %v997_v2 = vld [vmem:[%s10561_s2 + $0xa0] sm:$0xf]  ;;  %vm4069_vm15 = vcmask 523712   ;;  %s7699_s23 = sshll.u32 %s10614_s17, 7 }
  0x1e   : > { %1122 = vperm.xlu0 %8080, %v967_v23   ;;  %7831 = vmatprep.mubr.msk.bf16.mxu1 %vm10574_vm1, %v8090_v22  ;;  %v8323_v23 = vmov 839922192   ;;  %s10241_s21 = scalar_lea.vmem %s10560_s1, %s7699_s23 }
  0x21   : > { %1158 = vperm.xlu1 %8081, %v970_v24   ;;  %v1006_v24 = vunpack.c.l.s4 %v8323_v23 }
  0x22   : > { %1146 = vperm.xlu0 %8080, %v969_v25   ;;  %v1008_v25 = vlaneseq }
  0x25   : > { %7832 = vmatmul.mubr.msk.bf16.gmra.mrb[8].mxu1 %vm10574_vm1, %v8091_v26  ;;  %1182 = vperm.xlu1 %8081, %v972_v27  }
  0x26   : > { %1170 = vperm.xlu0 %8080, %v971_v29   ;;  %7835 = vmatprep.mubr.msk.bf16.mxu1 %vm10574_vm1, %v8092_v28  ;;  %v1007_v28 = vunpack.c.0.s8 %v1006_v24  ;;  %v8603_v29 = vshrl.u32 %v1008_v25, 7 }
  0x29   : > { %1206 = vperm.xlu1 %8081, %v974_v30  }
  0x2a   : > { %1194 = vperm.xlu0 %8080, %v973_v31  }
  0x2d   : > { %7836 = vmatmul.mubr.msk.bf16.gmra.mrb[12].mxu1 %vm10574_vm1, %v8093_v32  ;;  %1230 = vperm.xlu1 %8081, %v976_v33   ;;  %v8610_v32 = vsub.s32 %v1007_v28, %v8603_v29 }
  0x2e   : > { %1218 = vperm.xlu0 %8080, %v975_v35   ;;  %7839 = vmatprep.mubr.msk.bf16.mxu1 %vm10574_vm1, %v8094_v34 }
  0x31   : > { %1254 = vperm.xlu1 %8081, %v978_v36  }
  0x32   : > { %1242 = vperm.xlu0 %8080, %v977_v37  }
  0x35   : > { %7840 = vmatmul.mubr.msk.bf16.gmra.mrb[16].mxu1 %vm10574_vm1, %v8095_v38  ;;  %1278 = vperm.xlu1 %8081, %v980_v39  }
  0x36   : > { %1266 = vperm.xlu0 %8080, %v979_v41   ;;  %7843 = vmatprep.mubr.msk.bf16.mxu1 %vm10574_vm1, %v8096_v40 }
  0x39   : > { %1302 = vperm.xlu1 %8081, %v982_v42  }
  0x3a   : > { %1290 = vperm.xlu0 %8080, %v981_v43  }
  0x3d   : > { %7844 = vmatmul.mubr.msk.bf16.gmra.mrb[20].mxu1 %vm10574_vm1, %v8097_v44  ;;  %1326 = vperm.xlu1 %8081, %v984_v45  }
  0x3e   : > { %1314 = vperm.xlu0 %8080, %v983_v47   ;;  %7847 = vmatprep.mubr.msk.bf16.mxu1 %vm10574_vm1, %v8098_v46 }
  0x41   : > { %1350 = vperm.xlu1 %8081, %v986_v48  }
  0x42   : > { %1338 = vperm.xlu0 %8080, %v985_v49  }
  0x45   : > { %7848 = vmatmul.mubr.msk.bf16.gmra.mrb[24].mxu1 %vm10574_vm1, %v8099_v50  ;;  %1374 = vperm.xlu1 %8081, %v988_v51  }
  0x46   : > { %1362 = vperm.xlu0 %8080, %v987_v53   ;;  %7851 = vmatprep.mubr.msk.bf16.mxu1 %vm10574_vm1, %v8100_v52  ;;  %v8637_v53 = vld [vmem:[%s10563_s4] ss:$0 sm:$0xff] }
  0x49   : > { %1398 = vperm.xlu1 %8081, %v990_v54  }
  0x4a   : > { %1386 = vperm.xlu0 %8080, %v989_v55  }
  0x4d   : > { %7852 = vmatmul.mubr.msk.bf16.gmra.mrb[28].mxu1 %vm10574_vm1, %v8101_v56  ;;  %1422 = vperm.xlu1 %8081, %v992_v57  }
  0x4e   : > { %1410 = vperm.xlu0 %8080, %v991_v59   ;;  %7855 = vmatprep.mubr.msk.bf16.mxu1 %vm10574_vm1, %v8102_v58 }
  0x51   : > { %1446 = vperm.xlu1 %8081, %v994_v60  }
  0x52   : > { %1434 = vperm.xlu0 %8080, %v993_v61  }
  0x55   : > { %7856 = vmatmul.mubr.msk.bf16.gmra.mrb[32].mxu1 %vm10574_vm1, %v8103_v62  ;;  %1470 = vperm.xlu1 %8081, %v996_v63  }
  0x56   : > { %1458 = vperm.xlu0 %8080, %v995_v0  }
  0x59   : > { %1494 = vperm.xlu1 %8081, %v998_v1  }
  0x5a   : > { %1482 = vperm.xlu0 %8080, %v997_v2  }
  0x87   : > { %v1027_v3 = vpop.permute.xlu1 %1026  ;;  %v1003_v4 = vpop.permute.xlu0 %1002 }
  0x88   : > { %v1035_v33 = vrot.slane %v1027_v3, %v8610_v32  ;;  %v1011_v34 = vrot.slane %v1003_v4, %v8610_v32 }
  0x8b   : > { %v1039_v5 = vpop.permute.xlu1 %1038  ;;  %v1015_v6 = vpop.permute.xlu0 %1014 }
  0x8c   : > { %v1047_v36 = vrot.slane %v1039_v5, %v8610_v32  ;;  %v1023_v37 = vrot.slane %v1015_v6, %v8610_v32 }
  0x8e   : > { %v7323_v54 = vcombine.low %v1035_v33, %v1047_v36  ;;  %v7322_v55 = vcombine.low %v1011_v34, %v1023_v37 }
  0x8f   : > { %v1063_v7 = vpop.permute.xlu1 %1062  ;;  %v1051_v8 = vpop.permute.xlu0 %1050 }
  0x90   : > { %v1071_v38 = vrot.slane %v1063_v7, %v8610_v32  ;;  %v1059_v39 = vrot.slane %v1051_v8, %v8610_v32 }
  0x92   : > { %v8639_v56 = vcombine.low %v1059_v39, %v1071_v38 }
  0x94   : > { %v1087_v9 = vpop.permute.xlu1 %1086 }
  0x95   : > { %v1075_v10 = vpop.permute.xlu0 %1074  ;;  %v1095_v41 = vrot.slane %v1087_v9, %v8610_v32 }
  0x96   : > { %v1083_v42 = vrot.slane %v1075_v10, %v8610_v32 }
  0x98   : > { %v1111_v11 = vpop.permute.xlu1 %1110  ;;  %v8643_v58 = vcombine.low %v1083_v42, %v1095_v41 }
  0x99   : > { %v1099_v12 = vpop.permute.xlu0 %1098  ;;  %v1119_v43 = vrot.slane %v1111_v11, %v8610_v32 }
  0x9a   : > { %v1107_v44 = vrot.slane %v1099_v12, %v8610_v32 }
  0x9c   : > { %v1135_v13 = vpop.permute.xlu1 %1134  ;;  %v7326_v59 = vcombine.low %v1107_v44, %v1119_v43 }
  0x9d   : > { %v1123_v14 = vpop.permute.xlu0 %1122  ;;  %v1143_v45 = vrot.slane %v1135_v13, %v8610_v32 }
  0x9e   : > { %v1131_v46 = vrot.slane %v1123_v14, %v8610_v32 }
  0xa0   : > { %v1159_v15 = vpop.permute.xlu1 %1158  ;;  %v7327_v60 = vcombine.low %v1131_v46, %v1143_v45 }
  0xa1   : > { %v1147_v16 = vpop.permute.xlu0 %1146  ;;  %v1167_v47 = vrot.slane %v1159_v15, %v8610_v32 }
  0xa2   : > { %v1155_v48 = vrot.slane %v1147_v16, %v8610_v32 }
  0xa4   : > { %v1183_v17 = vpop.permute.xlu1 %1182  ;;  %v8645_v61 = vcombine.low %v1155_v48, %v1167_v47 }
  0xa5   : > { %v1171_v18 = vpop.permute.xlu0 %1170  ;;  %v1191_v49 = vrot.slane %v1183_v17, %v8610_v32 }
  0xa6   : > { %v1179_v50 = vrot.slane %v1171_v18, %v8610_v32 }
  0xa8   : > { %v1207_v19 = vpop.permute.xlu1 %1206  ;;  %v8649_v0 = vcombine.low %v1179_v50, %v1191_v49 }
  0xa9   : > { %v1195_v20 = vpop.permute.xlu0 %1194  ;;  %v1215_v51 = vrot.slane %v1207_v19, %v8610_v32 }
  0xaa   : > { %v1203_v52 = vrot.slane %v1195_v20, %v8610_v32 }
  0xac   : > { %v8595_v21 = vpop.permute.xlu1 %1230  ;;  %v8651_v1 = vcombine.low %v1203_v52, %v1215_v51 }
  0xad   : > { %v8597_v22 = vpop.permute.xlu0 %1218  ;;  %v1239_v2 = vrot.slane %v8595_v21, %v8610_v32 }
  0xae   : > { %v1227_v6 = vrot.slane %v8597_v22, %v8610_v32 }
  0xb0   : > { %v8599_v26 = vpop.permute.xlu1 %1254 }
  0xb1   : > { %v8601_v27 = vpop.permute.xlu0 %1242  ;;  %v1263_v7 = vrot.slane %v8599_v26, %v8610_v32 }
  0xb2   : > { %v1251_v12 = vrot.slane %v8601_v27, %v8610_v32 }
  0xb4   : > { %v8605_v30 = vpop.permute.xlu1 %1278 }
  0xb5   : > { %v8607_v31 = vpop.permute.xlu0 %1266  ;;  %v1287_v13 = vrot.slane %v8605_v30, %v8610_v32 }
  0xb6   : > { %v1275_v18 = vrot.slane %v8607_v31, %v8610_v32 }
  0xb8   : > { %v8614_v35 = vpop.permute.xlu1 %1302  ;;  %v8720_v21 = vcombine.low %v1275_v18, %v1287_v13 }
  0xb9   : > { %v8620_v40 = vpop.permute.xlu0 %1290  ;;  %v1311_v25 = vrot.slane %v8614_v35, %v8610_v32 }
  0xba   : > { %v1299_v36 = vrot.slane %v8620_v40, %v8610_v32 }
  0xbc   : > { %v8641_v57 = vpop.permute.xlu1 %1326  ;;  %v8731_v30 = vcombine.low %v1299_v36, %v1311_v25 }
  0xbd   : > { %v8647_v62 = vpop.permute.xlu0 %1314  ;;  %v1335_v41 = vrot.slane %v8641_v57, %v8610_v32 }
  0xbe   : > { %v1323_v46 = vrot.slane %v8647_v62, %v8610_v32 }
  0xc0   : > { %v1351_v42 = vpop.permute.xlu1 %1350  ;;  %v8733_v31 = vcombine.low %v1323_v46, %v1335_v41 }
  0xc1   : > { %v1359_v47 = vrot.slane %v1351_v42, %v8610_v32  ;;  %v1339_v48 = vpop.permute.xlu0 %1338 }
  0xc2   : > { %v1347_v52 = vrot.slane %v1339_v48, %v8610_v32  ;;  %v8712_v48 = vcombine.low %v1251_v12, %v1263_v7 }
  0xc4   : > { %v8735_v7 = vcombine.low %v1347_v52, %v1359_v47 }
  0xc5   : > { %v1363_v18 = vpop.permute.xlu0 %1362 }
  0xc6   : > { %v1371_v40 = vrot.slane %v1363_v18, %v8610_v32 }
  0xe7   : > { %v7817_v63 = vpop.f32.mrb[0].mxu0 }
  0xe8   : > { %v725_v3 = vadd.f32 %v7817_v63, %v8637_v53  ;;  %v7825_v4 = vpop.f32.mrb[0].mxu1  ;;  %v716_v5 = vpop.f32.mrb[1].mxu0 }
  0xe9   : > { %v757_v8 = vadd.f32 %v7825_v4, %v8637_v53  ;;  %v717_v9 = vadd.f32 %v8637_v53, %v716_v5  ;;  %v748_v10 = vpop.f32.mrb[1].mxu1  ;;  %v7818_v11 = vpop.f32.mrb[2].mxu0 }
  0xea   : > { %v749_v14 = vadd.f32 %v8637_v53, %v748_v10  ;;  %v728_v15 = vadd.f32 %v7818_v11, %v8637_v53  ;;  %v7826_v16 = vpop.f32.mrb[2].mxu1  ;;  %v719_v17 = vpop.f32.mrb[3].mxu0  ;;  %v892_v28 = vmax.f32 %v725_v3, 0.0 }
  0xeb   : > { %v900_v19 = vmax.f32 %v757_v8, 0.0  ;;  %v760_v20 = vadd.f32 %v7826_v16, %v8637_v53  ;;  %v720_v23 = vadd.f32 %v8637_v53, %v719_v17  ;;  %v751_v24 = vpop.f32.mrb[3].mxu1  ;;  %v890_v37 = vmax.f32 %v717_v9, 0.0 }
  0xec   : > { %v893_v33 = vmax.f32 %v728_v15, 0.0  ;;  %v752_v34 = vadd.f32 %v8637_v53, %v751_v24  ;;  %v898_v43 = vmax.f32 %v749_v14, 0.0 }
  0xed   : > { %v901_v38 = vmax.f32 %v760_v20, 0.0  ;;  %v891_v39 = vmax.f32 %v720_v23, 0.0 }
  0xee   : > { %v934_v44 = vpack.c.bf16 %v893_v33, %v892_v28  ;;  %v899_v45 = vmax.f32 %v752_v34, 0.0 }
  0xef   : > { %v938_v49 = vpack.c.bf16 %v901_v38, %v900_v19  ;;  %v933_v50 = vpack.c.bf16 %v891_v39, %v890_v37  ;;  %v7821_v51 = vpop.f32.mrb[4].mxu0  ;;  %v8688_v39 = vpop.permute.xlu1 %1374 }
  0xf0   : > { %v1647_v63 = vmul.bf16 %v7323_v54, %v934_v44  ;;  %v937_v3 = vpack.c.bf16 %v899_v45, %v898_v43  ;;  %v741_v4 = vadd.f32 %v7821_v51, %v8637_v53  ;;  %v7829_v57 = vpop.f32.mrb[4].mxu1  ;;  %v732_v5 = vpop.f32.mrb[5].mxu0  ;;  %v8704_v45 = vcombine.low %v1227_v6, %v1239_v2 }
  0xf1   : > { %v1651_v8 = vmul.bf16 %v7327_v60, %v938_v49  ;;  %v1646_v9 = vmul.bf16 %v7322_v55, %v933_v50  ;;  %v773_v10 = vadd.f32 %v7829_v57, %v8637_v53  ;;  %v733_v62 = vadd.f32 %v8637_v53, %v732_v5  ;;  %v764_v11 = vpop.f32.mrb[5].mxu1  ;;  %v7822_v14 = vpop.f32.mrb[6].mxu0 }
  0xf2   : > { %v7346_v15 = vcombine.low %v1647_v63, %v1647_v63  ;;  %v7347_v16 = vcombine.high %v1647_v63, %v1647_v63  ;;  %v1650_v17 = vmul.bf16 %v7326_v59, %v937_v3  ;;  %v896_v19 = vmax.f32 %v741_v4, 0.0  ;;  %v7830_v20 = vpop.f32.mrb[6].mxu1  ;;  %v735_v23 = vpop.f32.mrb[7].mxu0 }
  0xf3   : > { %v7354_v54 = vcombine.low %v1651_v8, %v1651_v8  ;;  %v7355_v24 = vcombine.high %v1651_v8, %v1651_v8  ;;  %v7344_v28 = vcombine.low %v1646_v9, %v1646_v9  ;;  %v7345_v33 = vcombine.high %v1646_v9, %v1646_v9  ;;  %v767_v34 = vpop.f32.mrb[7].mxu1  ;;  %v8742_v46 = vpop.permute.xlu1 %1398 }
  0xf4   : > { %1822 = vst.msk [vmem:[#allocation2 + $0x8] sm:$0xf] %vm1819_vm2, %v7346_v15  ;;  %1823 = vst.msk [vmem:[#allocation2 + $0xc] sm:$0xf] %vm1819_vm2, %v7347_v16  ;;  %v7352_v55 = vcombine.low %v1650_v17, %v1650_v17  ;;  %v7353_v60 = vcombine.high %v1650_v17, %v1650_v17  ;;  %v904_v37 = vmax.f32 %v773_v10, 0.0  ;;  %v894_v38 = vmax.f32 %v733_v62, 0.0 }
  0xf5   : > { %1830 = vst.msk [vmem:[#allocation2 + $0x28] sm:$0xf] %vm1819_vm2, %v7354_v54  ;;  %1831 = vst.msk [vmem:[#allocation2 + $0x2c] sm:$0xf] %vm1819_vm2, %v7355_v24  ;;  %v765_v59 = vadd.f32 %v8637_v53, %v764_v11  ;;  %v744_v42 = vadd.f32 %v7822_v14, %v8637_v53  ;;  %v776_v43 = vadd.f32 %v7830_v20, %v8637_v53  ;;  %v8754_v54 = vpop.permute.xlu0 %1386 }
  0xf6   : > { %1820 = vst.msk [vmem:[#allocation2] sm:$0xf] %vm1819_vm2, %v7344_v28  ;;  %1821 = vst.msk [vmem:[#allocation2 + $0x4] sm:$0xf] %vm1819_vm2, %v7345_v33  ;;  %v736_v44 = vadd.f32 %v8637_v53, %v735_v23  ;;  %v768_v22 = vadd.f32 %v8637_v53, %v767_v34  ;;  %v1383_v35 = vrot.slane %v8688_v39, %v8610_v32 }
  0xf7   : > { %1828 = vst.msk [vmem:[#allocation2 + $0x20] sm:$0xf] %vm1819_vm2, %v7352_v55  ;;  %1829 = vst.msk [vmem:[#allocation2 + $0x24] sm:$0xf] %vm1819_vm2, %v7353_v60  ;;  %v902_v26 = vmax.f32 %v765_v59, 0.0  ;;  %v897_v2 = vmax.f32 %v744_v42, 0.0  ;;  %v8776_v42 = vpop.permute.xlu1 %1422 }
  0xf8   : > { %v905_v27 = vmax.f32 %v776_v43, 0.0  ;;  %v895_v6 = vmax.f32 %v736_v44, 0.0  ;;  %v903_v12 = vmax.f32 %v768_v22, 0.0  ;;  %v7833_v13 = vpop.f32.mrb[8].mxu1  ;;  %v8766_v60 = vcombine.low %v1371_v40, %v1383_v35 }
  0xf9   : > { %v936_v49 = vpack.c.bf16 %v897_v2, %v896_v19  ;;  %v789_v63 = vadd.f32 %v7833_v13, %v8637_v53  ;;  %v780_v3 = vpop.f32.mrb[9].mxu1 }
  0xfa   : > { %v940_v50 = vpack.c.bf16 %v905_v27, %v904_v37  ;;  %v935_v51 = vpack.c.bf16 %v895_v6, %v894_v38  ;;  %v939_v25 = vpack.c.bf16 %v903_v12, %v902_v26  ;;  %v781_v36 = vadd.f32 %v8637_v53, %v780_v3  ;;  %v7834_v41 = vpop.f32.mrb[10].mxu1 }
  0xfb   : > { %v1649_v47 = vmul.bf16 %v8643_v58, %v936_v49  ;;  %v908_v57 = vmax.f32 %v789_v63, 0.0  ;;  %v783_v5 = vpop.f32.mrb[11].mxu1  ;;  %v792_v10 = vadd.f32 %v7834_v41, %v8637_v53  ;;  %v8762_v34 = vld [vmem:[#allocation2 + $0x8] sm:$0xff]   ;;  %v1407_v37 = vrot.slane %v8742_v46, %v8610_v32 }
  0xfc   : > { %v1653_v52 = vmul.bf16 %v8649_v0, %v940_v50  ;;  %v1648_v4 = vmul.bf16 %v8639_v56, %v935_v51  ;;  %v1652_v8 = vmul.bf16 %v8645_v61, %v939_v25  ;;  %v906_v9 = vmax.f32 %v781_v36, 0.0  ;;  %v8750_v11 = vld [vmem:[#allocation2 + $0x28] sm:$0xff]  }
  0xfd   : > { %v784_v62 = vadd.f32 %v8637_v53, %v783_v5  ;;  %v7350_v14 = vcombine.low %v1649_v47, %v1649_v47  ;;  %v7351_v15 = vcombine.high %v1649_v47, %v1649_v47  ;;  %v8106_v23 = vld [vmem:[#allocation2] sm:$0xfe]   ;;  %v909_v61 = vmax.f32 %v792_v10, 0.0  ;;  %v8784_v27 = vld [vmem:[#allocation2 + $0x28] sm:$0xff]  }
  0xfe   : > { %v7358_v16 = vcombine.low %v1653_v52, %v1653_v52  ;;  %v7359_v58 = vcombine.high %v1653_v52, %v1653_v52  ;;  %v8752_v17 = vld [vmem:[#allocation2 + $0x20] sm:$0xff]   ;;  %v7348_v0 = vcombine.low %v1648_v4, %v1648_v4  ;;  %v7349_v56 = vcombine.high %v1648_v4, %v1648_v4  ;;  %v8802_v52 = vld [vmem:[#allocation2 + $0x28] sm:$0xff]  }
  0xff   : > { %v7356_v19 = vcombine.low %v1652_v8, %v1652_v8  ;;  %v7357_v20 = vcombine.high %v1652_v8, %v1652_v8  ;;  %1826 = vst.msk [vmem:[#allocation2 + $0x18] sm:$0xf] %vm1819_vm2, %v7350_v14  ;;  %1827 = vst.msk [vmem:[#allocation2 + $0x1c] sm:$0xf] %vm1819_vm2, %v7351_v15  ;;  %v907_v24 = vmax.f32 %v784_v62, 0.0  ;;  %v2754_v28 = vrot.slane %v8752_v17, 1  ;;  %v8805_v8 = vpop.permute.xlu0 %1410 }
 0x100   : > { %1834 = vst.msk [vmem:[#allocation2 + $0x38] sm:$0xf] %vm1819_vm2, %v7358_v16  ;;  %1835 = vst.msk [vmem:[#allocation2 + $0x3c] sm:$0xf] %vm1819_vm2, %v7359_v58  ;;  %v10572_v33 = vrot.slane %v8750_v11, 1  ;;  %v8764_v55 = vld [vmem:[#allocation2 + $0x20] sm:$0xff]   ;;  %v1395_v38 = vrot.slane %v8754_v54, %v8610_v32  ;;  %v942_v43 = vpack.c.bf16 %v909_v61, %v908_v57  ;;  %v1431_v6 = vrot.slane %v8776_v42, %v8610_v32 }
 0x101   : > { %1824 = vst.msk [vmem:[#allocation2 + $0x10] sm:$0xf] %vm1819_vm2, %v7348_v0  ;;  %1825 = vst.msk [vmem:[#allocation2 + $0x14] sm:$0xf] %vm1819_vm2, %v7349_v56  ;;  %v7837_v39 = vpop.f32.mrb[12].mxu1  ;;  %v2509_v59 = vrot.slane %v8106_v23, 1  ;;  %v941_v44 = vpack.c.bf16 %v907_v24, %v906_v9  ;;  %v1419_v16 = vrot.slane %v8805_v8, %v8610_v32 }
 0x102   : > { %1832 = vst.msk [vmem:[#allocation2 + $0x30] sm:$0xf] %vm1819_vm2, %v7356_v19  ;;  %1833 = vst.msk [vmem:[#allocation2 + $0x34] sm:$0xf] %vm1819_vm2, %v7357_v20  ;;  %v805_v22 = vadd.f32 %v7837_v39, %v8637_v53  ;;  %v796_v26 = vpop.f32.mrb[13].mxu1  ;;  %v2757_v2 = vsel %vm2508_vm3, %v2754_v28, %v10572_v33  ;;  %v2510_v18 = vrot.slane %v8762_v34, 1  ;;  %v1655_v51 = vmul.bf16 %v8704_v45, %v942_v43 }
 0x103   : > { %v797_v12 = vadd.f32 %v8637_v53, %v796_v26  ;;  %v7838_v13 = vpop.f32.mrb[14].mxu1  ;;  %2792 = vrot.lane.b32.xlu1 %v2757_v2, %s8324_s27  ;;  %v3369_v49 = vrot.slane %v8764_v55, 2  ;;  %v8792_v50 = vld [vmem:[#allocation2 + $0x20] sm:$0xff]   ;;  %v1654_v63 = vmul.bf16 %v8651_v1, %v941_v44  ;;  %v10571_v47 = vrot.slane %v8784_v27, 2  ;;  %v8113_v15 = vld [vmem:[#allocation2 + $0x28] sm:$0xff]  }
 0x104   : > { %v912_v3 = vmax.f32 %v805_v22, 0.0  ;;  %v808_v35 = vadd.f32 %v7838_v13, %v8637_v53  ;;  %v799_v40 = vpop.f32.mrb[15].mxu1  ;;  %v2511_v41 = vsel %vm2508_vm3, %v2509_v59, %v2510_v18  ;;  %v8112_v4 = vld [vmem:[#allocation2 + $0x20] sm:$0xff]   ;;  %v7362_v45 = vcombine.low %v1655_v51, %v1655_v51  ;;  %v8823_v59 = vld [vmem:[#allocation2 + $0x28] sm:$0xff]  }
 0x105   : > { %v910_v25 = vmax.f32 %v797_v12, 0.0  ;;  %v800_v36 = vadd.f32 %v8637_v53, %v799_v40  ;;  %v7363_v57 = vcombine.high %v1655_v51, %v1655_v51  ;;  %v7360_v1 = vcombine.low %v1654_v63, %v1654_v63  ;;  %2546 = vrot.lane.b32.xlu0 %v2511_v41, %s8325_s28  ;;  %v8821_v39 = vld [vmem:[#allocation2 + $0x20] sm:$0xff]  }
 0x106   : > { %v7361_v5 = vcombine.high %v1654_v63, %v1654_v63  ;;  %v913_v9 = vmax.f32 %v808_v35, 0.0  ;;  %v3372_v62 = vsel %vm3363_vm4, %v3369_v49, %v10571_v47  ;;  %v3607_v14 = vrot.slane %v8792_v50, 2  ;;  %1838 = vst.msk [vmem:[#allocation2 + $0x48] sm:$0xf] %vm1819_vm2, %v7362_v45  ;;  %v8116_v12 = vld [vmem:[#allocation2 + $0x20] sm:$0xff]   ;;  %v8838_v45 = vld [vmem:[#allocation2 + $0x28] sm:$0xff]  }
 0x107   : > { %v911_v10 = vmax.f32 %v800_v36, 0.0  ;;  %1839 = vst.msk [vmem:[#allocation2 + $0x4c] sm:$0xf] %vm1819_vm2, %v7363_v57  ;;  %1836 = vst.msk [vmem:[#allocation2 + $0x40] sm:$0xf] %vm1819_vm2, %v7360_v1  ;;  %3407 = vrot.lane.b32.xlu1 %v3372_v62, %s8326_s29  ;;  %v3609_v58 = vrot.slane %v8802_v52, 2 }
 0x108   : > { %1837 = vst.msk [vmem:[#allocation2 + $0x44] sm:$0xf] %vm1819_vm2, %v7361_v5  ;;  %v3017_v0 = vshrl.u32 %v8112_v4, 16  ;;  %v3020_v56 = vshll.u32 %v8112_v4, 16  ;;  %v944_v19 = vpack.c.bf16 %v913_v9, %v912_v3  ;;  %v7841_v23 = vpop.f32.mrb[16].mxu1  ;;  %v3026_v61 = vshrl.u32 %v8113_v15, 16 }
 0x109   : > { %v943_v20 = vpack.c.bf16 %v911_v10, %v910_v25  ;;  %v3029_v24 = vshll.u32 %v8113_v15, 16  ;;  %v3610_v43 = vsel %vm3363_vm4, %v3607_v14, %v3609_v58  ;;  %v821_v44 = vadd.f32 %v7841_v23, %v8637_v53  ;;  %v812_v22 = vpop.f32.mrb[17].mxu1  ;;  %v8878_v54 = vld [vmem:[#allocation2 + $0x18] sm:$0xff]   ;;  %v8135_v52 = vld [vmem:[#allocation2 + $0x8] sm:$0xfc]  }
 0x10a   : > { %v3019_v26 = vrot.slane %v3017_v0, 1  ;;  %v3022_v2 = vrot.slane %v3020_v56, 2  ;;  %v1657_v13 = vmul.bf16 %v8720_v21, %v944_v19  ;;  %3645 = vrot.lane.b32.xlu0 %v3610_v43, %s8327_s30  ;;  %v813_v63 = vadd.f32 %v8637_v53, %v812_v22  ;;  %v7842_v3 = vpop.f32.mrb[18].mxu1  ;;  %v8855_v43 = vld [vmem:[#allocation2 + $0x28] sm:$0xff]  }
 0x10b   : > { %v1656_v51 = vmul.bf16 %v8712_v48, %v943_v20  ;;  %v3028_v35 = vrot.slane %v3026_v61, 1  ;;  %v916_v40 = vmax.f32 %v821_v44, 0.0  ;;  %v824_v25 = vadd.f32 %v7842_v3, %v8637_v53  ;;  %v815_v36 = vpop.f32.mrb[19].mxu1 }
 0x10c   : > { %v8836_v41 = vor.u32 %v3022_v2, %v3019_v26  ;;  %v3031_v4 = vrot.slane %v3029_v24, 2  ;;  %v7366_v57 = vcombine.low %v1657_v13, %v1657_v13  ;;  %v7367_v21 = vcombine.high %v1657_v13, %v1657_v13  ;;  %v8853_v24 = vld [vmem:[#allocation2 + $0x20] sm:$0xff]   ;;  %v8885_v13 = vld [vmem:[#allocation2 + $0x8] sm:$0xff]  }
 0x10d   : > { %v7364_v1 = vcombine.low %v1656_v51, %v1656_v51  ;;  %v7365_v48 = vcombine.high %v1656_v51, %v1656_v51  ;;  %v914_v5 = vmax.f32 %v813_v63, 0.0  ;;  %v917_v8 = vmax.f32 %v824_v25, 0.0 }
 0x10e   : > { %v816_v9 = vadd.f32 %v8637_v53, %v815_v36  ;;  %v8841_v10 = vor.u32 %v3031_v4, %v3028_v35  ;;  %1842 = vst.msk [vmem:[#allocation2 + $0x58] sm:$0xf] %vm1819_vm2, %v7366_v57  ;;  %1843 = vst.msk [vmem:[#allocation2 + $0x5c] sm:$0xf] %vm1819_vm2, %v7367_v21  ;;  %v4222_v62 = vrot.slane %v8821_v39, 3  ;;  %v10573_v15 = vrot.slane %v8823_v59, 3 }
 0x10f   : > { %1840 = vst.msk [vmem:[#allocation2 + $0x50] sm:$0xf] %vm1819_vm2, %v7364_v1  ;;  %1841 = vst.msk [vmem:[#allocation2 + $0x54] sm:$0xf] %vm1819_vm2, %v7365_v48  ;;  %v2189_v0 = vshll.u32 %v8116_v12, 16  ;;  %v2193_v56 = vshrl.u32 %v8116_v12, 16  ;;  %v946_v19 = vpack.c.bf16 %v917_v8, %v916_v40  ;;  %v8863_v44 = vcombine.low %v1395_v38, %v1407_v37 }
 0x110   : > { %v915_v20 = vmax.f32 %v816_v9, 0.0  ;;  %v3033_v23 = vsel %vm2989_vm5, %v8836_v41, %v8841_v10  ;;  %v2197_v61 = vshll.u32 %v8838_v45, 16  ;;  %v8868_v22 = vcombine.low %v1419_v16, %v1431_v6  ;;  %v7845_v2 = vpop.f32.mrb[20].mxu1  ;;  %v8121_v37 = vld [vmem:[#allocation2] sm:$0xff]   ;;  %v8893_v21 = vld [vmem:[#allocation2 + $0x18] sm:$0xff]  }
 0x111   : > { %3166 = vrot.lane.b32.xlu1 %v3033_v23, %s8328_s12  ;;  %v4225_v26 = vsel %vm4218_vm6, %v4222_v62, %v10573_v15  ;;  %v8876_v46 = vrot.slane %v2189_v0, 1  ;;  %v1659_v38 = vmul.bf16 %v8733_v31, %v946_v19  ;;  %v2516_v16 = vrot.slane %v8853_v24, 1  ;;  %v828_v12 = vpop.f32.mrb[21].mxu1  ;;  %v8124_v19 = vld [vmem:[#allocation2 + $0x20] sm:$0xff]  }
 0x112   : > { %v945_v42 = vpack.c.bf16 %v915_v20, %v914_v5  ;;  %4260 = vrot.lane.b32.xlu0 %v4225_v26, %s8329_s13  ;;  %v8882_v6 = vrot.slane %v2197_v61, 1  ;;  %v2518_v63 = vrot.slane %v8855_v43, 1  ;;  %v837_v3 = vadd.f32 %v7845_v2, %v8637_v53  ;;  %v7846_v31 = vpop.f32.mrb[22].mxu1 }
 0x113   : > { %v2195_v51 = vor.u32 %v2193_v56, %v8876_v46  ;;  %v829_v35 = vadd.f32 %v8637_v53, %v828_v12  ;;  %v7370_v40 = vcombine.low %v1659_v38, %v1659_v38  ;;  %v7371_v25 = vcombine.high %v1659_v38, %v1659_v38  ;;  %v831_v57 = vpop.f32.mrb[23].mxu1 }
 0x114   : > { %v1658_v36 = vmul.bf16 %v8731_v30, %v945_v42  ;;  %v840_v4 = vadd.f32 %v7846_v31, %v8637_v53  ;;  %v2519_v48 = vsel %vm2508_vm3, %v2516_v16, %v2518_v63  ;;  %v920_v5 = vmax.f32 %v837_v3, 0.0  ;;  %v8125_v42 = vld [vmem:[#allocation2 + $0x28] sm:$0xff]  }
 0x115   : > { %v2200_v1 = vsel %vm2156_vm7, %v2195_v51, %v8882_v6  ;;  %v918_v8 = vmax.f32 %v829_v35, 0.0  ;;  %1846 = vst.msk [vmem:[#allocation2 + $0x68] sm:$0xf] %vm1819_vm2, %v7370_v40  ;;  %1847 = vst.msk [vmem:[#allocation2 + $0x6c] sm:$0xf] %vm1819_vm2, %v7371_v25  ;;  %v832_v56 = vadd.f32 %v8637_v53, %v831_v57  ;;  %v3605_v20 = vrot.slane %v8878_v54, 2  ;;  %v8917_v40 = vpop.permute.xlu1 %1446 }
 0x116   : > { %v7368_v9 = vcombine.low %v1658_v36, %v1658_v36  ;;  %v7369_v30 = vcombine.high %v1658_v36, %v1658_v36  ;;  %2313 = vrot.lane.b32.xlu1 %v2200_v1, %s8330_s14  ;;  %2554 = vrot.lane.b32.xlu0 %v2519_v48, %s8325_s28  ;;  %v921_v0 = vmax.f32 %v840_v4, 0.0  ;;  %v2158_v23 = vshrl.u32 %v8121_v37, 16  ;;  %v8924_v1 = vld [vmem:[#allocation2 + $0x10] sm:$0xff]   ;;  %v8928_v48 = vpop.permute.xlu0 %1434 }
 0x117   : > { %v2160_v61 = vshll.u32 %v8121_v37, 16  ;;  %v2165_v24 = vshll.u32 %v8885_v13, 16  ;;  %v919_v2 = vmax.f32 %v832_v56, 0.0  ;;  %v2514_v38 = vrot.slane %v8893_v21, 1 }
 0x118   : > { %1844 = vst.msk [vmem:[#allocation2 + $0x60] sm:$0xf] %vm1819_vm2, %v7368_v9  ;;  %1845 = vst.msk [vmem:[#allocation2 + $0x64] sm:$0xf] %vm1819_vm2, %v7369_v30  ;;  %v948_v26 = vpack.c.bf16 %v921_v0, %v920_v5  ;;  %v3863_v12 = vshrl.u32 %v8124_v19, 16  ;;  %v3608_v51 = vsel %vm3363_vm4, %v3605_v20, %v3607_v14  ;;  %v3866_v35 = vshll.u32 %v8124_v19, 16 }
 0x119   : > { %v2162_v3 = vrot.slane %v2160_v61, 1  ;;  %v8915_v37 = vrot.slane %v2165_v24, 1  ;;  %v7849_v31 = vpop.f32.mrb[24].mxu1  ;;  %v947_v36 = vpack.c.bf16 %v919_v2, %v918_v8  ;;  %v2517_v50 = vsel %vm2508_vm3, %v2514_v38, %v2516_v16  ;;  %v8926_v14 = vld [vmem:[#allocation2 + $0x18] sm:$0xff]   ;;  %v8932_v24 = vld [vmem:[#allocation2 + $0x10] sm:$0xff]  }
 0x11a   : > { %v1661_v25 = vmul.bf16 %v8766_v60, %v948_v26  ;;  %3643 = vrot.lane.b32.xlu1 %v3608_v51, %s8327_s30  ;;  %v3865_v4 = vrot.slane %v3863_v12, 2  ;;  %v844_v57 = vpop.f32.mrb[25].mxu1  ;;  %v3868_v9 = vrot.slane %v3866_v35, 3  ;;  %v3872_v30 = vshrl.u32 %v8125_v42, 16  ;;  %v8943_v35 = vld [vmem:[#allocation2 + $0x18] sm:$0xff]  }
 0x11b   : > { %v2163_v5 = vor.u32 %v2162_v3, %v2158_v23  ;;  %v3875_v0 = vshll.u32 %v8125_v42, 16  ;;  %v7850_v60 = vpop.f32.mrb[26].mxu1  ;;  %v1660_v19 = vmul.bf16 %v8735_v7, %v947_v36  ;;  %v853_v61 = vadd.f32 %v7849_v31, %v8637_v53 }
 0x11c   : > { %v7374_v8 = vcombine.low %v1661_v25, %v1661_v25  ;;  %v7375_v56 = vcombine.high %v1661_v25, %v1661_v25  ;;  %v847_v16 = vpop.f32.mrb[27].mxu1  ;;  %v8936_v2 = vor.u32 %v3868_v9, %v3865_v4  ;;  %v3874_v12 = vrot.slane %v3872_v30, 2 }
 0x11d   : > { %v2168_v26 = vsel %vm2156_vm7, %v2163_v5, %v8915_v37  ;;  %v3877_v23 = vrot.slane %v3875_v0, 3  ;;  %v7372_v42 = vcombine.low %v1660_v19, %v1660_v19  ;;  %v7373_v51 = vcombine.high %v1660_v19, %v1660_v19  ;;  %v1471_v5 = vpop.permute.xlu1 %1470  ;;  %v8955_v0 = vld [vmem:[#allocation2 + $0x10] sm:$0xff]  }
 0x11e   : > { %1850 = vst.msk [vmem:[#allocation2 + $0x78] sm:$0xf] %vm1819_vm2, %v7374_v8  ;;  %1851 = vst.msk [vmem:[#allocation2 + $0x7c] sm:$0xf] %vm1819_vm2, %v7375_v56  ;;  %2305 = vrot.lane.b32.xlu0 %v2168_v26, %s8330_s14  ;;  %2552 = vrot.lane.b32.xlu1 %v2517_v50, %s8325_s28  ;;  %v924_v7 = vmax.f32 %v853_v61, 0.0  ;;  %v845_v3 = vadd.f32 %v8637_v53, %v844_v57  ;;  %v856_v25 = vadd.f32 %v7850_v60, %v8637_v53  ;;  %v1459_v8 = vpop.permute.xlu0 %1458  ;;  %v8965_v26 = vld [vmem:[#allocation2 + $0x18] sm:$0xff]  }
 0x11f   : > { %v8945_v31 = vor.u32 %v3877_v23, %v3874_v12  ;;  %v848_v36 = vadd.f32 %v8637_v53, %v847_v16  ;;  %v2512_v4 = vrot.slane %v8924_v1, 1  ;;  %1848 = vst.msk [vmem:[#allocation2 + $0x70] sm:$0xf] %vm1819_vm2, %v7372_v42  ;;  %1849 = vst.msk [vmem:[#allocation2 + $0x74] sm:$0xf] %vm1819_vm2, %v7373_v51  ;;  %v4220_v50 = vrot.slane %v8926_v14, 3 }
 0x120   : > { %v922_v9 = vmax.f32 %v845_v3, 0.0  ;;  %v2750_v57 = vrot.slane %v8932_v24, 1  ;;  %v2752_v30 = vrot.slane %v8943_v35, 1  ;;  %v925_v56 = vmax.f32 %v856_v25, 0.0  ;;  %v7853_v16 = vpop.f32.mrb[28].mxu1  ;;  %v9053_v24 = vld [vmem:[#allocation2 + $0x30] sm:$0xff]  }
 0x121   : > { %v3879_v60 = vsel %vm3844_vm8, %v8936_v2, %v8945_v31  ;;  %v923_v19 = vmax.f32 %v848_v36, 0.0  ;;  %v2513_v61 = vsel %vm2508_vm3, %v2510_v18, %v2512_v4  ;;  %v1455_v12 = vrot.slane %v8917_v40, %v8610_v32  ;;  %v860_v51 = vpop.f32.mrb[29].mxu1 }
 0x122   : > { %v1479_v23 = vrot.slane %v1471_v5, %v8610_v32  ;;  %v1467_v42 = vrot.slane %v1459_v8, %v8610_v32  ;;  %4019 = vrot.lane.b32.xlu0 %v3879_v60, %s8331_s15  ;;  %2548 = vrot.lane.b32.xlu1 %v2513_v61, %s8325_s28  ;;  %v950_v3 = vpack.c.bf16 %v925_v56, %v924_v7  ;;  %v7854_v25 = vpop.f32.mrb[30].mxu1  ;;  %v3365_v7 = vrot.slane %v8955_v0, 2  ;;  %v1483_v15 = vpop.permute.xlu0 %1482 }
 0x123   : > { %v949_v34 = vpack.c.bf16 %v923_v19, %v922_v9  ;;  %v869_v18 = vadd.f32 %v7853_v16, %v8637_v53  ;;  %v861_v35 = vadd.f32 %v8637_v53, %v860_v51  ;;  %v4223_v40 = vsel %vm4218_vm6, %v4220_v50, %v4222_v62  ;;  %v863_v8 = vpop.f32.mrb[31].mxu1  ;;  %v8985_v9 = vld [vmem:[#allocation2 + $0x30] sm:$0xff]  }
 0x124   : > { %v2753_v36 = vsel %vm2508_vm3, %v2750_v57, %v2752_v30  ;;  %v872_v5 = vadd.f32 %v7854_v25, %v8637_v53  ;;  %v1663_v60 = vmul.bf16 %v8868_v22, %v950_v3  ;;  %v3367_v19 = vrot.slane %v8965_v26, 2  ;;  %v8995_v25 = vld [vmem:[#allocation2 + $0x30] sm:$0xff]  }
 0x125   : > { %v1662_v56 = vmul.bf16 %v8863_v44, %v949_v34  ;;  %v928_v39 = vmax.f32 %v869_v18, 0.0  ;;  %v1443_v62 = vrot.slane %v8928_v48, %v8610_v32  ;;  %v926_v61 = vmax.f32 %v861_v35, 0.0  ;;  %v1495_v18 = vpop.permute.xlu1 %1494 }
 0x126   : > { %4258 = vrot.lane.b32.xlu0 %v4223_v40, %s8329_s13  ;;  %2788 = vrot.lane.b32.xlu1 %v2753_v36, %s8324_s27  ;;  %v929_v16 = vmax.f32 %v872_v5, 0.0  ;;  %v864_v51 = vadd.f32 %v8637_v53, %v863_v8  ;;  %v7378_v47 = vcombine.low %v1663_v60, %v1663_v60  ;;  %v7379_v22 = vcombine.high %v1663_v60, %v1663_v60  ;;  %v8133_v5 = vld [vmem:[#allocation2 + $0x8] sm:$0xfe]   ;;  %v9010_v60 = vld [vmem:[#allocation2 + $0x30] sm:$0xff]  }
 0x127   : > { %v7376_v3 = vcombine.low %v1662_v56, %v1662_v56  ;;  %v7377_v44 = vcombine.high %v1662_v56, %v1662_v56  ;;  %v7341_v34 = vcombine.low %v1467_v42, %v1479_v23  ;;  %v2755_v48 = vsel %vm2508_vm3, %v2752_v30, %v2754_v28 }
 0x128   : > { %v952_v26 = vpack.c.bf16 %v929_v16, %v928_v39  ;;  %v927_v33 = vmax.f32 %v864_v51, 0.0  ;;  %1854 = vst.msk [vmem:[#allocation2 + $0x88] sm:$0xf] %vm1819_vm2, %v7378_v47  ;;  %1855 = vst.msk [vmem:[#allocation2 + $0x8c] sm:$0xf] %vm1819_vm2, %v7379_v22  ;;  %v3368_v23 = vsel %vm3363_vm4, %v3365_v7, %v3367_v19  ;;  %v3611_v42 = vrot.slane %v8985_v9, 2 }
 0x129   : > { %1852 = vst.msk [vmem:[#allocation2 + $0x80] sm:$0xf] %vm1819_vm2, %v7376_v3  ;;  %1853 = vst.msk [vmem:[#allocation2 + $0x84] sm:$0xf] %vm1819_vm2, %v7377_v44  ;;  %v7857_v35 = vpop.f32.mrb[32].mxu1  ;;  %v7340_v40 = vcombine.low %v1443_v62, %v1455_v12  ;;  %v1503_v17 = vrot.slane %v1495_v18, %v8610_v32  ;;  %v2520_v56 = vrot.slane %v8995_v25, 1  ;;  %v1491_v39 = vrot.slane %v1483_v15, %v8610_v32 }
 0x12a   : > { %2790 = vrot.lane.b32.xlu0 %v2755_v48, %s8324_s27  ;;  %v1665_v47 = vmul.bf16 %v7341_v34, %v952_v26  ;;  %v951_v36 = vpack.c.bf16 %v927_v33, %v926_v61  ;;  %3403 = vrot.lane.b32.xlu1 %v3368_v23, %s8326_s29  ;;  %v876_v8 = vpop.f32.mrb[33].mxu1  ;;  %v9016_v33 = vld [vmem:[#allocation2 + $0x38] sm:$0xff]   ;;  %v3370_v61 = vsel %vm3363_vm4, %v3367_v19, %v3369_v49  ;;  %v8295_v32 = vld [vmem:[%s10563_s4] ss:$0 sm:$0xff]  ;;  %v2749_v49 = vrot.slane %v8133_v5, 1  ;;  %v9034_v34 = vld [vmem:[#allocation2 + $0x30] sm:$0xff]  }
 0x12b   : > { %v877_v28 = vadd.f32 %v8637_v53, %v876_v8  ;;  %v7858_v30 = vpop.f32.mrb[34].mxu1  ;;  %v3612_v53 = vsel %vm3363_vm4, %v3609_v58, %v3611_v42  ;;  %v2758_v58 = vrot.slane %v9010_v60, 1  ;;  %v8138_v44 = vld [vmem:[#allocation2 + $0x10] sm:$0xfc]   ;;  %v2760_v18 = vrot.slane %v9016_v33, 1  ;;  %v9039_v26 = vld [vmem:[#allocation2 + $0x38] sm:$0xff]  }
 0x12c   : > { %v7382_v12 = vcombine.low %v1665_v47, %v1665_v47  ;;  %v7383_v62 = vcombine.high %v1665_v47, %v1665_v47  ;;  %v1664_v16 = vmul.bf16 %v7340_v40, %v951_v36  ;;  %v879_v51 = vpop.f32.mrb[35].mxu1  ;;  %v7342_v48 = vcombine.low %v1491_v39, %v1503_v17  ;;  %v9049_v47 = vld [vmem:[#allocation2 + $0x10] sm:$0xff]  }
 0x12d   : > { %v930_v22 = vmax.f32 %v877_v28, 0.0  ;;  %v880_v15 = vadd.f32 %v8295_v32, %v879_v51  ;;  %v2751_v23 = vsel %vm2508_vm3, %v2749_v49, %v2750_v57  ;;  %v2521_v40 = vsel %vm2508_vm3, %v2518_v63, %v2520_v56  ;;  %v8141_v17 = vld [vmem:[#allocation2 + $0x10] sm:$0xf8]   ;;  %v8145_v28 = vld [vmem:[#allocation2 + $0x18] sm:$0xff]  }
 0x12e   : > { %1858 = vst.msk [vmem:[#allocation2 + $0x98] sm:$0xf] %vm1819_vm2, %v7382_v12  ;;  %1859 = vst.msk [vmem:[#allocation2 + $0x9c] sm:$0xf] %vm1819_vm2, %v7383_v62  ;;  %v7380_v3 = vcombine.low %v1664_v16, %v1664_v16  ;;  %v7381_v55 = vcombine.high %v1664_v16, %v1664_v16  ;;  %3405 = vrot.lane.b32.xlu0 %v3370_v61, %s8326_s29  ;;  %3647 = vrot.lane.b32.xlu1 %v3612_v53, %s8327_s30  ;;  %v3364_v36 = vrot.slane %v8135_v52, 2  ;;  %v8147_v49 = vld [vmem:[#allocation2 + $0x10] sm:$0xff]  }
 0x12f   : > { %v931_v19 = vmax.f32 %v880_v15, 0.0  ;;  %v3604_v8 = vrot.slane %v8138_v44, 2  ;;  %v2761_v43 = vsel %vm2508_vm3, %v2758_v58, %v2760_v18  ;;  %v3373_v63 = vrot.slane %v9034_v34, 2  ;;  %v9082_v15 = vld [vmem:[#allocation2 + $0x30] sm:$0xff]  }
 0x130   : > { %1856 = vst.msk [vmem:[#allocation2 + $0x90] sm:$0xf] %vm1819_vm2, %v7380_v3  ;;  %1857 = vst.msk [vmem:[#allocation2 + $0x94] sm:$0xf] %vm1819_vm2, %v7381_v55  ;;  %v3366_v57 = vsel %vm3363_vm4, %v3364_v36, %v3365_v7  ;;  %v3375_v39 = vrot.slane %v9039_v26, 2  ;;  %v2173_v12 = vshll.u32 %v9049_v47, 16 }
 0x131   : > { %v953_v35 = vpack.c.bf16 %v931_v19, %v930_v22  ;;  %v2205_v0 = vshll.u32 %v9053_v24, 16  ;;  %v8146_v7 = vld [vmem:[#allocation2 + $0x18] sm:$0xff]   ;;  %v3606_v62 = vsel %vm3363_vm4, %v3604_v8, %v3605_v20  ;;  %v2169_v16 = vshrl.u32 %v8885_v13, 16 }
 0x132   : > { %2786 = vrot.lane.b32.xlu0 %v2751_v23, %s8324_s27  ;;  %2556 = vrot.lane.b32.xlu1 %v2521_v40, %s8325_s28  ;;  %v3854_v51 = vshrl.u32 %v8145_v28, 16  ;;  %v3376_v61 = vsel %vm3363_vm4, %v3373_v63, %v3375_v39  ;;  %v4219_v53 = vrot.slane %v8141_v17, 3  ;;  %v2175_v22 = vrot.slane %v2173_v12, 1  ;;  %v9114_v12 = vld [vmem:[#allocation2 + $0x38] sm:$0xff]  }
 0x133   : > { %v1666_v5 = vmul.bf16 %v7342_v48, %v953_v35  ;;  %v3857_v32 = vshll.u32 %v8145_v28, 16  ;;  %v2201_v54 = vshrl.u32 %v8838_v45, 16  ;;  %v2171_v13 = vor.u32 %v2169_v16, %v8915_v37  ;;  %v8148_v48 = vld [vmem:[#allocation2 + $0x18] sm:$0xff]   ;;  %v8153_v16 = vld [vmem:[#allocation2 + $0x30] sm:$0xff]  }
 0x134   : > { %v9085_v20 = vrot.slane %v2205_v0, 1  ;;  %v2181_v3 = vshll.u32 %v8146_v7, 16  ;;  %v3856_v55 = vrot.slane %v3854_v51, 2  ;;  %v4221_v52 = vsel %vm4218_vm6, %v4219_v53, %v4220_v50 }
 0x135   : > { %v7384_v30 = vcombine.low %v1666_v5, %v1666_v5  ;;  %v2176_v19 = vsel %vm2156_vm7, %v2171_v13, %v2175_v22  ;;  %v3859_v44 = vrot.slane %v3857_v32, 3  ;;  %v2203_v45 = vor.u32 %v2201_v54, %v8882_v6  ;;  %v8151_v6 = vld [vmem:[#allocation2 + $0x30] sm:$0xff]   ;;  %v8154_v32 = vld [vmem:[#allocation2 + $0x38] sm:$0xff]  }
 0x136   : > { %3401 = vrot.lane.b32.xlu0 %v3366_v57, %s8326_s29  ;;  %2796 = vrot.lane.b32.xlu1 %v2761_v43, %s8324_s27  ;;  %v2515_v37 = vsel %vm2508_vm3, %v2512_v4, %v2514_v38  ;;  %v4226_v50 = vrot.slane %v9082_v15, 3  ;;  %v2999_v23 = vshrl.u32 %v8147_v49, 16  ;;  %v3002_v35 = vshll.u32 %v8147_v49, 16  ;;  %v9129_v54 = vld [vmem:[#allocation2 + $0x38] sm:$0xff]  }
 0x137   : > { %1860 = vst.msk [vmem:[#allocation2 + $0xa0] sm:$0xf] %vm1819_vm2, %v7384_v30  ;;  %v2208_v14 = vsel %vm2156_vm7, %v2203_v45, %v9085_v20  ;;  %v9102_v40 = vor.u32 %v3859_v44, %v3856_v55  ;;  %v2183_v36 = vrot.slane %v2181_v3, 1  ;;  %v3008_v5 = vshrl.u32 %v8148_v48, 16 }
 0x138   : > { %v3011_v8 = vshll.u32 %v8148_v48, 16  ;;  %v2185_v21 = vshrl.u32 %v8146_v7, 16  ;;  %v10575_v38 = vrot.slane %v8823_v59, 3  ;;  %v3001_v4 = vrot.slane %v2999_v23, 1  ;;  %v9148_v48 = vld [vmem:[#allocation2 + $0x38] sm:$0xff]  }
 0x139   : > { %v3004_v17 = vrot.slane %v3002_v35, 2  ;;  %v3870_v57 = vsel %vm3844_vm8, %v9102_v40, %v8936_v2  ;;  %v3010_v28 = vrot.slane %v3008_v5, 1  ;;  %v3881_v0 = vshrl.u32 %v8151_v6, 16  ;;  %v8156_v23 = vld [vmem:[#allocation2 + $0x8] sm:$0xfe]  }
 0x13a   : > { %3641 = vrot.lane.b32.xlu0 %v3606_v62, %s8327_s30  ;;  %3411 = vrot.lane.b32.xlu1 %v3376_v61, %s8326_s29  ;;  %v4227_v1 = vsel %vm4218_vm6, %v10575_v38, %v4226_v50  ;;  %v2187_v43 = vor.u32 %v2185_v21, %v2183_v36  ;;  %v3013_v30 = vrot.slane %v3011_v8, 2  ;;  %v3884_v7 = vshll.u32 %v8151_v6, 16  ;;  %v8158_v35 = vld [vmem:[#allocation2 + $0x10] sm:$0xfc]  }
 0x13b   : > { %v10576_v59 = vrot.slane %v8750_v11, 1  ;;  %v9123_v51 = vor.u32 %v3004_v17, %v3001_v4  ;;  %v2177_v53 = vshrl.u32 %v9049_v47, 16  ;;  %v3613_v60 = vrot.slane %v9114_v12, 2  ;;  %v9168_v4 = vld [vmem:[#allocation2 + $0x40] sm:$0xff]  }
 0x13c   : > { %v2192_v2 = vsel %vm2156_vm7, %v2187_v43, %v8876_v46  ;;  %v3014_v61 = vor.u32 %v3013_v30, %v3010_v28  ;;  %v3883_v11 = vrot.slane %v3881_v0, 2  ;;  %v10577_v46 = vrot.slane %v8784_v27, 2  ;;  %v8176_v28 = vld [vmem:[#allocation2 + $0x20] sm:$0xff]  }
 0x13d   : > { %v2759_v62 = vsel %vm2508_vm3, %v10576_v59, %v2758_v58  ;;  %v3886_v58 = vrot.slane %v3884_v7, 3  ;;  %v3035_v13 = vshrl.u32 %v8153_v16, 16  ;;  %v3038_v3 = vshll.u32 %v8153_v16, 16  ;;  %v9180_v30 = vld [vmem:[#allocation2 + $0x40] sm:$0xff]   ;;  %2012 = vst.msk [vmem:[#allocation3 + $0x20] sm:$0xff] %vm10574_vm1, %v8176_v28 }
 0x13e   : > { %4256 = vrot.lane.b32.xlu0 %v4221_v52, %s8329_s13  ;;  %2307 = vrot.lane.b32.xlu1 %v2176_v19, %s8330_s14  ;;  %v3374_v15 = vsel %vm3363_vm4, %v10577_v46, %v3373_v63  ;;  %v3015_v47 = vsel %vm2989_vm5, %v9123_v51, %v3014_v61  ;;  %v2179_v55 = vor.u32 %v2177_v53, %v2175_v22  ;;  %v3044_v49 = vshrl.u32 %v8154_v32, 16  ;;  %v9140_v19 = vld [vmem:[#allocation2 + $0x38] sm:$0xff]  }
 0x13f   : > { %v3047_v52 = vshll.u32 %v8154_v32, 16  ;;  %v3614_v27 = vsel %vm3363_vm4, %v3611_v42, %v3613_v60  ;;  %v4228_v34 = vrot.slane %v9129_v54, 3  ;;  %v3037_v63 = vrot.slane %v3035_v13, 1  ;;  %v9190_v32 = vld [vmem:[#allocation2 + $0x40] sm:$0xff]  }
 0x140   : > { %v3040_v44 = vrot.slane %v3038_v3, 2  ;;  %v2184_v22 = vsel %vm2156_vm7, %v2179_v55, %v2183_v36  ;;  %v9151_v45 = vor.u32 %v3886_v58, %v3883_v11  ;;  %v2522_v9 = vrot.slane %v9140_v19, 1  ;;  %v9205_v3 = vld [vmem:[#allocation2 + $0x40] sm:$0xff]  }
 0x141   : > { %v4229_v42 = vsel %vm4218_vm6, %v4226_v50, %v4228_v34  ;;  %v2213_v6 = vshll.u32 %v9148_v48, 16  ;;  %v2209_v21 = vshrl.u32 %v9053_v24, 16  ;;  %v2991_v38 = vshrl.u32 %v8156_v23, 16 }
 0x142   : > { %2550 = vrot.lane.b32.xlu0 %v2515_v37, %s8325_s28  ;;  %2315 = vrot.lane.b32.xlu1 %v2208_v14, %s8330_s14  ;;  %v3046_v37 = vrot.slane %v3044_v49, 1  ;;  %v3049_v14 = vrot.slane %v3047_v52, 2  ;;  %v3888_v36 = vsel %vm3844_vm8, %v8945_v31, %v9151_v45  ;;  %v3041_v5 = vor.u32 %v3040_v44, %v3037_v63  ;;  %v9211_v49 = vld [vmem:[#allocation2 + $0x48] sm:$0xff]   ;;  %v9220_v63 = vld [vmem:[#allocation2 + $0x40] sm:$0xff]  }
 0x143   : > { %v3846_v50 = vshrl.u32 %v8158_v35, 16  ;;  %v2523_v31 = vsel %vm2508_vm3, %v2520_v56, %v2522_v9  ;;  %v3849_v43 = vshll.u32 %v8158_v35, 16  ;;  %v9178_v24 = vrot.slane %v2213_v6, 1  ;;  %v8162_v56 = vld [vmem:[#allocation2 + $0x38] sm:$0xff]  }
 0x144   : > { %v9162_v8 = vor.u32 %v3049_v14, %v3046_v37  ;;  %v2993_v0 = vrot.slane %v2991_v38, 1  ;;  %v3615_v25 = vrot.slane %v9168_v4, 2  ;;  %v3893_v13 = vshll.u32 %v8162_v56, 16  ;;  %v9302_v4 = vld [vmem:[#allocation2 + $0x50] sm:$0xff]  }
 0x145   : > { %v3851_v16 = vrot.slane %v3849_v43, 3  ;;  %v2762_v12 = vrot.slane %v9190_v32, 1  ;;  %v2221_v44 = vshll.u32 %v9205_v3, 16  ;;  %v3042_v14 = vsel %vm2989_vm5, %v8841_v10, %v3041_v5 }
 0x146   : > { %4262 = vrot.lane.b32.xlu0 %v4227_v1, %s8329_s13  ;;  %4017 = vrot.lane.b32.xlu1 %v3870_v57, %s8331_s15  ;;  %v2994_v1 = vshll.u32 %v8156_v23, 16  ;;  %v3051_v17 = vsel %vm2989_vm5, %v3041_v5, %v9162_v8  ;;  %v2211_v57 = vor.u32 %v2209_v21, %v9085_v20  ;;  %v3024_v20 = vsel %vm2989_vm5, %v3014_v61, %v8836_v41  ;;  %v9198_v61 = vld [vmem:[#allocation2 + $0x48] sm:$0xff]  }
 0x147   : > { %v3616_v11 = vsel %vm3363_vm4, %v3613_v60, %v3615_v25  ;;  %v2524_v41 = vrot.slane %v9180_v30, 1  ;;  %v9208_v60 = vld [vmem:[#allocation2 + $0x40] sm:$0xff]   ;;  %v2764_v55 = vrot.slane %v9198_v61, 1  ;;  %v3379_v35 = vrot.slane %v9211_v49, 2 }
 0x148   : > { %v2996_v7 = vrot.slane %v2994_v1, 2  ;;  %v2216_v59 = vsel %vm2156_vm7, %v2211_v57, %v9178_v24  ;;  %v4230_v6 = vrot.slane %v9220_v63, 3  ;;  %v2217_v21 = vshrl.u32 %v9148_v48, 16  ;;  %v8217_v30 = vld [vmem:[%s10564_s5] sm:$0xff]  }
 0x149   : > { %v2525_v52 = vsel %vm2508_vm3, %v2522_v9, %v2524_v41  ;;  %v2765_v9 = vsel %vm2508_vm3, %v2762_v12, %v2764_v55  ;;  %v2223_v10 = vrot.slane %v2221_v44, 1  ;;  %v2763_v54 = vsel %vm2508_vm3, %v2760_v18, %v2762_v12  ;;  %v9270_v18 = vld [vmem:[#allocation2 + $0x48] sm:$0xff]   ;;  %7859 = vmatprep.subr.bf16.mxu1 %v8217_v30  ;;  %v9445_v49 = vld [vmem:[#allocation2 + $0x60] sm:$0xff]  }
 0x14a   : > { %2794 = vrot.lane.b32.xlu0 %v2759_v62, %s8324_s27  ;;  %2311 = vrot.lane.b32.xlu1 %v2192_v2, %s8330_s14  ;;  %v3848_v62 = vrot.slane %v3846_v50, 2  ;;  %v8180_v2 = vld [vmem:[#allocation2] sm:$0xff]   ;;  %v2997_v53 = vor.u32 %v2996_v7, %v2993_v0  ;;  %v2219_v48 = vor.u32 %v2217_v21, %v9178_v24  ;;  %v4231_v28 = vsel %vm4218_vm6, %v4228_v34, %v4230_v6  ;;  %v9252_v24 = vld [vmem:[#allocation2 + $0x48] sm:$0xff]  }
 0x14b   : > { %2008 = vst.msk [vmem:[#allocation3] sm:$0xff] %vm10574_vm1, %v8180_v2  ;;  %v2225_v32 = vshrl.u32 %v9205_v3, 16  ;;  %v2229_v33 = vshll.u32 %v9252_v24, 16  ;;  %v2766_v63 = vrot.slane %v9302_v4, 1  ;;  %7860 = vmatpush3.bf16.msra.mxu1 %v8217_v30  ;;  %vm4310_vm2 = vcmask 589312  }
 0x14c   : > { %v3006_v58 = vsel %vm2989_vm5, %v2997_v53, %v9123_v51  ;;  %v3852_v46 = vor.u32 %v3851_v16, %v3848_v62  ;;  %v2224_v7 = vsel %vm2156_vm7, %v2219_v48, %v2223_v10  ;;  %v8170_v62 = vld [vmem:[#allocation2 + $0x48] sm:$0xff]  }
 0x14d   : > { %v8200_v16 = vld [vmem:[#allocation2 + $0x8] sm:$0xff]  }
 0x14e   : > { %3409 = vrot.lane.b32.xlu0 %v3374_v15, %s8326_s29  ;;  %3162 = vrot.lane.b32.xlu1 %v3015_v47, %s8328_s12  ;;  %v3890_v15 = vshrl.u32 %v8162_v56, 16  ;;  %v8167_v47 = vld [vmem:[#allocation2 + $0x40] sm:$0xff]   ;;  %v3861_v51 = vsel %vm3844_vm8, %v3852_v46, %v9102_v40  ;;  %2009 = vst.msk [vmem:[#allocation3 + $0x8] sm:$0xff] %vm10574_vm1, %v8200_v16  ;;  %v3617_v46 = vrot.slane %v8170_v62, 2 }
 0x14f   : > { %v3902_v37 = vshll.u32 %v8167_v47, 16  ;;  %v8168_v40 = vld [vmem:[#allocation2 + $0x40] sm:$0xff]  }
 0x150   : > { %v3892_v19 = vrot.slane %v3890_v15, 2  ;;  %v3053_v1 = vshrl.u32 %v8168_v40, 16  ;;  %v3056_v50 = vshll.u32 %v8168_v40, 16  ;;  %v3618_v26 = vsel %vm3363_vm4, %v3615_v25, %v3617_v46  ;;  %v9304_v25 = vld [vmem:[#allocation2 + $0x58] sm:$0xff]  }
 0x151   : > { %v3904_v38 = vrot.slane %v3902_v37, 3  ;;  %v8207_v37 = vld [vmem:[#allocation2 + $0x18] sm:$0xff]  }
 0x152   : > { %3649 = vrot.lane.b32.xlu0 %v3614_v27, %s8327_s30  ;;  %2309 = vrot.lane.b32.xlu1 %v2184_v22, %s8330_s14  ;;  %v3895_v27 = vrot.slane %v3893_v13, 3  ;;  %v3899_v22 = vshrl.u32 %v8167_v47, 16  ;;  %v3055_v0 = vrot.slane %v3053_v1, 1  ;;  %v9274_v13 = vld [vmem:[#allocation2 + $0x50] sm:$0xff]   ;;  %v9285_v47 = vrot.slane %v2229_v33, 1  ;;  %2011 = vst.msk [vmem:[#allocation3 + $0x18] sm:$0xff] %vm10574_vm1, %v8207_v37 }
 0x153   : > { %v3619_v44 = vrot.slane %v9274_v13, 2  ;;  %v8185_v1 = vld [vmem:[#allocation2 + $0x50] sm:$0xff]  }
 0x154   : > { %v3896_v23 = vor.u32 %v3895_v27, %v3892_v19  ;;  %v3901_v5 = vrot.slane %v3899_v22, 2  ;;  %v4232_v19 = vrot.slane %v9270_v18, 3  ;;  %v9296_v22 = vld [vmem:[#allocation2 + $0x50] sm:$0xff]   ;;  %v3920_v16 = vshll.u32 %v8185_v1, 16  ;;  %v9398_v18 = vld [vmem:[#allocation2 + $0x58] sm:$0xff]  }
 0x155   : > { %v8222_v37 = vld [vmem:[#allocation2 + $0x30] sm:$0xff]   ;;  %v2245_v4 = vshll.u32 %v9398_v18, 16 }
 0x156   : > { %4264 = vrot.lane.b32.xlu0 %v4229_v42, %s8329_s13  ;;  %4021 = vrot.lane.b32.xlu1 %v3888_v36, %s8331_s15  ;;  %v3377_v42 = vrot.slane %v9208_v60, 2  ;;  %v8169_v36 = vld [vmem:[#allocation2 + $0x48] sm:$0xff]   ;;  %v9248_v56 = vor.u32 %v3904_v38, %v3901_v5  ;;  %v2227_v60 = vor.u32 %v2225_v32, %v2223_v10  ;;  %v9318_v10 = vld [vmem:[#allocation2 + $0x50] sm:$0xff]   ;;  %2014 = vst.msk [vmem:[#allocation3 + $0x30] sm:$0xff] %vm10574_vm1, %v8222_v37 }
 0x157   : > { %v3062_v57 = vshrl.u32 %v8169_v36, 16  ;;  %v3065_v43 = vshll.u32 %v8169_v36, 16  ;;  %v2528_v36 = vrot.slane %v9296_v22, 1  ;;  %v9324_v38 = vld [vmem:[#allocation2 + $0x50] sm:$0xff]  }
 0x158   : > { %v3906_v34 = vsel %vm3844_vm8, %v3896_v23, %v9248_v56  ;;  %v3378_v12 = vsel %vm3363_vm4, %v3375_v39, %v3377_v42  ;;  %v2232_v39 = vsel %vm2156_vm7, %v2227_v60, %v9285_v47  ;;  %v3381_v33 = vrot.slane %v9324_v38, 2  ;;  %v8221_v60 = vld [vmem:[%s10564_s5 + $0x8] sm:$0xff]  }
 0x159   : > { %7861 = vmatprep.subr.bf16.mxu1 %v8221_v60  ;;  %v9443_v38 = vrot.slane %v2245_v4, 1 }
 0x15a   : > { %2558 = vrot.lane.b32.xlu0 %v2523_v31, %s8325_s28  ;;  %3170 = vrot.lane.b32.xlu1 %v3051_v17, %s8328_s12  ;;  %v3897_v31 = vsel %vm3844_vm8, %v9151_v45, %v3896_v23  ;;  %v3380_v17 = vsel %vm3363_vm4, %v3377_v42, %v3379_v35  ;;  %v3058_v45 = vrot.slane %v3056_v50, 2  ;;  %v4233_v23 = vsel %vm4218_vm6, %v4230_v6, %v4232_v19  ;;  %v8212_v50 = vld [vmem:[#allocation2 + $0x10] sm:$0xff]  }
 0x15b   : > { %v3620_v42 = vsel %vm3363_vm4, %v3617_v46, %v3619_v44  ;;  %v2768_v6 = vrot.slane %v9304_v25, 1  ;;  %2010 = vst.msk [vmem:[#allocation3 + $0x10] sm:$0xff] %vm10574_vm1, %v8212_v50  ;;  %7862 = vmatpush3.bf16.msra.mxu1 %v8221_v60  ;;  %v8192_v60 = vld [vmem:[#allocation2 + $0x58] sm:$0xff]   ;;  %v8259_v25 = vld [vmem:[#allocation2 + $0x50] sm:$0xff]  }
 0x15c   : > { %v9259_v2 = vor.u32 %v3058_v45, %v3055_v0  ;;  %v9336_v0 = vld [vmem:[#allocation2 + $0x50] sm:$0xff]   ;;  %v2237_v45 = vshll.u32 %v9318_v10, 16  ;;  %2018 = vst.msk [vmem:[#allocation3 + $0x50] sm:$0xff] %vm10574_vm1, %v8259_v25  ;;  %v8270_v25 = vld [vmem:[#allocation2 + $0x58] sm:$0xff]  }
 0x15d   : > { %2019 = vst.msk [vmem:[#allocation3 + $0x58] sm:$0xff] %vm10574_vm1, %v8270_v25 }
 0x15e   : > { %3164 = vrot.lane.b32.xlu0 %v3024_v20, %s8328_s12  ;;  %2317 = vrot.lane.b32.xlu1 %v2216_v59, %s8330_s14  ;;  %v3064_v20 = vrot.slane %v3062_v57, 1  ;;  %v3067_v59 = vrot.slane %v3065_v43, 2  ;;  %v9328_v57 = vld [vmem:[#allocation2 + $0x58] sm:$0xff]   ;;  %v2239_v46 = vrot.slane %v2237_v45, 1 }
 0x160   : > { %v9261_v53 = vor.u32 %v3067_v59, %v3064_v20  ;;  %v3917_v20 = vshrl.u32 %v8185_v1, 16 }
 0x162   : > { %3160 = vrot.lane.b32.xlu0 %v3006_v58, %s8328_s12  ;;  %3651 = vrot.lane.b32.xlu1 %v3616_v11, %s8327_s30  ;;  %v8202_v58 = vld [vmem:[#allocation2 + $0x28] sm:$0xff]   ;;  %v3069_v3 = vsel %vm2989_vm5, %v9259_v2, %v9261_v53 }
 0x163   : > { %2013 = vst.msk [vmem:[#allocation3 + $0x28] sm:$0xff] %vm10574_vm1, %v8202_v58  ;;  %v3383_v58 = vrot.slane %v9328_v57, 2  ;;  %v8211_v57 = vld [vmem:[#allocation2 + $0x68] sm:$0xff]  }
 0x166   : > { %4015 = vrot.lane.b32.xlu0 %v3861_v51, %s8331_s15  ;;  %2560 = vrot.lane.b32.xlu1 %v2525_v52, %s8325_s28  ;;  %v8174_v51 = vld [vmem:[#allocation2 + $0x48] sm:$0xff]  }
 0x167   : > { %v8179_v52 = vld [vmem:[#allocation2 + $0x48] sm:$0xff]   ;;  %v2526_v40 = vrot.slane %v8174_v51, 1 }
 0x168   : > { %v3911_v21 = vshll.u32 %v8179_v52, 16 }
 0x169   : > { %v2527_v43 = vsel %vm2508_vm3, %v2524_v41, %v2526_v40  ;;  %v2529_v48 = vsel %vm2508_vm3, %v2526_v40, %v2528_v36  ;;  %v3060_v41 = vsel %vm2989_vm5, %v9162_v8, %v9259_v2  ;;  %v4234_v8 = vrot.slane %v9336_v0, 3 }
 0x16a   : > { %3168 = vrot.lane.b32.xlu0 %v3042_v14, %s8328_s12  ;;  %2800 = vrot.lane.b32.xlu1 %v2765_v9, %s8324_s27  ;;  %v3908_v9 = vshrl.u32 %v8179_v52, 16  ;;  %v2233_v2 = vshrl.u32 %v9252_v24, 16  ;;  %v3919_v52 = vrot.slane %v3917_v20, 2  ;;  %v3384_v24 = vsel %vm3363_vm4, %v3381_v33, %v3383_v58  ;;  %v8229_v20 = vld [vmem:[%s10564_s5 + $0x20] ss:$0 sps:$4 sm:$0xff]  }
 0x16e   : > { %4023 = vrot.lane.b32.xlu0 %v3897_v31, %s8331_s15  ;;  %3415 = vrot.lane.b32.xlu1 %v3380_v17, %s8326_s29  ;;  %v3910_v17 = vrot.slane %v3908_v9, 2 }
 0x172   : > { %4266 = vrot.lane.b32.xlu0 %v4231_v28, %s8329_s13  ;;  %2319 = vrot.lane.b32.xlu1 %v2224_v7, %s8330_s14  ;;  %v3913_v28 = vrot.slane %v3911_v21, 3  ;;  %v8186_v7 = vld [vmem:[#allocation2 + $0x50] sm:$0xff]   ;;  %v4235_v21 = vsel %vm4218_vm6, %v4232_v19, %v4234_v8 }
 0x174   : > { %v3914_v32 = vor.u32 %v3913_v28, %v3910_v17 }
 0x175   : > { %v9267_v11 = vpop.permute.xlu1 %2792 }
 0x176   : > { %2798 = vrot.lane.b32.xlu0 %v2763_v54, %s8324_s27  ;;  %4025 = vrot.lane.b32.xlu1 %v3906_v34, %s8331_s15  ;;  %v8187_v54 = vld [vmem:[#allocation2 + $0x58] sm:$0xff]   ;;  %v2769_v34 = vsel %vm2508_vm3, %v2766_v63, %v2768_v6  ;;  %v3915_v40 = vsel %vm3844_vm8, %v9248_v56, %v3914_v32 }
 0x177   : > { %v9272_v15 = vpop.permute.xlu0 %2546  ;;  %v3083_v9 = vshll.u32 %v8187_v54, 16 }
 0x179   : > { %v9293_v27 = vpop.permute.xlu1 %3407  ;;  %v3085_v45 = vrot.slane %v3083_v9, 2  ;;  %v2532_v9 = vrot.slane %v9445_v49, 1 }
 0x17a   : > { %3413 = vrot.lane.b32.xlu0 %v3378_v12, %s8326_s29  ;;  %3174 = vrot.lane.b32.xlu1 %v3069_v3, %s8328_s12  ;;  %v3071_v12 = vshrl.u32 %v8186_v7, 16  ;;  %v3074_v3 = vshll.u32 %v8186_v7, 16 }
 0x17c   : > { %v9300_v14 = vpop.permute.xlu0 %3645  ;;  %v3073_v17 = vrot.slane %v3071_v12, 1 }
 0x17e   : > { %3653 = vrot.lane.b32.xlu0 %v3618_v26, %s8327_s30  ;;  %2321 = vrot.lane.b32.xlu1 %v2232_v39, %s8330_s14  ;;  %v3922_v26 = vrot.slane %v3920_v16, 3  ;;  %v3080_v39 = vshrl.u32 %v8187_v54, 16  ;;  %v2241_v16 = vshrl.u32 %v9318_v10, 16  ;;  %v4446_v54 = vsel %vm678_vm0, %v8229_v20, 0 }
 0x17f   : > { %v3382_v10 = vsel %vm3363_vm4, %v3379_v35, %v3381_v33 }
 0x180   : > { %v3082_v28 = vrot.slane %v3080_v39, 1  ;;  %v2243_v12 = vor.u32 %v2241_v16, %v2239_v46 }
 0x182   : > { %4268 = vrot.lane.b32.xlu0 %v4233_v23, %s8329_s13  ;;  %3655 = vrot.lane.b32.xlu1 %v3620_v42, %s8327_s30  ;;  %v8224_v23 = vld [vmem:[%s10564_s5 + $0x10] sm:$0xff]   ;;  %v2235_v42 = vor.u32 %v2233_v2, %v9285_v47  ;;  %v8226_v47 = vld [vmem:[%s10564_s5 + $0x18] sm:$0xff]  }
 0x183   : > { %v9320_v5 = vpop.permute.xlu1 %3166  ;;  %7863 = vmatprep.subr.bf16.mxu1 %v8224_v23 }
 0x184   : > { %v9326_v31 = vpop.permute.xlu0 %4260  ;;  %v2240_v50 = vsel %vm2156_vm7, %v2235_v42, %v2239_v46  ;;  %7864 = vmatpush3.bf16.msra.mxu1 %v8224_v23  ;;  %v9463_v23 = vld [vmem:[#allocation2 + $0x68] sm:$0xff]  }
 0x185   : > { %7865 = vmatprep.subr.bf16.mxu1 %v8226_v47 }
 0x186   : > { %2562 = vrot.lane.b32.xlu0 %v2527_v43, %s8325_s28  ;;  %2564 = vrot.lane.b32.xlu1 %v2529_v48, %s8325_s28  ;;  %v9392_v43 = vor.u32 %v3922_v26, %v3919_v52  ;;  %v3076_v48 = vrot.slane %v3074_v3, 2  ;;  %v9438_v3 = vld [vmem:[#allocation2 + $0x60] sm:$0xff]   ;;  %v8196_v52 = vld [vmem:[#allocation2 + $0x58] sm:$0xff]   ;;  %v2248_v26 = vsel %vm2156_vm7, %v2243_v12, %v9443_v38 }
 0x187   : > { %v3623_v37 = vrot.slane %v9438_v3, 2  ;;  %v3926_v42 = vshrl.u32 %v8196_v52, 16  ;;  %v9603_v3 = vld [vmem:[#allocation2 + $0x70] sm:$0xff]  }
 0x188   : > { %v2314_v59 = vpop.permute.xlu1 %2313  ;;  %v2555_v62 = vpop.permute.xlu0 %2554  ;;  %v3924_v30 = vsel %vm3844_vm8, %v3914_v32, %v9392_v43  ;;  %7866 = vmatpush3.bf16.msra.mxu1 %v8226_v47  ;;  %v8241_v47 = vld [vmem:[#allocation2 + $0x40] sm:$0xff]  }
 0x189   : > { %2364 = vst.msk [vmem:[#allocation3 + $0x20] sm:$0xff] %vm2359_vm9, %v2314_v59  ;;  %v9416_v59 = vor.u32 %v3085_v45, %v3082_v28  ;;  %8041 = vmatprep.subr.msk.bf16.mxu1 %vm678_vm0, %v8229_v20  ;;  %v9482_v45 = vld [vmem:[#allocation2 + $0x60] sm:$0xff]   ;;  %v9484_v20 = vld [vmem:[#allocation2 + $0x68] sm:$0xff]   ;;  %v3928_v4 = vrot.slane %v3926_v42, 2 }
 0x18a   : > { %3172 = vrot.lane.b32.xlu0 %v3060_v41, %s8328_s12  ;;  %2605 = vst.msk [vmem:[#allocation3 + $0x20] sm:$0xff] %vm2600_vm10, %v2555_v62  ;;  %2804 = vrot.lane.b32.xlu1 %v2769_v34, %s8324_s27  ;;  %v9414_v41 = vor.u32 %v3076_v48, %v3073_v17  ;;  %v8188_v62 = vld [vmem:[#allocation2 + $0x58] sm:$0xff]   ;;  %v3929_v17 = vshll.u32 %v8196_v52, 16  ;;  %v8203_v48 = vld [vmem:[#allocation2 + $0x60] sm:$0xff]  }
 0x18b   : > { %v8234_v34 = vld [vmem:[#allocation2 + $0x38] sm:$0xff]   ;;  %v3621_v2 = vrot.slane %v8188_v62, 2  ;;  %2016 = vst.msk [vmem:[#allocation3 + $0x40] sm:$0xff] %vm10574_vm1, %v8241_v47  ;;  %v3938_v12 = vshll.u32 %v8203_v48, 16 }
 0x18c   : > { %v9364_v51 = vpop.permute.xlu1 %3643  ;;  %v3087_v32 = vsel %vm2989_vm5, %v9414_v41, %v9416_v59  ;;  %2015 = vst.msk [vmem:[#allocation3 + $0x38] sm:$0xff] %vm10574_vm1, %v8234_v34  ;;  %7868 = vmatpush3.bf16.msra.mxu1 %v4446_v54  ;;  %v3931_v54 = vrot.slane %v3929_v17, 3  ;;  %v3078_v22 = vsel %vm2989_vm5, %v9261_v53, %v9414_v41  ;;  %v2249_v41 = vshrl.u32 %v9398_v18, 16 }
 0x18d   : > { %v3622_v46 = vsel %vm3363_vm4, %v3619_v44, %v3621_v2  ;;  %v3940_v47 = vrot.slane %v3938_v12, 3 }
 0x18e   : > { %4027 = vrot.lane.b32.xlu0 %v3915_v40, %s8331_s15  ;;  %3419 = vrot.lane.b32.xlu1 %v3384_v24, %s8326_s29  ;;  %v2530_v40 = vrot.slane %v8192_v60, 1  ;;  %v9460_v24 = vld [vmem:[#allocation2 + $0x60] sm:$0xff]   ;;  %v8205_v60 = vld [vmem:[#allocation2 + $0x68] sm:$0xff]   ;;  %v2251_v18 = vor.u32 %v2249_v41, %v9443_v38 }
 0x18f   : > { %v2770_v28 = vrot.slane %v9460_v24, 1 }
 0x190   : > { %v2306_v56 = vpop.permute.xlu0 %2305  ;;  %v9385_v1 = vpop.permute.xlu1 %2552  ;;  %v2531_v62 = vsel %vm2508_vm3, %v2528_v36, %v2530_v40  ;;  %v2533_v16 = vsel %vm2508_vm3, %v2530_v40, %v2532_v9  ;;  %v3387_v40 = vrot.slane %v9484_v20, 2 }
 0x191   : > { %2360 = vst.msk [vmem:[#allocation3] sm:$0xff] %vm2359_vm9, %v2306_v56  ;;  %v9469_v56 = vld [vmem:[#allocation2 + $0x60] sm:$0xff]  }
 0x192   : > { %2601 = vst.msk [vmem:[#allocation3] sm:$0xff] %vm2600_vm10, %v9272_v15  ;;  %4270 = vrot.lane.b32.xlu0 %v4235_v21, %s8329_s13  ;;  %2323 = vrot.lane.b32.xlu1 %v2240_v50, %s8330_s14  ;;  %v2767_v15 = vsel %vm2508_vm3, %v2764_v55, %v2766_v63  ;;  %v9426_v63 = vld [vmem:[#allocation2 + $0x58] sm:$0xff]   ;;  %v3624_v50 = vsel %vm3363_vm4, %v3621_v2, %v3623_v37  ;;  %v2253_v34 = vshll.u32 %v9469_v56, 16 }
 0x193   : > { %v4236_v39 = vrot.slane %v9426_v63, 3  ;;  %v9548_v63 = vld [vmem:[#allocation2 + $0x68] sm:$0xff]  }
 0x194   : > { %v9400_v19 = vpop.permute.xlu0 %4019  ;;  %v9402_v7 = vpop.permute.xlu1 %2548  ;;  %v2255_v42 = vrot.slane %v2253_v34, 1  ;;  %v2261_v24 = vshll.u32 %v9548_v63, 16 }
 0x195   : > { %v4237_v21 = vsel %vm4218_vm6, %v4234_v8, %v4236_v39 }
 0x196   : > { %2802 = vrot.lane.b32.xlu0 %v2767_v15, %s8324_s27  ;;  %4029 = vrot.lane.b32.xlu1 %v3924_v30, %s8331_s15  ;;  %v2772_v15 = vrot.slane %v9463_v23, 1  ;;  %v9490_v30 = vld [vmem:[#allocation2 + $0x60] sm:$0xff]  }
 0x197   : > { %v4238_v53 = vrot.slane %v9490_v30, 3 }
 0x198   : > { %v9422_v61 = vpop.permute.xlu0 %4258  ;;  %v9424_v55 = vpop.permute.xlu1 %2788  ;;  %v2773_v52 = vsel %vm2508_vm3, %v2770_v28, %v2772_v15 }
 0x19a   : > { %3417 = vrot.lane.b32.xlu0 %v3382_v10, %s8326_s29  ;;  %3178 = vrot.lane.b32.xlu1 %v3087_v32, %s8328_s12  ;;  %v3935_v10 = vshrl.u32 %v8203_v48, 16  ;;  %v8204_v32 = vld [vmem:[#allocation2 + $0x60] sm:$0xff]  }
 0x19b   : > { %v3089_v48 = vshrl.u32 %v8204_v32, 16 }
 0x19c   : > { %v9447_v35 = vpop.permute.xlu0 %2790  ;;  %v9449_v33 = vpop.permute.xlu1 %3403 }
 0x19d   : > { %v3091_v12 = vrot.slane %v3089_v48, 1 }
 0x19e   : > { %3657 = vrot.lane.b32.xlu0 %v3622_v46, %s8327_s30  ;;  %2325 = vrot.lane.b32.xlu1 %v2248_v26, %s8330_s14  ;;  %v3932_v46 = vor.u32 %v3931_v54, %v3928_v4  ;;  %v3385_v26 = vrot.slane %v9482_v45, 2  ;;  %v3098_v45 = vshrl.u32 %v8205_v60, 16  ;;  %v3101_v4 = vshll.u32 %v8205_v60, 16  ;;  %v8252_v54 = vld [vmem:[#allocation2 + $0x48] sm:$0xff]  }
 0x19f   : > { %2017 = vst.msk [vmem:[#allocation3 + $0x48] sm:$0xff] %vm10574_vm1, %v8252_v54 }
 0x1a0   : > { %v9465_v13 = vpop.permute.xlu0 %3405  ;;  %v9467_v44 = vpop.permute.xlu1 %3647  ;;  %v3100_v38 = vrot.slane %v3098_v45, 1 }
 0x1a2   : > { %4272 = vrot.lane.b32.xlu0 %v4237_v21, %s8329_s13  ;;  %3659 = vrot.lane.b32.xlu1 %v3624_v50, %s8327_s30  ;;  %v3937_v21 = vrot.slane %v3935_v10, 2 }
 0x1a4   : > { %v2787_v0 = vpop.permute.xlu0 %2786  ;;  %v9487_v8 = vpop.permute.xlu1 %2556 }
 0x1a5   : > { %2841 = vst.msk [vmem:[#allocation3] sm:$0xff] %vm2840_vm11, %v2787_v0  ;;  %v3092_v0 = vshll.u32 %v8204_v32, 16  ;;  %v2256_v32 = vsel %vm2156_vm7, %v2251_v18, %v2255_v42 }
 0x1a6   : > { %2566 = vrot.lane.b32.xlu0 %v2531_v62, %s8325_s28  ;;  %2568 = vrot.lane.b32.xlu1 %v2533_v16, %s8325_s28  ;;  %v3933_v62 = vsel %vm3844_vm8, %v9392_v43, %v3932_v46  ;;  %v3388_v16 = vsel %vm3363_vm4, %v3385_v26, %v3387_v40  ;;  %v4239_v43 = vsel %vm4218_vm6, %v4236_v39, %v4238_v53 }
 0x1a7   : > { %v3094_v60 = vrot.slane %v3092_v0, 2  ;;  %v3386_v0 = vsel %vm3363_vm4, %v3383_v58, %v3385_v26  ;;  %v9588_v26 = vld [vmem:[#allocation2 + $0x70] sm:$0xff]  }
 0x1a8   : > { %v9502_v2 = vpop.permute.xlu0 %3401  ;;  %v2797_v36 = vpop.permute.xlu1 %2796 }
 0x1aa   : > { %3176 = vrot.lane.b32.xlu0 %v3078_v22, %s8328_s12  ;;  %2808 = vrot.lane.b32.xlu1 %v2773_v52, %s8324_s27  ;;  %v9539_v22 = vor.u32 %v3940_v47, %v3937_v21  ;;  %v3103_v52 = vrot.slane %v3101_v4, 2  ;;  %v2771_v21 = vsel %vm2508_vm3, %v2768_v6, %v2770_v28  ;;  %v9560_v47 = vor.u32 %v3094_v60, %v3091_v12  ;;  %v9609_v60 = vld [vmem:[#allocation2 + $0x70] sm:$0xff]  }
 0x1ab   : > { %v2257_v6 = vshrl.u32 %v9469_v56, 16  ;;  %v9582_v56 = vld [vmem:[#allocation2 + $0x70] sm:$0xff]   ;;  %v9586_v4 = vrot.slane %v2261_v24, 1 }
 0x1ac   : > { %v9518_v50 = vpop.permute.xlu0 %3641  ;;  %v9520_v17 = vpop.permute.xlu1 %3411  ;;  %v9562_v48 = vor.u32 %v3103_v52, %v3100_v38 }
 0x1ae   : > { %4031 = vrot.lane.b32.xlu0 %v3933_v62, %s8331_s15  ;;  %3423 = vrot.lane.b32.xlu1 %v3388_v16, %s8326_s29  ;;  %v2259_v62 = vor.u32 %v2257_v6, %v2255_v42  ;;  %v8216_v16 = vld [vmem:[#allocation2 + $0x68] sm:$0xff]  }
 0x1af   : > { %v3947_v12 = vshll.u32 %v8216_v16, 16 }
 0x1b0   : > { %v9531_v34 = vpop.permute.xlu0 %4256  ;;  %v2308_v10 = vpop.permute.xlu1 %2307  ;;  %v2264_v18 = vsel %vm2156_vm7, %v2259_v62, %v9586_v4 }
 0x1b1   : > { %2361 = vst.msk [vmem:[#allocation3 + $0x8] sm:$0xff] %vm2359_vm9, %v2308_v10  ;;  %v3627_v10 = vrot.slane %v9582_v56, 2  ;;  %v3949_v30 = vrot.slane %v3947_v12, 3  ;;  %v8277_v12 = vld [vmem:[#allocation2 + $0x80] sm:$0xff]  }
 0x1b2   : > { %4274 = vrot.lane.b32.xlu0 %v4239_v43, %s8329_s13  ;;  %2602 = vst.msk [vmem:[#allocation3 + $0x8] sm:$0xff] %vm2600_vm10, %v9402_v7  ;;  %2327 = vrot.lane.b32.xlu1 %v2256_v32, %s8330_s14  ;;  %v3942_v7 = vsel %vm3844_vm8, %v3932_v46, %v9539_v22  ;;  %v3944_v32 = vshrl.u32 %v8216_v16, 16  ;;  %v8275_v16 = vld [vmem:[#allocation2 + $0x70] sm:$0xff]  }
 0x1b3   : > { %2842 = vst.msk [vmem:[#allocation3 + $0x8] sm:$0xff] %vm2840_vm11, %v9424_v55  ;;  %v8206_v55 = vld [vmem:[#allocation2 + $0x68] sm:$0xff]  }
 0x1b4   : > { %v9550_v39 = vpop.permute.xlu0 %2550  ;;  %v2316_v41 = vpop.permute.xlu1 %2315  ;;  %v3625_v45 = vrot.slane %v8206_v55, 2  ;;  %v9620_v55 = vld [vmem:[#allocation2 + $0x70] sm:$0xff]   ;;  %2022 = vst.msk [vmem:[#allocation3 + $0x70] sm:$0xff] %vm10574_vm1, %v8275_v16  ;;  %2024 = vst.msk [vmem:[#allocation3 + $0x80] sm:$0xff] %vm10574_vm1, %v8277_v12 }
 0x1b5   : > { %2365 = vst.msk [vmem:[#allocation3 + $0x28] sm:$0xff] %vm2359_vm9, %v2316_v41  ;;  %v2536_v41 = vrot.slane %v9588_v26, 1  ;;  %v3953_v62 = vshrl.u32 %v9620_v55, 16 }
 0x1b6   : > { %2806 = vrot.lane.b32.xlu0 %v2771_v21, %s8324_s27  ;;  %2606 = vst.msk [vmem:[#allocation3 + $0x28] sm:$0xff] %vm2600_vm10, %v9487_v8  ;;  %4033 = vrot.lane.b32.xlu1 %v3942_v7, %s8331_s15  ;;  %v3105_v8 = vsel %vm2989_vm5, %v9560_v47, %v9562_v48  ;;  %v3626_v42 = vsel %vm3363_vm4, %v3623_v37, %v3625_v45  ;;  %v9605_v37 = vld [vmem:[#allocation2 + $0x78] sm:$0xff]   ;;  %v9618_v7 = vld [vmem:[#allocation2 + $0x70] sm:$0xff]  }
 0x1b7   : > { %2846 = vst.msk [vmem:[#allocation3 + $0x28] sm:$0xff] %vm2840_vm11, %v2797_v36  ;;  %v9580_v36 = vld [vmem:[#allocation2 + $0x68] sm:$0xff]   ;;  %v9616_v21 = vld [vmem:[#allocation2 + $0x78] sm:$0xff]   ;;  %v3955_v25 = vrot.slane %v3953_v62, 2 }
 0x1b8   : > { %v9571_v28 = vpop.permute.xlu0 %4262  ;;  %v4018_v46 = vpop.permute.xlu1 %4017  ;;  %v4240_v43 = vrot.slane %v9580_v36, 3  ;;  %v3391_v49 = vrot.slane %v9616_v21, 2  ;;  %v8233_v36 = vld [vmem:[#allocation2 + $0x80] sm:$0xff]  }
 0x1b9   : > { %v3974_v23 = vshll.u32 %v8233_v36, 16 }
 0x1ba   : > { %3421 = vrot.lane.b32.xlu0 %v3386_v0, %s8326_s29  ;;  %3182 = vrot.lane.b32.xlu1 %v3105_v8, %s8328_s12  ;;  %v2776_v0 = vrot.slane %v9605_v37, 1  ;;  %v8274_v8 = vld [vmem:[#allocation2 + $0x68] sm:$0xff]  }
 0x1bb   : > { %2021 = vst.msk [vmem:[#allocation3 + $0x68] sm:$0xff] %vm10574_vm1, %v8274_v8 }
 0x1bc   : > { %v2795_v54 = vpop.permute.xlu0 %2794  ;;  %v2312_v58 = vpop.permute.xlu1 %2311 }
 0x1bd   : > { %2845 = vst.msk [vmem:[#allocation3 + $0x20] sm:$0xff] %vm2840_vm11, %v2795_v54 }
 0x1be   : > { %2363 = vst.msk [vmem:[#allocation3 + $0x18] sm:$0xff] %vm2359_vm9, %v2312_v58  ;;  %3661 = vrot.lane.b32.xlu0 %v3626_v42, %s8327_s30  ;;  %2329 = vrot.lane.b32.xlu1 %v2264_v18, %s8330_s14  ;;  %v8227_v58 = vld [vmem:[#allocation2 + $0x70] sm:$0xff]   ;;  %v8228_v42 = vld [vmem:[#allocation2 + $0x78] sm:$0xff]  }
 0x1bf   : > { %2604 = vst.msk [vmem:[#allocation3 + $0x18] sm:$0xff] %vm2600_vm10, %v9385_v1  ;;  %v2534_v1 = vrot.slane %v8211_v57, 1  ;;  %v8276_v57 = vld [vmem:[#allocation2 + $0x78] sm:$0xff]  }
 0x1c0   : > { %2844 = vst.msk [vmem:[#allocation3 + $0x18] sm:$0xff] %vm2840_vm11, %v9267_v11  ;;  %v9611_v38 = vpop.permute.xlu0 %3409  ;;  %v3163_v52 = vpop.permute.xlu1 %3162  ;;  %v4241_v11 = vsel %vm4218_vm6, %v4238_v53, %v4240_v43  ;;  %v8273_v53 = vld [vmem:[#allocation2 + $0x60] sm:$0xff]  }
 0x1c1   : > { %3218 = vst.msk [vmem:[#allocation3 + $0x18] sm:$0xff] %vm3214_vm12, %v9320_v5  ;;  %3216 = vst.msk [vmem:[#allocation3 + $0x8] sm:$0xff] %vm3214_vm12, %v3163_v52  ;;  %v3628_v5 = vsel %vm3363_vm4, %v3625_v45, %v3627_v10  ;;  %v2269_v45 = vshll.u32 %v9618_v7, 16  ;;  %v8278_v52 = vld [vmem:[#allocation2 + $0x88] sm:$0xff]  }
 0x1c2   : > { %3459 = vst.msk [vmem:[#allocation3 + $0x18] sm:$0xff] %vm3455_vm13, %v9293_v27  ;;  %4276 = vrot.lane.b32.xlu0 %v4241_v11, %s8329_s13  ;;  %3457 = vst.msk [vmem:[#allocation3 + $0x8] sm:$0xff] %vm3455_vm13, %v9449_v33  ;;  %3663 = vrot.lane.b32.xlu1 %v3628_v5, %s8327_s30  ;;  %v3946_v27 = vrot.slane %v3944_v32, 2  ;;  %v2535_v33 = vsel %vm2508_vm3, %v2532_v9, %v2534_v1  ;;  %v9658_v9 = vld [vmem:[#allocation2 + $0x70] sm:$0xff]  }
 0x1c3   : > { %3699 = vst.msk [vmem:[#allocation3 + $0x18] sm:$0xff] %vm3695_vm14, %v9467_v44  ;;  %3697 = vst.msk [vmem:[#allocation3 + $0x8] sm:$0xff] %vm3695_vm14, %v9364_v51  ;;  %v2537_v44 = vsel %vm2508_vm3, %v2534_v1, %v2536_v41  ;;  %v2774_v51 = vrot.slane %v9603_v3, 1  ;;  %v2265_v1 = vshrl.u32 %v9548_v63, 16  ;;  %v9698_v5 = vrot.slane %v2269_v45, 1 }
 0x1c4   : > { %4071 = vst.msk [vmem:[#allocation3 + $0x8] sm:$0xff] %vm4069_vm15, %v4018_v46  ;;  %v9643_v6 = vpop.permute.xlu0 %3649  ;;  %v2310_v24 = vpop.permute.xlu1 %2309  ;;  %v3389_v46 = vrot.slane %v9609_v60, 2  ;;  %v3950_v54 = vor.u32 %v3949_v30, %v3946_v27  ;;  %v3110_v63 = vshll.u32 %v8227_v58, 16  ;;  %v3116_v30 = vshrl.u32 %v8228_v42, 16  ;;  %v8235_v60 = vld [vmem:[#allocation2 + $0x78] sm:$0xff]  }
 0x1c5   : > { %4312 = vst.msk [vmem:[#allocation3 + $0x8] sm:$0xff] %vm4310_vm2, %v9422_v61  ;;  %v3956_v61 = vshll.u32 %v9620_v55, 16 }
 0x1c6   : > { %2362 = vst.msk [vmem:[#allocation3 + $0x10] sm:$0xff] %vm2359_vm9, %v2310_v24  ;;  %2570 = vrot.lane.b32.xlu0 %v2535_v33, %s8325_s28  ;;  %2572 = vrot.lane.b32.xlu1 %v2537_v44, %s8325_s28  ;;  %v2267_v33 = vor.u32 %v2265_v1, %v9586_v4  ;;  %v3112_v16 = vrot.slane %v3110_v63, 2  ;;  %v3118_v4 = vrot.slane %v3116_v30, 1  ;;  %v2273_v63 = vshrl.u32 %v9618_v7, 16 }
 0x1c7   : > { %2020 = vst.msk [vmem:[#allocation3 + $0x60] sm:$0xff] %vm10574_vm1, %v8273_v53  ;;  %2023 = vst.msk [vmem:[#allocation3 + $0x78] sm:$0xff] %vm10574_vm1, %v8276_v57  ;;  %v3958_v27 = vrot.slane %v3956_v61, 3  ;;  %v3119_v53 = vshll.u32 %v8228_v42, 16 }
 0x1c8   : > { %2603 = vst.msk [vmem:[#allocation3 + $0x10] sm:$0xff] %vm2600_vm10, %v9550_v39  ;;  %v9672_v18 = vpop.permute.xlu0 %4264  ;;  %v4022_v32 = vpop.permute.xlu1 %4021  ;;  %v3096_v39 = vsel %vm2989_vm5, %v9416_v59, %v9560_v47  ;;  %v3951_v59 = vsel %vm3844_vm8, %v9539_v22, %v3950_v54  ;;  %v4242_v47 = vrot.slane %v9658_v9, 3  ;;  %v3107_v22 = vshrl.u32 %v8227_v58, 16  ;;  %v8232_v58 = vld [vmem:[#allocation2 + $0x78] sm:$0xff]  }
 0x1c9   : > { %2843 = vst.msk [vmem:[#allocation3 + $0x10] sm:$0xff] %vm2840_vm11, %v9447_v35  ;;  %v2777_v35 = vsel %vm2508_vm3, %v2774_v51, %v2776_v0  ;;  %v2272_v45 = vsel %vm2156_vm7, %v2267_v33, %v9698_v5  ;;  %v9714_v62 = vor.u32 %v3958_v27, %v3955_v25  ;;  %v3121_v61 = vrot.slane %v3119_v53, 2  ;;  %v8236_v53 = vld [vmem:[#allocation2 + $0x78] sm:$0xff]  }
 0x1ca   : > { %4073 = vst.msk [vmem:[#allocation3 + $0x18] sm:$0xff] %vm4069_vm15, %v4022_v32  ;;  %3180 = vrot.lane.b32.xlu0 %v3096_v39, %s8328_s12  ;;  %2812 = vrot.lane.b32.xlu1 %v2777_v35, %s8324_s27  ;;  %v4243_v44 = vsel %vm4218_vm6, %v4240_v43, %v4242_v47  ;;  %v9740_v32 = vld [vmem:[#allocation2 + $0x80] sm:$0xff]   ;;  %v3965_v39 = vshll.u32 %v8232_v58, 16 }
 0x1cb   : > { %4314 = vst.msk [vmem:[#allocation3 + $0x18] sm:$0xff] %vm4310_vm2, %v9571_v28  ;;  %v3392_v28 = vsel %vm3363_vm4, %v3389_v46, %v3391_v49  ;;  %v9738_v42 = vor.u32 %v3121_v61, %v3118_v4  ;;  %v3631_v12 = vrot.slane %v9740_v32, 2  ;;  %v9802_v4 = vld [vmem:[#allocation2 + $0x80] sm:$0xff]  }
 0x1cc   : > { %v2559_v55 = vpop.permute.xlu0 %2558  ;;  %v3171_v11 = vpop.permute.xlu1 %3170  ;;  %2025 = vst.msk [vmem:[#allocation3 + $0x88] sm:$0xff] %vm10574_vm1, %v8278_v52  ;;  %v3976_v52 = vrot.slane %v3974_v23, 3  ;;  %vm4390_vm1 = vcmask 588800   ;;  %v2540_v23 = vrot.slane %v9802_v4, 1 }
 0x1cd   : > { %3220 = vst.msk [vmem:[#allocation3 + $0x28] sm:$0xff] %vm3214_vm12, %v3171_v11  ;;  %v9767_v11 = vld [vmem:[#allocation2 + $0x80] sm:$0xff]  }
 0x1ce   : > { %4035 = vrot.lane.b32.xlu0 %v3951_v59, %s8331_s15  ;;  %3461 = vst.msk [vmem:[#allocation3 + $0x28] sm:$0xff] %vm3455_vm13, %v9520_v17  ;;  %3427 = vrot.lane.b32.xlu1 %v3392_v28, %s8326_s29  ;;  %v3109_v17 = vrot.slane %v3107_v22, 1  ;;  %v2285_v33 = vshll.u32 %v9767_v11, 16 }
 0x1d0   : > { %v3165_v24 = vpop.permute.xlu0 %3164  ;;  %v2318_v8 = vpop.permute.xlu1 %2317 }
 0x1d1   : > { %3217 = vst.msk [vmem:[#allocation3 + $0x10] sm:$0xff] %vm3214_vm12, %v3165_v24  ;;  %v2275_v24 = vor.u32 %v2273_v63, %v9698_v5  ;;  %v9800_v5 = vld [vmem:[#allocation2 + $0x80] sm:$0xff]  }
 0x1d2   : > { %2366 = vst.msk [vmem:[#allocation3 + $0x30] sm:$0xff] %vm2359_vm9, %v2318_v8  ;;  %4278 = vrot.lane.b32.xlu0 %v4243_v44, %s8329_s13  ;;  %2331 = vrot.lane.b32.xlu1 %v2272_v45, %s8330_s14  ;;  %v4244_v45 = vrot.slane %v8236_v53, 3 }
 0x1d3   : > { %3458 = vst.msk [vmem:[#allocation3 + $0x10] sm:$0xff] %vm3455_vm13, %v9465_v13  ;;  %v2775_v13 = vsel %vm2508_vm3, %v2772_v15, %v2774_v51  ;;  %v8230_v15 = vld [vmem:[#allocation2 + $0x78] sm:$0xff]  }
 0x1d4   : > { %2607 = vst.msk [vmem:[#allocation3 + $0x30] sm:$0xff] %vm2600_vm10, %v2559_v55  ;;  %v3161_v43 = vpop.permute.xlu0 %3160  ;;  %v3652_v57 = vpop.permute.xlu1 %3651  ;;  %v3629_v59 = vrot.slane %v8230_v15, 2  ;;  %v8242_v15 = vld [vmem:[#allocation2 + $0x80] sm:$0xff]  }
 0x1d5   : > { %3698 = vst.msk [vmem:[#allocation3 + $0x10] sm:$0xff] %vm3695_vm14, %v9300_v14  ;;  %3701 = vst.msk [vmem:[#allocation3 + $0x28] sm:$0xff] %vm3695_vm14, %v3652_v57  ;;  %v3960_v14 = vsel %vm3844_vm8, %v3950_v54, %v9714_v62  ;;  %v3962_v54 = vshrl.u32 %v8232_v58, 16  ;;  %v8239_v57 = vld [vmem:[#allocation2 + $0x78] sm:$0xff]  }
 0x1d6   : > { %4072 = vst.msk [vmem:[#allocation3 + $0x10] sm:$0xff] %vm4069_vm15, %v9400_v19  ;;  %v3113_v19 = vor.u32 %v3112_v16, %v3109_v17  ;;  %2810 = vrot.lane.b32.xlu0 %v2775_v13, %s8324_s27  ;;  %4037 = vrot.lane.b32.xlu1 %v3960_v14, %s8331_s15  ;;  %v2281_v17 = vshrl.u32 %v8235_v60, 16  ;;  %v9798_v16 = vrot.slane %v2285_v33, 1  ;;  %v4245_v14 = vsel %vm4218_vm6, %v4242_v47, %v4244_v45  ;;  %v9849_v33 = vld [vmem:[#allocation2 + $0x88] sm:$0xff]  }
 0x1d7   : > { %4313 = vst.msk [vmem:[#allocation3 + $0x10] sm:$0xff] %vm4310_vm2, %v9326_v31  ;;  %v3971_v31 = vshrl.u32 %v8233_v36, 16  ;;  %v3964_v55 = vrot.slane %v3962_v54, 2  ;;  %v8244_v36 = vld [vmem:[#allocation2 + $0x80] sm:$0xff]  }
 0x1d8   : > { %3215 = vst.msk [vmem:[#allocation3] sm:$0xff] %vm3214_vm12, %v3161_v43  ;;  %v4016_v3 = vpop.permute.xlu0 %4015  ;;  %v2561_v51 = vpop.permute.xlu1 %2560  ;;  %v3123_v35 = vsel %vm2989_vm5, %v3113_v19, %v9738_v42  ;;  %v8245_v43 = vld [vmem:[#allocation2 + $0x88] sm:$0xff]   ;;  %v3125_v9 = vshrl.u32 %v8244_v36, 16  ;;  %v3128_v54 = vshll.u32 %v8244_v36, 16 }
 0x1d9   : > { %3456 = vst.msk [vmem:[#allocation3] sm:$0xff] %vm3455_vm13, %v9502_v2  ;;  %v3390_v2 = vsel %vm3363_vm4, %v3387_v40, %v3389_v46  ;;  %v3967_v40 = vrot.slane %v3965_v39, 3  ;;  %v3114_v46 = vsel %vm2989_vm5, %v9562_v48, %v3113_v19  ;;  %v2277_v48 = vshll.u32 %v8235_v60, 16 }
 0x1da   : > { %3696 = vst.msk [vmem:[#allocation3] sm:$0xff] %vm3695_vm14, %v9518_v50  ;;  %3425 = vrot.lane.b32.xlu0 %v3390_v2, %s8326_s29  ;;  %3186 = vrot.lane.b32.xlu1 %v3123_v35, %s8328_s12  ;;  %v3973_v50 = vrot.slane %v3971_v31, 2  ;;  %v4246_v31 = vrot.slane %v9800_v5, 3  ;;  %v3134_v47 = vshrl.u32 %v8245_v43, 16  ;;  %v3137_v39 = vshll.u32 %v8245_v43, 16 }
 0x1db   : > { %4070 = vst.msk [vmem:[#allocation3] sm:$0xff] %vm4069_vm15, %v4016_v3  ;;  %v3968_v22 = vor.u32 %v3967_v40, %v3964_v55  ;;  %v9818_v3 = vld [vmem:[#allocation2 + $0x88] sm:$0xff]   ;;  %v2538_v35 = vrot.slane %v8239_v57, 1  ;;  %v3127_v55 = vrot.slane %v3125_v9, 1  ;;  %v3130_v40 = vrot.slane %v3128_v54, 2 }
 0x1dc   : > { %4311 = vst.msk [vmem:[#allocation3] sm:$0xff] %vm4310_vm2, %v9531_v34  ;;  %v3169_v1 = vpop.permute.xlu0 %3168  ;;  %v2801_v20 = vpop.permute.xlu1 %2800  ;;  %v3632_v34 = vsel %vm3363_vm4, %v3629_v59, %v3631_v12  ;;  %v9773_v28 = vor.u32 %v3976_v52, %v3973_v50 }
 0x1dd   : > { %3219 = vst.msk [vmem:[#allocation3 + $0x20] sm:$0xff] %vm3214_vm12, %v3169_v1  ;;  %v3969_v8 = vsel %vm3844_vm8, %v9714_v62, %v3968_v22  ;;  %v2541_v60 = vsel %vm2508_vm3, %v2538_v35, %v2540_v23  ;;  %v2778_v1 = vrot.slane %v8242_v15, 1 }
 0x1de   : > { %3460 = vst.msk [vmem:[#allocation3 + $0x20] sm:$0xff] %vm3455_vm13, %v9611_v38  ;;  %3184 = vrot.lane.b32.xlu0 %v3114_v46, %s8328_s12  ;;  %3667 = vrot.lane.b32.xlu1 %v3632_v34, %s8327_s30  ;;  %v3630_v38 = vsel %vm3363_vm4, %v3627_v10, %v3629_v59  ;;  %v3978_v7 = vsel %vm3844_vm8, %v3968_v22, %v9773_v28  ;;  %v4331_v56 = vld [vmem:[#allocation3 + $0x10] sm:$0xff]  ;;  %v2279_v10 = vrot.slane %v2277_v48, 1  ;;  %v3136_v46 = vrot.slane %v3134_v47, 1 }
 0x1df   : > { %3700 = vst.msk [vmem:[#allocation3 + $0x20] sm:$0xff] %vm3695_vm14, %v9643_v6  ;;  %v4330_v6 = vld [vmem:[#allocation3 + $0x8] sm:$0xff]  ;;  %v4247_v59 = vsel %vm4218_vm6, %v4244_v45, %v4246_v31  ;;  %v3139_v34 = vrot.slane %v3137_v39, 2  ;;  %v2539_v22 = vsel %vm2508_vm3, %v2536_v41, %v2538_v35  ;;  %v8255_v47 = vld [vmem:[#allocation2 + $0x90] ss:$0 sps:$4 sm:$0x11]  }
 0x1e0   : > { %v4024_v25 = vpop.permute.xlu0 %4023  ;;  %v9777_v27 = vpop.permute.xlu1 %3415  ;;  %v2280_v61 = vsel %vm2156_vm7, %v2275_v24, %v2279_v10  ;;  %v2283_v62 = vor.u32 %v2281_v17, %v2279_v10  ;;  %v2779_v24 = vsel %vm2508_vm3, %v2776_v0, %v2778_v1 }
 0x1e1   : > { %4074 = vst.msk [vmem:[#allocation3 + $0x20] sm:$0xff] %vm4069_vm15, %v4024_v25  ;;  %v9847_v53 = vor.u32 %v3139_v34, %v3136_v46 }
 0x1e2   : > { %4315 = vst.msk [vmem:[#allocation3 + $0x20] sm:$0xff] %vm4310_vm2, %v9672_v18  ;;  %3665 = vrot.lane.b32.xlu0 %v3630_v38, %s8327_s30  ;;  %4041 = vrot.lane.b32.xlu1 %v3978_v7, %s8331_s15  ;;  %v2288_v19 = vsel %vm2156_vm7, %v2283_v62, %v9798_v16  ;;  %v8246_v38 = vld [vmem:[#allocation2 + $0x80] sm:$0xff]   ;;  %v8250_v7 = vld [vmem:[#allocation2 + $0x88] sm:$0xff]  }
 0x1e3   : > { %v4329_v30 = vld [vmem:[#allocation3] sm:$0xff]  ;;  %v3980_v0 = vshrl.u32 %v8250_v7, 16  ;;  %v3983_v36 = vshll.u32 %v8250_v7, 16 }
 0x1e4   : > { %7869 = vmatprep.mubr.msk.bf16.mxu1 %vm4390_vm1, %v4329_v30  ;;  %v4267_v44 = vpop.permute.xlu0 %4266  ;;  %v2320_v18 = vpop.permute.xlu1 %2319  ;;  %v3131_v30 = vor.u32 %v3130_v40, %v3127_v55 }
 0x1e5   : > { %7870 = vmatmul.mubr.msk.bf16.vlgmr.msra.gmra.mrb[36].mxu1 %vm4390_vm1, %v4330_v6  ;;  %2367 = vst.msk [vmem:[#allocation3 + $0x38] sm:$0xff] %vm2359_vm9, %v2320_v18  ;;  %v8251_v6 = vld [vmem:[#allocation2 + $0x90] sm:$0xff]   ;;  %v3982_v9 = vrot.slane %v3980_v0, 2  ;;  %v3985_v54 = vrot.slane %v3983_v36, 3 }
 0x1e6   : > { %7873 = vmatprep.mubr.msk.bf16.mxu1 %vm4390_vm1, %v4331_v56  ;;  %4039 = vrot.lane.b32.xlu0 %v3969_v8, %s8331_s15  ;;  %2608 = vst.msk [vmem:[#allocation3 + $0x38] sm:$0xff] %vm2600_vm10, %v2561_v51  ;;  %v4332_v51 = vld [vmem:[#allocation3 + $0x18] sm:$0xff]  ;;  %v3393_v56 = vrot.slane %v8246_v38, 2  ;;  %v3141_v10 = vsel %vm2989_vm5, %v3131_v30, %v9847_v53  ;;  %v9861_v18 = vld [vmem:[#allocation2 + $0x90] sm:$0xff]   ;;  %v3989_v8 = vshrl.u32 %v8251_v6, 16  ;;  %v3992_v45 = vshll.u32 %v8251_v6, 16 }
 0x1e7   : > { %2848 = vst.msk [vmem:[#allocation3 + $0x38] sm:$0xff] %vm2840_vm11, %v2801_v20  ;;  %2333 = vrot.lane.b32.xlu1 %v2280_v61, %s8330_s14  ;;  %v2780_v20 = vrot.slane %v9818_v3, 1  ;;  %v8248_v61 = vld [vmem:[#allocation2 + $0x88] sm:$0xff]   ;;  %v3132_v43 = vsel %vm2989_vm5, %v9738_v42, %v3131_v30  ;;  %v3635_v57 = vrot.slane %v9861_v18, 2  ;;  %v8262_v38 = vld [vmem:[#allocation2 + $0x90] sm:$0xff]  }
 0x1e8   : > { %v2799_v58 = vpop.permute.xlu0 %2798  ;;  %v4026_v13 = vpop.permute.xlu1 %4025  ;;  %v3394_v42 = vsel %vm3363_vm4, %v3391_v49, %v3393_v56  ;;  %v3986_v49 = vor.u32 %v3985_v54, %v3982_v9 }
 0x1e9   : > { %2847 = vst.msk [vmem:[#allocation3 + $0x30] sm:$0xff] %vm2840_vm11, %v2799_v58  ;;  %v4333_v2 = vld [vmem:[#allocation3 + $0x20] sm:$0xff]  ;;  %v3991_v58 = vrot.slane %v3989_v8, 2 }
 0x1ea   : > { %4075 = vst.msk [vmem:[#allocation3 + $0x28] sm:$0xff] %vm4069_vm15, %v4026_v13  ;;  %4280 = vrot.lane.b32.xlu0 %v4245_v14, %s8329_s13  ;;  %v3994_v13 = vrot.slane %v3992_v45, 3  ;;  %v8253_v14 = vld [vmem:[#allocation2 + $0x88] sm:$0xff]   ;;  %v3987_v32 = vsel %vm3844_vm8, %v9773_v28, %v3986_v49  ;;  %v8260_v8 = vld [vmem:[#allocation2 + $0x90] sm:$0xff]  }
 0x1eb   : > { %4316 = vst.msk [vmem:[#allocation3 + $0x28] sm:$0xff] %vm4310_vm2, %v4267_v44  ;;  %2335 = vrot.lane.b32.xlu1 %v2288_v19, %s8330_s14  ;;  %v3395_v44 = vrot.slane %v9849_v33, 2  ;;  %v2293_v35 = vshll.u32 %v8253_v14, 16  ;;  %v8257_v28 = vld [vmem:[#allocation2 + $0x88] sm:$0xff]  }
 0x1ec   : > { %v9824_v50 = vpop.permute.xlu0 %3413  ;;  %v3175_v52 = vpop.permute.xlu1 %3174  ;;  %v8261_v45 = vld [vmem:[#allocation2 + $0x98] ss:$0 sps:$4 sm:$0x11]  }
 0x1ed   : > { %7874 = vmatmul.mubr.msk.bf16.gmra.mrb[40].mxu1 %vm4390_vm1, %v4332_v51  ;;  %3222 = vst.msk [vmem:[#allocation3 + $0x38] sm:$0xff] %vm3214_vm12, %v3175_v52  ;;  %v3396_v62 = vsel %vm3363_vm4, %v3393_v56, %v3395_v44  ;;  %v3633_v51 = vrot.slane %v8248_v61, 2 }
 0x1ee   : > { %7877 = vmatprep.mubr.msk.bf16.mxu1 %vm4390_vm1, %v4333_v2  ;;  %4282 = vrot.lane.b32.xlu0 %v4247_v59, %s8329_s13  ;;  %3463 = vst.msk [vmem:[#allocation3 + $0x38] sm:$0xff] %vm3455_vm13, %v9777_v27  ;;  %v2781_v27 = vsel %vm2508_vm3, %v2778_v1, %v2780_v20  ;;  %v9883_v2 = vor.u32 %v3994_v13, %v3991_v58  ;;  %v2289_v59 = vshrl.u32 %v9767_v11, 16  ;;  %v2301_v1 = vshll.u32 %v8255_v47, 16 }
 0x1ef   : > { %2576 = vrot.lane.b32.xlu1 %v2541_v60, %s8325_s28  ;;  %v3636_v39 = vsel %vm3363_vm4, %v3633_v51, %v3635_v57  ;;  %v8254_v60 = vld [vmem:[#allocation2 + $0x88] sm:$0xff]   ;;  %v2295_v11 = vrot.slane %v2293_v35, 1  ;;  %v2782_v58 = vrot.slane %v8260_v8, 1  ;;  %v2784_v13 = vrot.slane %v8261_v45, 1 }
 0x1f0   : > { %v3654_v48 = vpop.permute.xlu0 %3653  ;;  %v2322_v25 = vpop.permute.xlu1 %2321  ;;  %v3996_v55 = vsel %vm3844_vm8, %v3986_v49, %v9883_v2  ;;  %v2291_v40 = vor.u32 %v2289_v59, %v9798_v16  ;;  %v8265_v49 = vld [vmem:[#allocation2 + $0x98] ss:$0 sps:$4 sm:$0x33]   ;;  %v8269_v59 = vld [vmem:[#allocation2 + $0xa0] ss:$0 sps:$4 sm:$0x77]  }
 0x1f1   : > { %2368 = vst.msk [vmem:[#allocation3 + $0x40] sm:$0xff] %vm2359_vm9, %v2322_v25  ;;  %v2297_v25 = vshrl.u32 %v8253_v14, 16  ;;  %v2785_v35 = vsel %vm2508_vm3, %v2782_v58, %v2784_v13 }
 0x1f2   : > { %v4334_v63 = vld [vmem:[#allocation3 + $0x28] sm:$0xff]  ;;  %2574 = vrot.lane.b32.xlu0 %v2539_v22, %s8325_s28  ;;  %v2303_v22 = vrot.slane %v2301_v1, 1  ;;  %v2296_v16 = vsel %vm2156_vm7, %v2291_v40, %v2295_v11  ;;  %v3399_v40 = vrot.slane %v8265_v49, 2 }
 0x1f3   : > { %2816 = vrot.lane.b32.xlu1 %v2781_v27, %s8324_s27  ;;  %v8263_v27 = vld [vmem:[#allocation2 + $0x98] ss:$0 sps:$4 sm:$0x33]   ;;  %v2299_v30 = vor.u32 %v2297_v25, %v2295_v11  ;;  %v8267_v11 = vld [vmem:[#allocation2 + $0xa0] ss:$0 sps:$4 sm:$0x33]  }
 0x1f4   : > { %v4269_v26 = vpop.permute.xlu0 %4268  ;;  %v3656_v41 = vpop.permute.xlu1 %3655  ;;  %v3152_v61 = vshrl.u32 %v8263_v27, 16  ;;  %v3155_v5 = vshll.u32 %v8263_v27, 16  ;;  %v8266_v25 = vld [vmem:[#allocation2 + $0x98] sm:$0xff]  }
 0x1f5   : > { %7878 = vmatmul.mubr.msk.bf16.gmra.mrb[44].mxu1 %vm4390_vm1, %v4334_v63  ;;  %3703 = vst.msk [vmem:[#allocation3 + $0x38] sm:$0xff] %vm3695_vm14, %v3656_v41  ;;  %v8258_v63 = vld [vmem:[#allocation2 + $0x90] ss:$0 sps:$4 sm:$0x11]   ;;  %v2304_v56 = vsel %vm2156_vm7, %v2299_v30, %v2303_v22 }
 0x1f6   : > { %2814 = vrot.lane.b32.xlu0 %v2779_v24, %s8324_s27 }
 0x1f7   : > { %3190 = vrot.lane.b32.xlu1 %v3141_v10, %s8328_s12  ;;  %v2544_v10 = vrot.slane %v8258_v63, 1 }
 0x1f8   : > { %v2563_v17 = vpop.permute.xlu0 %2562  ;;  %v2565_v37 = vpop.permute.xlu1 %2564 }
 0x1f9   : > { %2609 = vst.msk [vmem:[#allocation3 + $0x40] sm:$0xff] %vm2600_vm10, %v2563_v17  ;;  %v3143_v17 = vshrl.u32 %v8262_v38, 16 }
 0x1fa   : > { %3188 = vrot.lane.b32.xlu0 %v3132_v43, %s8328_s12 }
 0x1fb   : > { %3431 = vrot.lane.b32.xlu1 %v3396_v62, %s8326_s29  ;;  %v3145_v14 = vrot.slane %v3143_v17, 1 }
 0x1fc   : > { %v3173_v19 = vpop.permute.xlu0 %3172  ;;  %v2805_v15 = vpop.permute.xlu1 %2804 }
 0x1fd   : > { %3221 = vst.msk [vmem:[#allocation3 + $0x30] sm:$0xff] %vm3214_vm12, %v3173_v19 }
 0x1fe   : > { %3462 = vst.msk [vmem:[#allocation3 + $0x30] sm:$0xff] %vm3455_vm13, %v9824_v50  ;;  %3429 = vrot.lane.b32.xlu0 %v3394_v42, %s8326_s29  ;;  %v3634_v50 = vsel %vm3363_vm4, %v3631_v12, %v3633_v51  ;;  %v4248_v12 = vrot.slane %v8254_v60, 3  ;;  %v3157_v51 = vrot.slane %v3155_v5, 2  ;;  %v8268_v60 = vld [vmem:[#allocation2 + $0x98] sm:$0xff]  }
 0x1ff   : > { %3702 = vst.msk [vmem:[#allocation3 + $0x30] sm:$0xff] %vm3695_vm14, %v3654_v48  ;;  %3671 = vrot.lane.b32.xlu1 %v3636_v39, %s8327_s30  ;;  %v9898_v48 = vld [vmem:[#allocation2 + $0x90] sm:$0xff]   ;;  %v3998_v22 = vshrl.u32 %v8268_v60, 16  ;;  %v4001_v3 = vshll.u32 %v8268_v60, 16 }
 0x200   : > { %v4028_v21 = vpop.permute.xlu0 %4027  ;;  %v3420_v52 = vpop.permute.xlu1 %3419  ;;  %v4250_v41 = vrot.slane %v9898_v48, 3  ;;  %v4249_v7 = vsel %vm4218_vm6, %v4246_v31, %v4248_v12  ;;  %v2542_v31 = vrot.slane %v8257_v28, 1  ;;  %v8264_v39 = vld [vmem:[#allocation2 + $0x90] sm:$0xff]  }
 0x201   : > { %4076 = vst.msk [vmem:[#allocation3 + $0x30] sm:$0xff] %vm4069_vm15, %v4028_v21  ;;  %v3397_v1 = vrot.slane %v8264_v39, 2 }
 0x202   : > { %4317 = vst.msk [vmem:[#allocation3 + $0x30] sm:$0xff] %vm4310_vm2, %v4269_v26  ;;  %3669 = vrot.lane.b32.xlu0 %v3634_v50, %s8327_s30  ;;  %v4251_v43 = vsel %vm4218_vm6, %v4248_v12, %v4250_v41  ;;  %v2545_v62 = vsel %vm2508_vm3, %v2542_v31, %v2544_v10  ;;  %v2543_v42 = vsel %vm2508_vm3, %v2540_v23, %v2542_v31  ;;  %v8272_v10 = vld [vmem:[#allocation2 + $0xa0] ss:$0 sps:$4 sm:$0x77]  }
 0x203   : > { %4045 = vrot.lane.b32.xlu1 %v3996_v55, %s8331_s15  ;;  %v2783_v23 = vsel %vm2508_vm3, %v2780_v20, %v2782_v58  ;;  %v3400_v63 = vsel %vm3363_vm4, %v3397_v1, %v3399_v40  ;;  %v999_v58 = vld [vmem:[%s10561_s2 + $0xa8] sm:$0x7] }
 0x204   : > { %v4271_v46 = vpop.permute.xlu0 %4270  ;;  %v2324_v34 = vpop.permute.xlu1 %2323 }
 0x205   : > { %2369 = vst.msk [vmem:[#allocation3 + $0x48] sm:$0xff] %vm2359_vm9, %v2324_v34  ;;  %v4010_v34 = vshll.u32 %v8269_v59, 16 }
 0x206   : > { %4043 = vrot.lane.b32.xlu0 %v3987_v32, %s8331_s15  ;;  %2610 = vst.msk [vmem:[#allocation3 + $0x48] sm:$0xff] %vm2600_vm10, %v2565_v37  ;;  %v3146_v37 = vshll.u32 %v8262_v38, 16 }
 0x207   : > { %2850 = vst.msk [vmem:[#allocation3 + $0x48] sm:$0xff] %vm2840_vm11, %v2805_v15  ;;  %2337 = vrot.lane.b32.xlu1 %v2296_v16, %s8330_s14  ;;  %v3154_v15 = vrot.slane %v3152_v61, 1  ;;  %v3639_v16 = vrot.slane %v8267_v11, 2  ;;  %v4012_v27 = vrot.slane %v4010_v34, 3  ;;  %v4254_v61 = vrot.slane %v8272_v10, 3 }
 0x208   : > { %v2803_v6 = vpop.permute.xlu0 %2802  ;;  %v4030_v26 = vpop.permute.xlu1 %4029  ;;  %v3148_v19 = vrot.slane %v3146_v37, 2  ;;  %v8271_v37 = vld [vmem:[#allocation2 + $0x98] sm:$0xff]  }
 0x209   : > { %2849 = vst.msk [vmem:[#allocation3 + $0x40] sm:$0xff] %vm2840_vm11, %v2803_v6  ;;  %v4335_v24 = vld [vmem:[#allocation3 + $0x30] sm:$0xff]  ;;  %v3637_v6 = vrot.slane %v8266_v25, 2 }
 0x20a   : > { %4077 = vst.msk [vmem:[#allocation3 + $0x38] sm:$0xff] %vm4069_vm15, %v4030_v26  ;;  %4284 = vrot.lane.b32.xlu0 %v4249_v7, %s8329_s13  ;;  %7881 = vmatprep.mubr.msk.bf16.mxu1 %vm4390_vm1, %v4335_v24  ;;  %v3149_v21 = vor.u32 %v3148_v19, %v3145_v14  ;;  %v4000_v26 = vrot.slane %v3998_v22, 2  ;;  %v4003_v7 = vrot.slane %v4001_v3, 3  ;;  %v5571_v3 = vld [vmem:[%s10566_s7] sm:$0xf] }
 0x20b   : > { %4318 = vst.msk [vmem:[#allocation3 + $0x38] sm:$0xff] %vm4310_vm2, %v4271_v46  ;;  %2339 = vrot.lane.b32.xlu1 %v2304_v56, %s8330_s14  ;;  %v4007_v46 = vshrl.u32 %v8269_v59, 16  ;;  %v3640_v24 = vsel %vm3363_vm4, %v3637_v6, %v3639_v16  ;;  %v3638_v33 = vsel %vm3363_vm4, %v3635_v57, %v3637_v6  ;;  %8042 = vmatprep.subr.msk.bf16.mxu0 %vm678_vm0, %v5571_v3  ;;  %v6412_v16 = vsel %vm678_vm0, %v5571_v3, 0 }
 0x20c   : > { %v3418_v0 = vpop.permute.xlu0 %3417  ;;  %v3179_v36 = vpop.permute.xlu1 %3178  ;;  %v3150_v20 = vsel %vm2989_vm5, %v9847_v53, %v3149_v21  ;;  %v3398_v53 = vsel %vm3363_vm4, %v3395_v44, %v3397_v1  ;;  %v4004_v17 = vor.u32 %v4003_v7, %v4000_v26  ;;  %7906 = vmatpush3.bf16.msra.mxu0 %v6412_v16 }
 0x20d   : > { %3224 = vst.msk [vmem:[#allocation3 + $0x48] sm:$0xff] %vm3214_vm12, %v3179_v36  ;;  %v4009_v38 = vrot.slane %v4007_v46, 2 }
 0x20e   : > { %4286 = vrot.lane.b32.xlu0 %v4251_v43, %s8329_s13  ;;  %3465 = vst.msk [vmem:[#allocation3 + $0x48] sm:$0xff] %vm3455_vm13, %v3420_v52  ;;  %v3158_v52 = vor.u32 %v3157_v51, %v3154_v15  ;;  %v4005_v36 = vsel %vm3844_vm8, %v9883_v2, %v4004_v17 }
 0x20f   : > { %2580 = vrot.lane.b32.xlu1 %v2545_v62, %s8325_s28  ;;  %v4013_v56 = vor.u32 %v4012_v27, %v4009_v38 }
 0x210   : > { %v3658_v9 = vpop.permute.xlu0 %3657  ;;  %v2326_v54 = vpop.permute.xlu1 %2325  ;;  %v3159_v55 = vsel %vm2989_vm5, %v3149_v21, %v3158_v52 }
 0x211   : > { %2370 = vst.msk [vmem:[#allocation3 + $0x50] sm:$0xff] %vm2359_vm9, %v2326_v54  ;;  %v4014_v44 = vsel %vm3844_vm8, %v4004_v17, %v4013_v56 }
 0x212   : > { %v4336_v47 = vld [vmem:[#allocation3 + $0x38] sm:$0xff]  ;;  %2578 = vrot.lane.b32.xlu0 %v2543_v42, %s8325_s28 }
 0x213   : > { %7882 = vmatmul.mubr.msk.bf16.gmra.mrb[48].mxu1 %vm4390_vm1, %v4336_v47  ;;  %2820 = vrot.lane.b32.xlu1 %v2785_v35, %s8324_s27 }
 0x214   : > { %v4273_v50 = vpop.permute.xlu0 %4272  ;;  %v3660_v4 = vpop.permute.xlu1 %3659 }
 0x215   : > { %3705 = vst.msk [vmem:[#allocation3 + $0x48] sm:$0xff] %vm3695_vm14, %v3660_v4 }
 0x216   : > { %2818 = vrot.lane.b32.xlu0 %v2783_v23, %s8324_s27 }
 0x217   : > { %3194 = vrot.lane.b32.xlu1 %v3159_v55, %s8328_s12 }
 0x218   : > { %v2567_v32 = vpop.permute.xlu0 %2566  ;;  %v2569_v12 = vpop.permute.xlu1 %2568 }
 0x219   : > { %2611 = vst.msk [vmem:[#allocation3 + $0x50] sm:$0xff] %vm2600_vm10, %v2567_v32 }
 0x21a   : > { %3192 = vrot.lane.b32.xlu0 %v3150_v20, %s8328_s12 }
 0x21b   : > { %3435 = vrot.lane.b32.xlu1 %v3400_v63, %s8326_s29 }
 0x21c   : > { %v3177_v30 = vpop.permute.xlu0 %3176  ;;  %v2809_v28 = vpop.permute.xlu1 %2808 }
 0x21d   : > { %3223 = vst.msk [vmem:[#allocation3 + $0x40] sm:$0xff] %vm3214_vm12, %v3177_v30 }
 0x21e   : > { %3464 = vst.msk [vmem:[#allocation3 + $0x40] sm:$0xff] %vm3455_vm13, %v3418_v0  ;;  %3433 = vrot.lane.b32.xlu0 %v3398_v53, %s8326_s29  ;;  %v4252_v0 = vrot.slane %v8271_v37, 3 }
 0x21f   : > { %3704 = vst.msk [vmem:[#allocation3 + $0x40] sm:$0xff] %vm3695_vm14, %v3658_v9  ;;  %3675 = vrot.lane.b32.xlu1 %v3640_v24, %s8327_s30 }
 0x220   : > { %v4032_v8 = vpop.permute.xlu0 %4031  ;;  %v3424_v45 = vpop.permute.xlu1 %3423  ;;  %v4255_v18 = vsel %vm4218_vm6, %v4252_v0, %v4254_v61  ;;  %v4253_v2 = vsel %vm4218_vm6, %v4250_v41, %v4252_v0 }
 0x221   : > { %4078 = vst.msk [vmem:[#allocation3 + $0x40] sm:$0xff] %vm4069_vm15, %v4032_v8 }
 0x222   : > { %4319 = vst.msk [vmem:[#allocation3 + $0x40] sm:$0xff] %vm4310_vm2, %v4273_v50  ;;  %3673 = vrot.lane.b32.xlu0 %v3638_v33, %s8327_s30 }
 0x223   : > { %4049 = vrot.lane.b32.xlu1 %v4014_v44, %s8331_s15 }
 0x224   : > { %v4275_v5 = vpop.permute.xlu0 %4274  ;;  %v2328_v31 = vpop.permute.xlu1 %2327 }
 0x225   : > { %2371 = vst.msk [vmem:[#allocation3 + $0x58] sm:$0xff] %vm2359_vm9, %v2328_v31 }
 0x226   : > { %4047 = vrot.lane.b32.xlu0 %v4005_v36, %s8331_s15  ;;  %2612 = vst.msk [vmem:[#allocation3 + $0x58] sm:$0xff] %vm2600_vm10, %v2569_v12 }
 0x227   : > { %2852 = vst.msk [vmem:[#allocation3 + $0x58] sm:$0xff] %vm2840_vm11, %v2809_v28  ;;  %4290 = vrot.lane.b32.xlu1 %v4255_v18, %s8329_s13 }
 0x228   : > { %v2807_v57 = vpop.permute.xlu0 %2806  ;;  %v4034_v43 = vpop.permute.xlu1 %4033 }
 0x229   : > { %2851 = vst.msk [vmem:[#allocation3 + $0x50] sm:$0xff] %vm2840_vm11, %v2807_v57  ;;  %v4337_v62 = vld [vmem:[#allocation3 + $0x40] sm:$0xff] }
 0x22a   : > { %4079 = vst.msk [vmem:[#allocation3 + $0x48] sm:$0xff] %vm4069_vm15, %v4034_v43  ;;  %4288 = vrot.lane.b32.xlu0 %v4253_v2, %s8329_s13  ;;  %7885 = vmatprep.mubr.msk.bf16.mxu1 %vm4390_vm1, %v4337_v62  ;;  %s10427_s13 = scalar_lea.vmem %s10570_s11, %s7699_s23 }
 0x22b   : > { %4320 = vst.msk [vmem:[#allocation3 + $0x48] sm:$0xff] %vm4310_vm2, %v4275_v5 }
 0x22c   : > { %v3422_v13 = vpop.permute.xlu0 %3421  ;;  %v3183_v14 = vpop.permute.xlu1 %3182 }
 0x22d   : > { %3226 = vst.msk [vmem:[#allocation3 + $0x58] sm:$0xff] %vm3214_vm12, %v3183_v14 }
 0x22e   : > { %1506 = vperm.xlu0 %8080, %v999_v58   ;;  %3467 = vst.msk [vmem:[#allocation3 + $0x58] sm:$0xff] %vm3455_vm13, %v3424_v45 }
 0x230   : > { %v3662_v48 = vpop.permute.xlu0 %3661  ;;  %v2330_v41 = vpop.permute.xlu1 %2329 }
 0x231   : > { %2372 = vst.msk [vmem:[#allocation3 + $0x60] sm:$0xff] %vm2359_vm9, %v2330_v41 }
 0x232   : > { %v4338_v19 = vld [vmem:[#allocation3 + $0x48] sm:$0xff] }
 0x233   : > { %7886 = vmatmul.mubr.msk.bf16.gmra.mrb[52].mxu1 %vm4390_vm1, %v4338_v19 }
 0x234   : > { %v4277_v15 = vpop.permute.xlu0 %4276  ;;  %v3664_v51 = vpop.permute.xlu1 %3663 }
 0x235   : > { %3707 = vst.msk [vmem:[#allocation3 + $0x58] sm:$0xff] %vm3695_vm14, %v3664_v51  ;;  %v8332_v51 = vmov 1966171168  }
 0x238   : > { %v2571_v9 = vpop.permute.xlu0 %2570  ;;  %v2573_v54 = vpop.permute.xlu1 %2572 }
 0x239   : > { %2613 = vst.msk [vmem:[#allocation3 + $0x60] sm:$0xff] %vm2600_vm10, %v2571_v9  ;;  %v4699_v9 = vunpack.c.l.s4 %v8332_v51 }
 0x23c   : > { %v3181_v42 = vpop.permute.xlu0 %3180  ;;  %v2813_v47 = vpop.permute.xlu1 %2812 }
 0x23d   : > { %3225 = vst.msk [vmem:[#allocation3 + $0x50] sm:$0xff] %vm3214_vm12, %v3181_v42 }
 0x23e   : > { %3466 = vst.msk [vmem:[#allocation3 + $0x50] sm:$0xff] %vm3455_vm13, %v3422_v13 }
 0x23f   : > { %3706 = vst.msk [vmem:[#allocation3 + $0x50] sm:$0xff] %vm3695_vm14, %v3662_v48 }
 0x240   : > { %v4036_v39 = vpop.permute.xlu0 %4035  ;;  %v3428_v35 = vpop.permute.xlu1 %3427 }
 0x241   : > { %4080 = vst.msk [vmem:[#allocation3 + $0x50] sm:$0xff] %vm4069_vm15, %v4036_v39 }
 0x242   : > { %4321 = vst.msk [vmem:[#allocation3 + $0x50] sm:$0xff] %vm4310_vm2, %v4277_v15 }
 0x244   : > { %v4279_v21 = vpop.permute.xlu0 %4278  ;;  %v2332_v52 = vpop.permute.xlu1 %2331 }
 0x245   : > { %2373 = vst.msk [vmem:[#allocation3 + $0x68] sm:$0xff] %vm2359_vm9, %v2332_v52 }
 0x246   : > { %2614 = vst.msk [vmem:[#allocation3 + $0x68] sm:$0xff] %vm2600_vm10, %v2573_v54  ;;  %v10059_v54 = vld [vmem:[%s10565_s6] ss:$0 sm:$0xff] }
 0x247   : > { %2854 = vst.msk [vmem:[#allocation3 + $0x68] sm:$0xff] %vm2840_vm11, %v2813_v47  ;;  %v4700_v47 = vunpack.c.0.s8 %v4699_v9 }
 0x248   : > { %v2811_v49 = vpop.permute.xlu0 %2810  ;;  %v4038_v59 = vpop.permute.xlu1 %4037 }
 0x249   : > { %2853 = vst.msk [vmem:[#allocation3 + $0x60] sm:$0xff] %vm2840_vm11, %v2811_v49  ;;  %v4339_v50 = vld [vmem:[#allocation3 + $0x50] sm:$0xff] }
 0x24a   : > { %4081 = vst.msk [vmem:[#allocation3 + $0x58] sm:$0xff] %vm4069_vm15, %v4038_v59  ;;  %7889 = vmatprep.mubr.msk.bf16.mxu1 %vm4390_vm1, %v4339_v50 }
 0x24b   : > { %4322 = vst.msk [vmem:[#allocation3 + $0x58] sm:$0xff] %vm4310_vm2, %v4279_v21 }
 0x24c   : > { %v3426_v4 = vpop.permute.xlu0 %3425  ;;  %v3187_v60 = vpop.permute.xlu1 %3186 }
 0x24d   : > { %3228 = vst.msk [vmem:[#allocation3 + $0x68] sm:$0xff] %vm3214_vm12, %v3187_v60 }
 0x24e   : > { %3469 = vst.msk [vmem:[#allocation3 + $0x68] sm:$0xff] %vm3455_vm13, %v3428_v35 }
 0x250   : > { %v3185_v23 = vpop.permute.xlu0 %3184  ;;  %v3668_v1 = vpop.permute.xlu1 %3667 }
 0x251   : > { %3227 = vst.msk [vmem:[#allocation3 + $0x60] sm:$0xff] %vm3214_vm12, %v3185_v23 }
 0x252   : > { %3709 = vst.msk [vmem:[#allocation3 + $0x68] sm:$0xff] %vm3695_vm14, %v3668_v1  ;;  %v4340_v55 = vld [vmem:[#allocation3 + $0x58] sm:$0xff] }
 0x253   : > { %3468 = vst.msk [vmem:[#allocation3 + $0x60] sm:$0xff] %vm3455_vm13, %v3426_v4  ;;  %7890 = vmatmul.mubr.msk.bf16.gmra.mrb[56].mxu1 %vm4390_vm1, %v4340_v55  ;;  %v10066_v4 = vsub.s32 %v4700_v47, %v8603_v29 }
 0x254   : > { %v3666_v40 = vpop.permute.xlu0 %3665  ;;  %v4042_v11 = vpop.permute.xlu1 %4041 }
 0x255   : > { %3708 = vst.msk [vmem:[#allocation3 + $0x60] sm:$0xff] %vm3695_vm14, %v3666_v40 }
 0x256   : > { %4083 = vst.msk [vmem:[#allocation3 + $0x68] sm:$0xff] %vm4069_vm15, %v4042_v11 }
 0x258   : > { %v4040_v46 = vpop.permute.xlu0 %4039 }
 0x259   : > { %4082 = vst.msk [vmem:[#allocation3 + $0x60] sm:$0xff] %vm4069_vm15, %v4040_v46  ;;  %v2334_v34 = vpop.permute.xlu1 %2333 }
 0x25a   : > { %2374 = vst.msk [vmem:[#allocation3 + $0x70] sm:$0xff] %vm2359_vm9, %v2334_v34 }
 0x25c   : > { %v4281_v32 = vpop.permute.xlu0 %4280 }
 0x25d   : > { %4323 = vst.msk [vmem:[#allocation3 + $0x60] sm:$0xff] %vm4310_vm2, %v4281_v32  ;;  %v2336_v12 = vpop.permute.xlu1 %2335 }
 0x25e   : > { %2375 = vst.msk [vmem:[#allocation3 + $0x78] sm:$0xff] %vm2359_vm9, %v2336_v12 }
 0x260   : > { %v4283_v25 = vpop.permute.xlu0 %4282 }
 0x261   : > { %4324 = vst.msk [vmem:[#allocation3 + $0x68] sm:$0xff] %vm4310_vm2, %v4283_v25  ;;  %v2577_v22 = vpop.permute.xlu1 %2576 }
 0x262   : > { %2616 = vst.msk [vmem:[#allocation3 + $0x78] sm:$0xff] %vm2600_vm10, %v2577_v22 }
 0x264   : > { %v2575_v20 = vpop.permute.xlu0 %2574  ;;  %v4341_v63 = vld [vmem:[#allocation3 + $0x60] sm:$0xff] }
 0x265   : > { %2615 = vst.msk [vmem:[#allocation3 + $0x70] sm:$0xff] %vm2600_vm10, %v2575_v20  ;;  %7893 = vmatprep.mubr.msk.bf16.mxu1 %vm4390_vm1, %v4341_v63  ;;  %v2817_v38 = vpop.permute.xlu1 %2816 }
 0x266   : > { %2856 = vst.msk [vmem:[#allocation3 + $0x78] sm:$0xff] %vm2840_vm11, %v2817_v38 }
 0x268   : > { %v2815_v27 = vpop.permute.xlu0 %2814  ;;  %v4342_v30 = vld [vmem:[#allocation3 + $0x68] sm:$0xff] }
 0x269   : > { %2855 = vst.msk [vmem:[#allocation3 + $0x70] sm:$0xff] %vm2840_vm11, %v2815_v27  ;;  %7894 = vmatmul.mubr.msk.bf16.gmra.mrb[60].mxu1 %vm4390_vm1, %v4342_v30  ;;  %v3191_v28 = vpop.permute.xlu1 %3190 }
 0x26a   : > { %3230 = vst.msk [vmem:[#allocation3 + $0x78] sm:$0xff] %vm3214_vm12, %v3191_v28 }
 0x26c   : > { %v3189_v6 = vpop.permute.xlu0 %3188 }
 0x26d   : > { %3229 = vst.msk [vmem:[#allocation3 + $0x70] sm:$0xff] %vm3214_vm12, %v3189_v6  ;;  %v3432_v26 = vpop.permute.xlu1 %3431 }
 0x26e   : > { %3471 = vst.msk [vmem:[#allocation3 + $0x78] sm:$0xff] %vm3455_vm13, %v3432_v26 }
 0x270   : > { %v3430_v7 = vpop.permute.xlu0 %3429 }
 0x271   : > { %3470 = vst.msk [vmem:[#allocation3 + $0x70] sm:$0xff] %vm3455_vm13, %v3430_v7  ;;  %v3672_v53 = vpop.permute.xlu1 %3671 }
 0x272   : > { %3711 = vst.msk [vmem:[#allocation3 + $0x78] sm:$0xff] %vm3695_vm14, %v3672_v53 }
 0x274   : > { %v3670_v24 = vpop.permute.xlu0 %3669 }
 0x275   : > { %3710 = vst.msk [vmem:[#allocation3 + $0x70] sm:$0xff] %vm3695_vm14, %v3670_v24  ;;  %v4046_v56 = vpop.permute.xlu1 %4045 }
 0x276   : > { %4085 = vst.msk [vmem:[#allocation3 + $0x78] sm:$0xff] %vm4069_vm15, %v4046_v56 }
 0x278   : > { %v4044_v10 = vpop.permute.xlu0 %4043 }
 0x279   : > { %4084 = vst.msk [vmem:[#allocation3 + $0x70] sm:$0xff] %vm4069_vm15, %v4044_v10  ;;  %v2338_v8 = vpop.permute.xlu1 %2337 }
 0x27a   : > { %2376 = vst.msk [vmem:[#allocation3 + $0x80] sm:$0xff] %vm2359_vm9, %v2338_v8 }
 0x27c   : > { %v4285_v45 = vpop.permute.xlu0 %4284 }
 0x27d   : > { %4325 = vst.msk [vmem:[#allocation3 + $0x70] sm:$0xff] %vm4310_vm2, %v4285_v45  ;;  %v2340_v17 = vpop.permute.xlu1 %2339 }
 0x27e   : > { %2377 = vst.msk [vmem:[#allocation3 + $0x88] sm:$0xff] %vm2359_vm9, %v2340_v17 }
 0x280   : > { %v4287_v37 = vpop.permute.xlu0 %4286 }
 0x281   : > { %4326 = vst.msk [vmem:[#allocation3 + $0x78] sm:$0xff] %vm4310_vm2, %v4287_v37  ;;  %v2581_v33 = vpop.permute.xlu1 %2580 }
 0x282   : > { %2618 = vst.msk [vmem:[#allocation3 + $0x88] sm:$0xff] %vm2600_vm10, %v2581_v33 }
 0x284   : > { %v2579_v44 = vpop.permute.xlu0 %2578  ;;  %v4343_v61 = vld [vmem:[#allocation3 + $0x70] sm:$0xff] }
 0x285   : > { %2617 = vst.msk [vmem:[#allocation3 + $0x80] sm:$0xff] %vm2600_vm10, %v2579_v44  ;;  %7897 = vmatprep.mubr.msk.bf16.mxu1 %vm4390_vm1, %v4343_v61  ;;  %v2821_v5 = vpop.permute.xlu1 %2820 }
 0x286   : > { %2858 = vst.msk [vmem:[#allocation3 + $0x88] sm:$0xff] %vm2840_vm11, %v2821_v5 }
 0x288   : > { %v2819_v31 = vpop.permute.xlu0 %2818  ;;  %v4344_v0 = vld [vmem:[#allocation3 + $0x78] sm:$0xff] }
 0x289   : > { %2857 = vst.msk [vmem:[#allocation3 + $0x80] sm:$0xff] %vm2840_vm11, %v2819_v31  ;;  %7898 = vmatmul.mubr.msk.bf16.gmra.mrb[64].mxu1 %vm4390_vm1, %v4344_v0  ;;  %v3195_v36 = vpop.permute.xlu1 %3194 }
 0x28a   : > { %3232 = vst.msk [vmem:[#allocation3 + $0x88] sm:$0xff] %vm3214_vm12, %v3195_v36 }
 0x28c   : > { %v3193_v18 = vpop.permute.xlu0 %3192 }
 0x28d   : > { %3231 = vst.msk [vmem:[#allocation3 + $0x80] sm:$0xff] %vm3214_vm12, %v3193_v18  ;;  %v3436_v57 = vpop.permute.xlu1 %3435 }
 0x28e   : > { %3473 = vst.msk [vmem:[#allocation3 + $0x88] sm:$0xff] %vm3455_vm13, %v3436_v57 }
 0x290   : > { %v3434_v43 = vpop.permute.xlu0 %3433 }
 0x291   : > { %3472 = vst.msk [vmem:[#allocation3 + $0x80] sm:$0xff] %vm3455_vm13, %v3434_v43  ;;  %v3676_v2 = vpop.permute.xlu1 %3675 }
 0x292   : > { %3713 = vst.msk [vmem:[#allocation3 + $0x88] sm:$0xff] %vm3695_vm14, %v3676_v2 }
 0x294   : > { %v3674_v62 = vpop.permute.xlu0 %3673 }
 0x295   : > { %3712 = vst.msk [vmem:[#allocation3 + $0x80] sm:$0xff] %vm3695_vm14, %v3674_v62  ;;  %v4050_v58 = vpop.permute.xlu1 %4049 }
 0x296   : > { %4087 = vst.msk [vmem:[#allocation3 + $0x88] sm:$0xff] %vm4069_vm15, %v4050_v58 }
 0x298   : > { %v4048_v13 = vpop.permute.xlu0 %4047 }
 0x299   : > { %4086 = vst.msk [vmem:[#allocation3 + $0x80] sm:$0xff] %vm4069_vm15, %v4048_v13  ;;  %v4291_v14 = vpop.permute.xlu1 %4290 }
 0x29a   : > { %4328 = vst.msk [vmem:[#allocation3 + $0x88] sm:$0xff] %vm4310_vm2, %v4291_v14 }
 0x29c   : > { %v4289_v48 = vpop.permute.xlu0 %4288 }
 0x29d   : > { %4327 = vst.msk [vmem:[#allocation3 + $0x80] sm:$0xff] %vm4310_vm2, %v4289_v48 }
 0x2a1   : > { %v4346_v41 = vld [vmem:[#allocation3 + $0x88] sm:$0xff] }
 0x2a4   : > { %v4345_v19 = vld [vmem:[#allocation3 + $0x80] sm:$0xff] }
 0x2a5   : > { %7901 = vmatprep.mubr.msk.bf16.mxu1 %vm4390_vm1, %v4345_v19 }
 0x2a6   : > { %7902 = vmatmul.mubr.msk.bf16.gmra.mrb[68].mxu1 %vm4390_vm1, %v4346_v41  ;;  %vm10578_vm1 = vcmask 64512  }
 0x2a7   : > { %vm10579_vm3 = vmmov %vm10578_vm1 }
 0x2a8   : > { %vm10580_vm4 = vmmov %vm10578_vm1 }
 0x2ad   : > { %v1507_v15 = vpop.permute.xlu0 %1506 }
 0x2b8   : > { %v7871_v42 = vpop.f32.mrb[36].mxu1 }
 0x2b9   : > { %v4491_v39 = vadd.f32 %v7871_v42, %v10059_v54  ;;  %v4482_v35 = vpop.f32.mrb[37].mxu1 }
 0x2ba   : > { %v4483_v21 = vadd.f32 %v10059_v54, %v4482_v35  ;;  %v7872_v52 = vpop.f32.mrb[38].mxu1 }
 0x2bb   : > { %v4494_v49 = vadd.f32 %v7872_v52, %v10059_v54  ;;  %v4485_v59 = vpop.f32.mrb[39].mxu1  ;;  %v4627_v60 = vmax.f32 %v4491_v39, 0.0 }
 0x2bc   : > { %v4486_v50 = vadd.f32 %v10059_v54, %v4485_v59  ;;  %v4625_v1 = vmax.f32 %v4483_v21, 0.0 }
 0x2bd   : > { %v4628_v23 = vmax.f32 %v4494_v49, 0.0 }
 0x2be   : > { %v4626_v55 = vmax.f32 %v4486_v50, 0.0 }
 0x2bf   : > { %v4662_v40 = vpack.c.bf16 %v4628_v23, %v4627_v60  ;;  %v7582_v11 = vpack.c.bf16 %v4628_v23, %v4628_v23 }
 0x2c0   : > { %v4661_v46 = vpack.c.bf16 %v4626_v55, %v4625_v1  ;;  %v7581_v34 = vpack.c.bf16 %v4626_v55, %v4626_v55  ;;  %v7875_v32 = vpop.f32.mrb[40].mxu1 }
 0x2c1   : > { %v4753_v12 = vrot.slane %v4662_v40, %v10066_v4  ;;  %v4760_v25 = vrot.slane %v7582_v11, %v10066_v4  ;;  %v4498_v22 = vpop.f32.mrb[41].mxu1  ;;  %v4507_v53 = vadd.f32 %v7875_v32, %v10059_v54 }
 0x2c2   : > { %v4704_v3 = vrot.slane %v4661_v46, %v10066_v4  ;;  %v4711_v20 = vrot.slane %v7581_v34, %v10066_v4  ;;  %v7876_v29 = vpop.f32.mrb[42].mxu1  ;;  %v4499_v8 = vadd.f32 %v10059_v54, %v4498_v22 }
 0x2c3   : > { %v4761_v63 = vcombine.high %v4753_v12, %v4753_v12  ;;  %v4762_v16 = vcombine.high %v4760_v25, %v4760_v25  ;;  %v4769_v38 = vrot.slane %v4753_v12, %v10066_v4  ;;  %v4776_v27 = vrot.slane %v4760_v25, %v10066_v4  ;;  %v4501_v30 = vpop.f32.mrb[43].mxu1 }
 0x2c4   : > { %v4712_v28 = vcombine.high %v4704_v3, %v4704_v3  ;;  %v4713_v7 = vcombine.high %v4711_v20, %v4711_v20  ;;  %v4510_v37 = vadd.f32 %v7876_v29, %v10059_v54  ;;  %v10085_v33 = vrot.slane %v4704_v3, %v10066_v4 }
 0x2c5   : > { %v4783_v6 = vrot.slane %v4761_v63, %v10066_v4  ;;  %v4791_v26 = vcombine.high %v4769_v38, %v4769_v38  ;;  %v10077_v24 = vrot.slane %v4762_v16, %v10066_v4  ;;  %v4792_v56 = vcombine.high %v4776_v27, %v4776_v27 }
 0x2c6   : > { %v10080_v10 = vrot.slane %v4712_v28, %v10066_v4  ;;  %v10088_v44 = vrot.slane %v4711_v20, %v10066_v4  ;;  %v4741_v31 = vrot.slane %v4713_v7, %v10066_v4  ;;  %v4631_v0 = vmax.f32 %v4507_v53, 0.0 }
 0x2c7   : > { %v4793_v45 = vcombine.high %v4783_v6, %v4783_v6  ;;  %v5628_v17 = vcombine.low %v4783_v6, %v4791_v26  ;;  %v4632_v36 = vmax.f32 %v4510_v37, 0.0  ;;  %v10092_v57 = vcombine.low %v10077_v24, %v4792_v56 }
 0x2c8   : > { %v7879_v61 = vpop.f32.mrb[44].mxu1  ;;  %v5579_v2 = vcombine.low %v10085_v33, %v10080_v10  ;;  %v4629_v62 = vmax.f32 %v4499_v8, 0.0  ;;  %v4502_v41 = vadd.f32 %v10059_v54, %v4501_v30  ;;  %v7600_v15 = vcombine.high %v10085_v33, %v10080_v10 }
 0x2c9   : > { %v5629_v5 = vcombine.low %v4793_v45, %v4776_v27  ;;  %v4514_v18 = vpop.f32.mrb[45].mxu1  ;;  %v5638_v43 = vrot.slane %v5628_v17, %v10066_v4  ;;  %v4664_v14 = vpack.c.bf16 %v4632_v36, %v4631_v0  ;;  %v7584_v48 = vpack.c.bf16 %v4632_v36, %v4632_v36 }
 0x2ca   : > { %v7880_v58 = vpop.f32.mrb[46].mxu1  ;;  %v4523_v51 = vadd.f32 %v7879_v61, %v10059_v54  ;;  %v4515_v9 = vadd.f32 %v10059_v54, %v4514_v18  ;;  %v4630_v21 = vmax.f32 %v4502_v41, 0.0  ;;  %v5581_v52 = vcombine.low %v10088_v44, %v4741_v31 }
 0x2cb   : > { %v5645_v13 = vrot.slane %v5629_v5, %v10066_v4  ;;  %v4517_v19 = vpop.f32.mrb[47].mxu1  ;;  %v4526_v42 = vadd.f32 %v7880_v58, %v10059_v54  ;;  %v4851_v39 = vrot.slane %v4664_v14, %v10066_v4  ;;  %v4858_v35 = vrot.slane %v7584_v48, %v10066_v4 }
 0x2cc   : > { %v4635_v49 = vmax.f32 %v4523_v51, 0.0  ;;  %v4518_v50 = vadd.f32 %v10059_v54, %v4517_v19  ;;  %v5652_v60 = vrot.slane %v10092_v57, %v10066_v4  ;;  %v7601_v23 = vcombine.high %v10088_v44, %v4741_v31 }
 0x2cd   : > { %v10104_v47 = vcombine.low %v5638_v43, %v5645_v13  ;;  %v10109_v59 = vmax.f32 %v4526_v42, 0.0  ;;  %v4859_v1 = vcombine.high %v4851_v39, %v4851_v39  ;;  %v4860_v55 = vcombine.high %v4858_v35, %v4858_v35 }
 0x2ce   : > { %v4874_v40 = vrot.slane %v4858_v35, %v10066_v4  ;;  %v4663_v11 = vpack.c.bf16 %v4630_v21, %v4629_v62  ;;  %v7583_v46 = vpack.c.bf16 %v4630_v21, %v4630_v21  ;;  %v4633_v25 = vmax.f32 %v4515_v9, 0.0 }
 0x2cf   : > { %v4666_v34 = vpack.c.bf16 %v10109_v59, %v4635_v49  ;;  %v4881_v32 = vrot.slane %v4859_v1, %v10066_v4  ;;  %v4888_v12 = vrot.slane %v4860_v55, %v10066_v4  ;;  %v4634_v22 = vmax.f32 %v4518_v50, 0.0 }
 0x2d0   : > { %v4889_v3 = vcombine.high %v4874_v40, %v4874_v40  ;;  %v4802_v20 = vrot.slane %v4663_v11, %v10066_v4  ;;  %v4809_v29 = vrot.slane %v7583_v46, %v10066_v4  ;;  %v5589_v16 = vrot.slane %v5579_v2, %v10066_v4 }
 0x2d1   : > { %v4947_v63 = vrot.slane %v4666_v34, %v10066_v4  ;;  %v4867_v38 = vrot.slane %v4851_v39, %v10066_v4  ;;  %v4890_v27 = vcombine.high %v4881_v32, %v4881_v32  ;;  %v4665_v30 = vpack.c.bf16 %v4634_v22, %v4633_v25 }
 0x2d2   : > { %v4794_v28 = vcombine.high %v10077_v24, %v10077_v24  ;;  %v4810_v6 = vcombine.high %v4802_v20, %v4802_v20  ;;  %v4811_v26 = vcombine.high %v4809_v29, %v4809_v29  ;;  %v4818_v7 = vrot.slane %v4802_v20, %v10066_v4 }
 0x2d3   : > { %v5680_v53 = vcombine.low %v4867_v38, %v4881_v32  ;;  %v5726_v56 = vcombine.low %v4890_v27, %v4874_v40  ;;  %v5727_v10 = vcombine.low %v4888_v12, %v4889_v3  ;;  %v4955_v8 = vcombine.high %v4947_v63, %v4947_v63 }
 0x2d4   : > { %v4825_v45 = vrot.slane %v4809_v29, %v10066_v4  ;;  %v4832_v17 = vrot.slane %v4810_v6, %v10066_v4  ;;  %v4839_v37 = vrot.slane %v4811_v26, %v10066_v4  ;;  %v5631_v33 = vcombine.low %v4794_v28, %v4818_v7 }
 0x2d5   : > { %v5668_v44 = vrot.slane %v10104_v47, %v10066_v4  ;;  %v5596_v24 = vrot.slane %v7600_v15, %v10066_v4  ;;  %v5603_v61 = vrot.slane %v5581_v52, %v10066_v4  ;;  %v5610_v5 = vrot.slane %v7601_v23, %v10066_v4 }
 0x2d6   : > { %v5659_v31 = vrot.slane %v5631_v33, %v10066_v4  ;;  %v7602_v0 = vcombine.high %v4818_v7, %v4832_v17  ;;  %v5678_v36 = vcombine.low %v4825_v45, %v4839_v37  ;;  %v7603_v18 = vcombine.high %v4825_v45, %v4839_v37 }
 0x2d7   : > { %v5708_v57 = vrot.slane %v5680_v53, %v10066_v4  ;;  %v5743_v43 = vrot.slane %v5727_v10, %v10066_v4  ;;  %v4963_v2 = vrot.slane %v4947_v63, %v10066_v4  ;;  %v4977_v62 = vrot.slane %v4955_v8, %v10066_v4  ;;  %v6607_v63 = vld [vmem:[%s10568_s9] sm:$0xf] }
 0x2d8   : > { %v5736_v58 = vrot.slane %v5726_v56, %v10066_v4  ;;  %v5661_v13 = vcombine.low %v5652_v60, %v5659_v31  ;;  %v5687_v14 = vrot.slane %v7602_v0, %v10066_v4  ;;  %v5694_v48 = vrot.slane %v5678_v36, %v10066_v4  ;;  %8043 = vmatprep.subr.msk.bf16.mxu0 %vm678_vm0, %v6607_v63 }
 0x2d9   : > { %v5701_v41 = vrot.slane %v7603_v18, %v10066_v4  ;;  %v5777_v19 = vcombine.low %v4963_v2, %v4977_v62  ;;  %v7605_v15 = vcombine.high %v4963_v2, %v4977_v62  ;;  %v7585_v51 = vpack.c.bf16 %v4634_v22, %v4634_v22 }
 0x2da   : > { %v5675_v9 = vrot.slane %v5661_v13, %v10066_v4  ;;  %v4899_v42 = vrot.slane %v4665_v30, %v10066_v4  ;;  %v5611_v47 = vcombine.low %v5589_v16, %v5596_v24  ;;  %v5612_v39 = vcombine.low %v5603_v61, %v5610_v5 }
 0x2db   : > { %v5799_v35 = vrot.slane %v5777_v19, %v10066_v4  ;;  %v5806_v21 = vrot.slane %v7605_v15, %v10066_v4  ;;  %v4891_v52 = vcombine.high %v4888_v12, %v4888_v12  ;;  %v4906_v49 = vrot.slane %v7585_v51, %v10066_v4 }
 0x2dc   : > { %v5676_v50 = vcombine.low %v5668_v44, %v5675_v9  ;;  %v4907_v60 = vcombine.high %v4899_v42, %v4899_v42  ;;  %v4915_v23 = vrot.slane %v4899_v42, %v10066_v4  ;;  %v5619_v1 = vrot.slane %v5611_v47, %v10066_v4 }
 0x2dd   : > { %v4908_v55 = vcombine.high %v4906_v49, %v4906_v49  ;;  %v4922_v40 = vrot.slane %v4906_v49, %v10066_v4  ;;  %v5626_v11 = vrot.slane %v5612_v39, %v10066_v4  ;;  %v5709_v46 = vcombine.low %v5687_v14, %v5694_v48 }
 0x2de   : > { %v4929_v34 = vrot.slane %v4907_v60, %v10066_v4  ;;  %v4937_v32 = vcombine.high %v4915_v23, %v4915_v23  ;;  %v5728_v25 = vcombine.low %v4891_v52, %v4915_v23  ;;  %v5710_v22 = vcombine.low %v5701_v41, %v5708_v57 }
 0x2df   : > { %v4936_v12 = vrot.slane %v4908_v55, %v10066_v4  ;;  %v5627_v3 = vcombine.low %v5619_v1, %v5626_v11  ;;  %v5717_v20 = vrot.slane %v5709_v46, %v10066_v4  ;;  %v5758_v29 = vcombine.low %v5736_v58, %v5743_v43 }
 0x2e0   : > { %v7586_v16 = vpack.c.bf16 %v10109_v59, %v10109_v59  ;;  %v5729_v38 = vcombine.low %v4929_v34, %v4937_v32  ;;  %v5724_v27 = vrot.slane %v5710_v22, %v10066_v4  ;;  %v5808_v6 = vcombine.low %v5799_v35, %v5806_v21 }
 0x2e1   : > { %v5775_v30 = vcombine.low %v4922_v40, %v4936_v12  ;;  %v7604_v28 = vcombine.high %v4922_v40, %v4936_v12  ;;  %7907 = vmatprep.mubr.msk.bf16.mxu0 %vm10578_vm1, %v5627_v3  ;;  %v5750_v26 = vrot.slane %v5728_v25, %v10066_v4  ;;  %v6737_v56 = vsel %vm678_vm0, %v6607_v63, 0  ;;  %vm10581_vm0 = vmmov %vm10578_vm1 }
 0x2e2   : > { %v5757_v7 = vrot.slane %v5729_v38, %v10066_v4  ;;  %7908 = vmatmul.mubr.msk.bf16.vlgmr.msra.gmra.mrb[8].mxu0 %vm10579_vm3, %v5676_v50  ;;  %v5725_v53 = vcombine.low %v5717_v20, %v5724_v27  ;;  %v4954_v8 = vrot.slane %v7586_v16, %v10066_v4  ;;  %v5822_v37 = vrot.slane %v5808_v6, %v10066_v4  ;;  %vm10582_vm5 = vmmov %vm10581_vm0 }
 0x2e3   : > { %v5785_v59 = vrot.slane %v5775_v30, %v10066_v4  ;;  %v5792_v10 = vrot.slane %v7604_v28, %v10066_v4  ;;  %7940 = vmatpush3.bf16.msra.mxu0 %v6737_v56  ;;  %v5766_v44 = vrot.slane %v5758_v29, %v10066_v4  ;;  %vm10583_vm6 = vmmov %vm10581_vm0 }
 0x2e4   : > { %7911 = vmatprep.mubr.msk.bf16.mxu0 %vm10580_vm4, %v5725_v53  ;;  %v5759_v45 = vcombine.low %v5750_v26, %v5757_v7  ;;  %v4956_v18 = vcombine.high %v4954_v8, %v4954_v8  ;;  %v4970_v57 = vrot.slane %v4954_v8, %v10066_v4  ;;  %vm10584_vm7 = vmmov %vm10581_vm0 }
 0x2e5   : > { %v5807_v17 = vcombine.low %v5785_v59, %v5792_v10  ;;  %vm10585_vm8 = vmmov %vm10581_vm0 }
 0x2e6   : > { %v7883_v33 = vpop.f32.mrb[48].mxu1  ;;  %v5773_v24 = vrot.slane %v5759_v45, %v10066_v4  ;;  %v4984_v15 = vrot.slane %v4956_v18, %v10066_v4  ;;  %v4986_v51 = vcombine.high %v4970_v57, %v4970_v57  ;;  %vm10586_vm9 = vmmov %vm10581_vm0 }
 0x2e7   : > { %v4539_v61 = vadd.f32 %v7883_v33, %v10059_v54  ;;  %v4530_v5 = vpop.f32.mrb[49].mxu1  ;;  %v5815_v31 = vrot.slane %v5807_v17, %v10066_v4  ;;  %vm10587_vm10 = vmmov %vm10581_vm0 }
 0x2e8   : > { %v4531_v0 = vadd.f32 %v10059_v54, %v4530_v5  ;;  %v7884_v36 = vpop.f32.mrb[50].mxu1  ;;  %v5774_v43 = vcombine.low %v5766_v44, %v5773_v24  ;;  %v5824_v50 = vcombine.low %v4984_v15, %v4986_v51  ;;  %v4988_v1 = vcombine.high %v4984_v15, %v4984_v15  ;;  %vm10588_vm11 = vmmov %vm10581_vm0 }
 0x2e9   : > { %v4542_v2 = vadd.f32 %v7884_v36, %v10059_v54  ;;  %v4533_v62 = vpop.f32.mrb[51].mxu1  ;;  %v5823_v58 = vcombine.low %v5815_v31, %v5822_v37  ;;  %v4639_v14 = vmax.f32 %v4539_v61, 0.0  ;;  %vm10589_vm12 = vmmov %vm10581_vm0 }
 0x2ea   : > { %v4534_v13 = vadd.f32 %v10059_v54, %v4533_v62  ;;  %7912 = vmatmul.mubr.msk.bf16.gmra.mrb[12].mxu0 %vm10581_vm0, %v5774_v43  ;;  %v4637_v41 = vmax.f32 %v4531_v0, 0.0  ;;  %v5834_v63 = vrot.slane %v5824_v50, %v10066_v4  ;;  %vm10590_vm13 = vmmov %vm10581_vm0 }
 0x2eb   : > { %v4640_v48 = vmax.f32 %v4542_v2, 0.0  ;;  %7915 = vmatprep.mubr.msk.bf16.mxu0 %vm10582_vm5, %v5823_v58  ;;  %vm10591_vm14 = vmmov %vm10581_vm0 }
 0x2ec   : > { %v4638_v19 = vmax.f32 %v4534_v13, 0.0  ;;  %vm10592_vm15 = vmmov %vm10581_vm0 }
 0x2ed   : > { %v4668_v9 = vpack.c.bf16 %v4640_v48, %v4639_v14  ;;  %v7588_v42 = vpack.c.bf16 %v4640_v48, %v4640_v48  ;;  %vm10593_vm2 = vmmov %vm10581_vm0 }
 0x2ee   : > { %v4667_v47 = vpack.c.bf16 %v4638_v19, %v4637_v41  ;;  %v7587_v39 = vpack.c.bf16 %v4638_v19, %v4638_v19  ;;  %vm10594_vm1 = vmmov %vm10581_vm0 }
 0x2ef   : > { %v5045_v35 = vrot.slane %v4668_v9, %v10066_v4  ;;  %v5052_v21 = vrot.slane %v7588_v42, %v10066_v4  ;;  %vm10595_vm3 = vmmov %vm10581_vm0 }
 0x2f0   : > { %v4996_v52 = vrot.slane %v4667_v47, %v10066_v4  ;;  %v5003_v49 = vrot.slane %v7587_v39, %v10066_v4  ;;  %vm10596_vm4 = vmmov %vm10581_vm0 }
 0x2f1   : > { %v5053_v60 = vcombine.high %v5045_v35, %v5045_v35  ;;  %v5054_v23 = vcombine.high %v5052_v21, %v5052_v21  ;;  %v5061_v55 = vrot.slane %v5045_v35, %v10066_v4  ;;  %v5068_v34 = vrot.slane %v5052_v21, %v10066_v4  ;;  %vm10597_vm5 = vmmov %vm10581_vm0 }
 0x2f2   : > { %v5004_v40 = vcombine.high %v4996_v52, %v4996_v52  ;;  %v5005_v11 = vcombine.high %v5003_v49, %v5003_v49  ;;  %v5012_v46 = vrot.slane %v4996_v52, %v10066_v4  ;;  %v5019_v22 = vrot.slane %v5003_v49, %v10066_v4 }
 0x2f3   : > { %v5075_v32 = vrot.slane %v5053_v60, %v10066_v4  ;;  %v10193_v25 = vrot.slane %v5054_v23, %v10066_v4 }
 0x2f4   : > { %v5026_v12 = vrot.slane %v5004_v40, %v10066_v4  ;;  %v5033_v3 = vrot.slane %v5005_v11, %v10066_v4  ;;  %v5034_v20 = vcombine.high %v5012_v46, %v5012_v46  ;;  %v5825_v29 = vcombine.low %v4988_v1, %v5012_v46 }
 0x2f5   : > { %v5874_v16 = vcombine.low %v5061_v55, %v5075_v32  ;;  %v7607_v38 = vcombine.high %v5061_v55, %v5075_v32  ;;  %v5876_v27 = vcombine.low %v5068_v34, %v10193_v25  ;;  %v5085_v60 = vcombine.high %v10193_v25, %v10193_v25 }
 0x2f6   : > { %v5036_v30 = vcombine.high %v5026_v12, %v5026_v12  ;;  %v5826_v28 = vcombine.low %v5026_v12, %v5034_v20  ;;  %v5841_v6 = vrot.slane %v5825_v29, %v10066_v4  ;;  %v7606_v26 = vcombine.high %v5019_v22, %v5033_v3 }
 0x2f7   : > { %v5890_v7 = vrot.slane %v5874_v16, %v10066_v4  ;;  %v5897_v53 = vrot.slane %v7607_v38, %v10066_v4  ;;  %v5904_v56 = vrot.slane %v5876_v27, %v10066_v4 }
 0x2f8   : > { %v5827_v59 = vcombine.low %v5036_v30, %v5019_v22  ;;  %v5883_v10 = vrot.slane %v7606_v26, %v10066_v4  ;;  %v5856_v8 = vcombine.low %v5834_v63, %v5841_v6  ;;  %v5848_v17 = vrot.slane %v5826_v28, %v10066_v4 }
 0x2f9   : > { %v5906_v45 = vcombine.low %v5897_v53, %v5904_v56 }
 0x2fa   : > { %v5855_v37 = vrot.slane %v5827_v59, %v10066_v4  ;;  %v5905_v33 = vcombine.low %v5883_v10, %v5890_v7  ;;  %v5864_v5 = vrot.slane %v5856_v8, %v10066_v4 }
 0x2fb   : > { %v5920_v44 = vrot.slane %v5906_v45, %v10066_v4 }
 0x2fc   : > { %v5857_v24 = vcombine.low %v5848_v17, %v5855_v37  ;;  %v5913_v61 = vrot.slane %v5905_v33, %v10066_v4 }
 0x2fe   : > { %v5871_v31 = vrot.slane %v5857_v24, %v10066_v4  ;;  %v5921_v0 = vcombine.low %v5913_v61, %v5920_v44 }
 0x300   : > { %v5872_v36 = vcombine.low %v5864_v5, %v5871_v31 }
 0x302   : > { %7916 = vmatmul.mubr.msk.bf16.gmra.mrb[16].mxu0 %vm10583_vm6, %v5872_v36  ;;  %vm10598_vm6 = vmmov %vm10581_vm0 }
 0x303   : > { %7919 = vmatprep.mubr.msk.bf16.mxu0 %vm10584_vm7, %v5921_v0  ;;  %vm10599_vm7 = vmmov %vm10581_vm0 }
 0x306   : > { %v7887_v18 = vpop.f32.mrb[52].mxu1 }
 0x307   : > { %v4555_v57 = vadd.f32 %v7887_v18, %v10059_v54  ;;  %v4546_v43 = vpop.f32.mrb[53].mxu1 }
 0x308   : > { %v4547_v2 = vadd.f32 %v10059_v54, %v4546_v43  ;;  %v7888_v62 = vpop.f32.mrb[54].mxu1 }
 0x309   : > { %v4558_v58 = vadd.f32 %v7888_v62, %v10059_v54  ;;  %v4549_v13 = vpop.f32.mrb[55].mxu1  ;;  %v4643_v48 = vmax.f32 %v4555_v57, 0.0 }
 0x30a   : > { %v4550_v14 = vadd.f32 %v10059_v54, %v4549_v13  ;;  %v4641_v19 = vmax.f32 %v4547_v2, 0.0 }
 0x30b   : > { %v4644_v41 = vmax.f32 %v4558_v58, 0.0 }
 0x30c   : > { %v4642_v15 = vmax.f32 %v4550_v14, 0.0 }
 0x30d   : > { %v4670_v51 = vpack.c.bf16 %v4644_v41, %v4643_v48  ;;  %v7590_v9 = vpack.c.bf16 %v4644_v41, %v4644_v41 }
 0x30e   : > { %v4669_v42 = vpack.c.bf16 %v4642_v15, %v4641_v19  ;;  %v7589_v47 = vpack.c.bf16 %v4642_v15, %v4642_v15 }
 0x30f   : > { %v5141_v39 = vrot.slane %v4670_v51, %v10066_v4  ;;  %v5148_v35 = vrot.slane %v7590_v9, %v10066_v4 }
 0x310   : > { %v5093_v21 = vrot.slane %v4669_v42, %v10066_v4  ;;  %v5100_v52 = vrot.slane %v7589_v47, %v10066_v4 }
 0x311   : > { %v5149_v49 = vcombine.high %v5141_v39, %v5141_v39  ;;  %v5150_v50 = vcombine.high %v5148_v35, %v5148_v35  ;;  %v5157_v11 = vrot.slane %v5141_v39, %v10066_v4  ;;  %v5164_v46 = vrot.slane %v5148_v35, %v10066_v4 }
 0x312   : > { %v5101_v23 = vcombine.high %v5093_v21, %v5093_v21  ;;  %v5102_v1 = vcombine.high %v5100_v52, %v5100_v52  ;;  %v5109_v55 = vrot.slane %v5093_v21, %v10066_v4  ;;  %v5116_v40 = vrot.slane %v5100_v52, %v10066_v4 }
 0x313   : > { %v5171_v34 = vrot.slane %v5149_v49, %v10066_v4  ;;  %v5178_v32 = vrot.slane %v5150_v50, %v10066_v4 }
 0x314   : > { %v5123_v22 = vrot.slane %v5101_v23, %v10066_v4  ;;  %v5130_v12 = vrot.slane %v5102_v1, %v10066_v4  ;;  %v5131_v25 = vcombine.high %v5109_v55, %v5109_v55  ;;  %v5132_v3 = vcombine.high %v5116_v40, %v5116_v40 }
 0x315   : > { %v5971_v20 = vcombine.low %v5157_v11, %v5171_v34  ;;  %v7608_v29 = vcombine.high %v5157_v11, %v5171_v34  ;;  %v5973_v63 = vcombine.low %v5164_v46, %v5178_v32  ;;  %v7609_v16 = vcombine.high %v5164_v46, %v5178_v32 }
 0x316   : > { %v5133_v38 = vcombine.high %v5123_v22, %v5123_v22  ;;  %v5922_v27 = vcombine.low %v5085_v60, %v5109_v55  ;;  %v5923_v30 = vcombine.low %v5123_v22, %v5131_v25  ;;  %v5925_v28 = vcombine.low %v5130_v12, %v5132_v3 }
 0x317   : > { %v5981_v6 = vrot.slane %v5971_v20, %v10066_v4  ;;  %v5988_v26 = vrot.slane %v7608_v29, %v10066_v4  ;;  %v5995_v7 = vrot.slane %v5973_v63, %v10066_v4  ;;  %v6002_v53 = vrot.slane %v7609_v16, %v10066_v4 }
 0x318   : > { %v5924_v56 = vcombine.low %v5133_v38, %v5116_v40  ;;  %v5932_v59 = vrot.slane %v5922_v27, %v10066_v4  ;;  %v5939_v10 = vrot.slane %v5923_v30, %v10066_v4  ;;  %v5953_v37 = vrot.slane %v5925_v28, %v10066_v4 }
 0x319   : > { %v6003_v8 = vcombine.low %v5981_v6, %v5988_v26  ;;  %v6004_v45 = vcombine.low %v5995_v7, %v6002_v53 }
 0x31a   : > { %v5946_v17 = vrot.slane %v5924_v56, %v10066_v4  ;;  %v5954_v33 = vcombine.low %v5932_v59, %v5939_v10 }
 0x31b   : > { %v6011_v44 = vrot.slane %v6003_v8, %v10066_v4  ;;  %v6018_v24 = vrot.slane %v6004_v45, %v10066_v4 }
 0x31c   : > { %v5955_v61 = vcombine.low %v5946_v17, %v5953_v37  ;;  %v5962_v31 = vrot.slane %v5954_v33, %v10066_v4 }
 0x31d   : > { %v6019_v5 = vcombine.low %v6011_v44, %v6018_v24 }
 0x31e   : > { %v5969_v0 = vrot.slane %v5955_v61, %v10066_v4 }
 0x320   : > { %v5970_v36 = vcombine.low %v5962_v31, %v5969_v0 }
 0x322   : > { %7920 = vmatmul.mubr.msk.bf16.gmra.mrb[20].mxu0 %vm10585_vm8, %v5970_v36  ;;  %vm10600_vm8 = vmmov %vm10581_vm0 }
 0x323   : > { %7923 = vmatprep.mubr.msk.bf16.mxu0 %vm10586_vm9, %v6019_v5  ;;  %vm10601_vm9 = vmmov %vm10581_vm0 }
 0x326   : > { %v7891_v18 = vpop.f32.mrb[56].mxu1 }
 0x327   : > { %v4571_v57 = vadd.f32 %v7891_v18, %v10059_v54  ;;  %v4562_v43 = vpop.f32.mrb[57].mxu1 }
 0x328   : > { %v4563_v2 = vadd.f32 %v10059_v54, %v4562_v43  ;;  %v7892_v62 = vpop.f32.mrb[58].mxu1 }
 0x329   : > { %v4574_v58 = vadd.f32 %v7892_v62, %v10059_v54  ;;  %v4565_v13 = vpop.f32.mrb[59].mxu1  ;;  %v4647_v48 = vmax.f32 %v4571_v57, 0.0 }
 0x32a   : > { %v4566_v14 = vadd.f32 %v10059_v54, %v4565_v13  ;;  %v4645_v19 = vmax.f32 %v4563_v2, 0.0 }
 0x32b   : > { %v4648_v41 = vmax.f32 %v4574_v58, 0.0 }
 0x32c   : > { %v4646_v15 = vmax.f32 %v4566_v14, 0.0 }
 0x32d   : > { %v4672_v51 = vpack.c.bf16 %v4648_v41, %v4647_v48  ;;  %v7592_v9 = vpack.c.bf16 %v4648_v41, %v4648_v41 }
 0x32e   : > { %v4671_v42 = vpack.c.bf16 %v4646_v15, %v4645_v19  ;;  %v7591_v47 = vpack.c.bf16 %v4646_v15, %v4646_v15 }
 0x32f   : > { %v5239_v39 = vrot.slane %v4672_v51, %v10066_v4  ;;  %v5246_v35 = vrot.slane %v7592_v9, %v10066_v4 }
 0x330   : > { %v5190_v21 = vrot.slane %v4671_v42, %v10066_v4  ;;  %v5197_v52 = vrot.slane %v7591_v47, %v10066_v4 }
 0x331   : > { %v5247_v49 = vcombine.high %v5239_v39, %v5239_v39  ;;  %v5248_v50 = vcombine.high %v5246_v35, %v5246_v35  ;;  %v5255_v40 = vrot.slane %v5239_v39, %v10066_v4  ;;  %v10265_v11 = vrot.slane %v5246_v35, %v10066_v4 }
 0x332   : > { %v5198_v60 = vcombine.high %v5190_v21, %v5190_v21  ;;  %v5199_v23 = vcombine.high %v5197_v52, %v5197_v52  ;;  %v5206_v1 = vrot.slane %v5190_v21, %v10066_v4  ;;  %v5213_v55 = vrot.slane %v5197_v52, %v10066_v4 }
 0x333   : > { %v5269_v46 = vrot.slane %v5247_v49, %v10066_v4  ;;  %v5276_v34 = vrot.slane %v5248_v50, %v10066_v4 }
 0x334   : > { %v5220_v32 = vrot.slane %v5198_v60, %v10066_v4  ;;  %v5227_v22 = vrot.slane %v5199_v23, %v10066_v4  ;;  %v5228_v12 = vcombine.high %v5206_v1, %v5206_v1  ;;  %v5229_v25 = vcombine.high %v5213_v55, %v5213_v55 }
 0x335   : > { %v7610_v3 = vcombine.high %v5255_v40, %v5269_v46  ;;  %v6070_v20 = vcombine.low %v10265_v11, %v5276_v34  ;;  %v7611_v47 = vcombine.high %v10265_v11, %v5276_v34 }
 0x336   : > { %v5230_v29 = vcombine.high %v5220_v32, %v5220_v32  ;;  %v5231_v63 = vcombine.high %v5227_v22, %v5227_v22  ;;  %v6020_v16 = vcombine.low %v5220_v32, %v5228_v12  ;;  %v6022_v38 = vcombine.low %v5227_v22, %v5229_v25 }
 0x337   : > { %v6079_v27 = vrot.slane %v7610_v3, %v10066_v4  ;;  %v6086_v30 = vrot.slane %v6070_v20, %v10066_v4  ;;  %v6093_v46 = vrot.slane %v7611_v47, %v10066_v4 }
 0x338   : > { %v6021_v28 = vcombine.low %v5230_v29, %v5213_v55  ;;  %v6023_v6 = vcombine.low %v5231_v63, %v5255_v40  ;;  %v6030_v7 = vrot.slane %v6020_v16, %v10066_v4  ;;  %v6044_v56 = vrot.slane %v6022_v38, %v10066_v4 }
 0x339   : > { %v6101_v26 = vcombine.low %v6079_v27, %v6086_v30 }
 0x33a   : > { %v6037_v53 = vrot.slane %v6021_v28, %v10066_v4  ;;  %v6051_v59 = vrot.slane %v6023_v6, %v10066_v4 }
 0x33b   : > { %v6109_v29 = vrot.slane %v6101_v26, %v10066_v4 }
 0x33c   : > { %v6052_v10 = vcombine.low %v6030_v7, %v6037_v53  ;;  %v6053_v8 = vcombine.low %v6044_v56, %v6051_v59  ;;  %v7895_v45 = vpop.f32.mrb[60].mxu1 }
 0x33d   : > { %v4587_v17 = vadd.f32 %v7895_v45, %v10059_v54  ;;  %v4578_v37 = vpop.f32.mrb[61].mxu1 }
 0x33e   : > { %v6060_v33 = vrot.slane %v6052_v10, %v10066_v4  ;;  %v6067_v44 = vrot.slane %v6053_v8, %v10066_v4  ;;  %v4579_v24 = vadd.f32 %v10059_v54, %v4578_v37  ;;  %v7896_v61 = vpop.f32.mrb[62].mxu1 }
 0x33f   : > { %v4590_v5 = vadd.f32 %v7896_v61, %v10059_v54  ;;  %v4581_v31 = vpop.f32.mrb[63].mxu1  ;;  %v4651_v18 = vmax.f32 %v4587_v17, 0.0 }
 0x340   : > { %v6068_v0 = vcombine.low %v6060_v33, %v6067_v44  ;;  %v4582_v36 = vadd.f32 %v10059_v54, %v4581_v31  ;;  %v4649_v43 = vmax.f32 %v4579_v24, 0.0 }
 0x341   : > { %v4652_v57 = vmax.f32 %v4590_v5, 0.0 }
 0x342   : > { %7924 = vmatmul.mubr.msk.bf16.gmra.mrb[24].mxu0 %vm10587_vm10, %v6068_v0  ;;  %v4650_v2 = vmax.f32 %v4582_v36, 0.0  ;;  %vm10602_vm10 = vmmov %vm10581_vm0 }
 0x343   : > { %v4674_v62 = vpack.c.bf16 %v4652_v57, %v4651_v18  ;;  %v7594_v6 = vpack.c.bf16 %v4652_v57, %v4652_v57 }
 0x344   : > { %v4673_v58 = vpack.c.bf16 %v4650_v2, %v4649_v43  ;;  %v7593_v13 = vpack.c.bf16 %v4650_v2, %v4650_v2 }
 0x345   : > { %v5336_v14 = vrot.slane %v4674_v62, %v10066_v4  ;;  %v5343_v53 = vrot.slane %v7594_v6, %v10066_v4 }
 0x346   : > { %v5288_v48 = vrot.slane %v4673_v58, %v10066_v4  ;;  %v5295_v41 = vrot.slane %v7593_v13, %v10066_v4 }
 0x347   : > { %v5344_v19 = vcombine.high %v5336_v14, %v5336_v14  ;;  %v5352_v15 = vrot.slane %v5336_v14, %v10066_v4  ;;  %v5345_v59 = vcombine.high %v5343_v53, %v5343_v53  ;;  %v5359_v0 = vrot.slane %v5343_v53, %v10066_v4 }
 0x348   : > { %v5296_v51 = vcombine.high %v5288_v48, %v5288_v48  ;;  %v5297_v9 = vcombine.high %v5295_v41, %v5295_v41  ;;  %v5311_v42 = vrot.slane %v5295_v41, %v10066_v4  ;;  %v5304_v21 = vrot.slane %v5288_v48, %v10066_v4 }
 0x349   : > { %v5366_v39 = vrot.slane %v5344_v19, %v10066_v4  ;;  %v5374_v35 = vcombine.high %v5352_v15, %v5352_v15  ;;  %v5373_v44 = vrot.slane %v5345_v59, %v10066_v4  ;;  %v8297_v59 = vld [vmem:[%s10565_s6] ss:$0 sm:$0xff] }
 0x34a   : > { %v5318_v52 = vrot.slane %v5296_v51, %v10066_v4  ;;  %v5325_v49 = vrot.slane %v5297_v9, %v10066_v4  ;;  %v5326_v50 = vcombine.high %v5311_v42, %v5311_v42 }
 0x34b   : > { %v6121_v60 = vcombine.low %v5366_v39, %v5374_v35  ;;  %v6167_v2 = vcombine.low %v5359_v0, %v5373_v44  ;;  %v7612_v62 = vcombine.high %v5359_v0, %v5373_v44 }
 0x34c   : > { %v5327_v23 = vcombine.high %v5318_v52, %v5318_v52  ;;  %v5328_v1 = vcombine.high %v5325_v49, %v5325_v49  ;;  %v6072_v55 = vcombine.low %v5304_v21, %v5318_v52  ;;  %v6119_v40 = vcombine.low %v5325_v49, %v5326_v50 }
 0x34d   : > { %v6149_v22 = vrot.slane %v6121_v60, %v10066_v4  ;;  %v6177_v9 = vrot.slane %v6167_v2, %v10066_v4 }
 0x34e   : > { %v6100_v32 = vrot.slane %v6072_v55, %v10066_v4  ;;  %v6118_v11 = vcombine.low %v5327_v23, %v5311_v42  ;;  %v6120_v34 = vcombine.low %v5328_v1, %v5352_v15  ;;  %v6135_v25 = vrot.slane %v6119_v40, %v10066_v4 }
 0x34f   : > { %v6184_v42 = vrot.slane %v7612_v62, %v10066_v4 }
 0x350   : > { %v6128_v12 = vrot.slane %v6118_v11, %v10066_v4  ;;  %v6102_v3 = vcombine.low %v6093_v46, %v6100_v32  ;;  %v6142_v20 = vrot.slane %v6120_v34, %v10066_v4 }
 0x352   : > { %v6116_v63 = vrot.slane %v6102_v3, %v10066_v4  ;;  %v6150_v16 = vcombine.low %v6128_v12, %v6135_v25  ;;  %v6151_v38 = vcombine.low %v6142_v20, %v6149_v22  ;;  %v6199_v12 = vcombine.low %v6177_v9, %v6184_v42 }
 0x354   : > { %v6117_v27 = vcombine.low %v6109_v29, %v6116_v63  ;;  %v6158_v30 = vrot.slane %v6150_v16, %v10066_v4  ;;  %v6165_v28 = vrot.slane %v6151_v38, %v10066_v4  ;;  %v6207_v38 = vrot.slane %v6199_v12, %v10066_v4 }
 0x356   : > { %7927 = vmatprep.mubr.msk.bf16.mxu0 %vm10588_vm11, %v6117_v27  ;;  %v6166_v7 = vcombine.low %v6158_v30, %v6165_v28  ;;  %vm10603_vm11 = vmmov %vm10581_vm0 }
 0x358   : > { %7928 = vmatmul.mubr.msk.bf16.gmra.mrb[28].mxu0 %vm10589_vm12, %v6166_v7  ;;  %vm10604_vm12 = vmmov %vm10581_vm0 }
 0x35c   : > { %v7899_v56 = vpop.f32.mrb[64].mxu1 }
 0x35d   : > { %v4603_v26 = vadd.f32 %v7899_v56, %v10059_v54  ;;  %v4594_v10 = vpop.f32.mrb[65].mxu1 }
 0x35e   : > { %v4595_v8 = vadd.f32 %v10059_v54, %v4594_v10  ;;  %v7900_v45 = vpop.f32.mrb[66].mxu1 }
 0x35f   : > { %v4606_v17 = vadd.f32 %v7900_v45, %v10059_v54  ;;  %v4597_v37 = vpop.f32.mrb[67].mxu1  ;;  %v4655_v24 = vmax.f32 %v4603_v26, 0.0 }
 0x360   : > { %v4598_v33 = vadd.f32 %v10059_v54, %v4597_v37  ;;  %v4653_v5 = vmax.f32 %v4595_v8, 0.0 }
 0x361   : > { %v4656_v61 = vmax.f32 %v4606_v17, 0.0 }
 0x362   : > { %v4654_v31 = vmax.f32 %v4598_v33, 0.0 }
 0x363   : > { %v4676_v36 = vpack.c.bf16 %v4656_v61, %v4655_v24  ;;  %v7596_v18 = vpack.c.bf16 %v4656_v61, %v4656_v61 }
 0x364   : > { %v4675_v57 = vpack.c.bf16 %v4654_v31, %v4653_v5  ;;  %v7595_v43 = vpack.c.bf16 %v4654_v31, %v4654_v31 }
 0x365   : > { %v5433_v58 = vrot.slane %v4676_v36, %v10066_v4  ;;  %v5440_v14 = vrot.slane %v7596_v18, %v10066_v4 }
 0x366   : > { %v5384_v13 = vrot.slane %v4675_v57, %v10066_v4  ;;  %v5391_v54 = vrot.slane %v7595_v43, %v10066_v4 }
 0x367   : > { %v5441_v48 = vcombine.high %v5433_v58, %v5433_v58  ;;  %v5449_v41 = vrot.slane %v5433_v58, %v10066_v4  ;;  %v10327_v50 = vrot.slane %v5440_v14, %v10066_v4  ;;  %v5442_v33 = vcombine.high %v5440_v14, %v5440_v14 }
 0x368   : > { %v5392_v19 = vcombine.high %v5384_v13, %v5384_v13  ;;  %v5393_v15 = vcombine.high %v5391_v54, %v5391_v54  ;;  %v5407_v51 = vrot.slane %v5391_v54, %v10066_v4  ;;  %v5400_v35 = vrot.slane %v5384_v13, %v10066_v4 }
 0x369   : > { %v5463_v47 = vrot.slane %v5441_v48, %v10066_v4  ;;  %v5471_v39 = vcombine.high %v5449_v41, %v5449_v41  ;;  %v5470_v18 = vrot.slane %v5442_v33, %v10066_v4  ;;  %v8286_v33 = vld [vmem:[%s10241_s21 + $0x38] sm:$0xff]  }
 0x36a   : > { %v5414_v21 = vrot.slane %v5392_v19, %v10066_v4  ;;  %v5421_v52 = vrot.slane %v5393_v15, %v10066_v4  ;;  %v5423_v49 = vcombine.high %v5407_v51, %v5407_v51 }
 0x36b   : > { %v5473_v60 = vcombine.high %v5463_v47, %v5463_v47  ;;  %v6218_v23 = vcombine.low %v5463_v47, %v5471_v39  ;;  %v7614_v19 = vcombine.high %v10327_v50, %v5470_v18  ;;  %v8294_v18 = vld [vmem:[%s10241_s21 + $0x78] sm:$0xff]  }
 0x36c   : > { %v5425_v1 = vcombine.high %v5421_v52, %v5421_v52  ;;  %v6169_v55 = vcombine.low %v5400_v35, %v5414_v21  ;;  %v7613_v40 = vcombine.high %v5400_v35, %v5414_v21  ;;  %v6216_v46 = vcombine.low %v5421_v52, %v5423_v49 }
 0x36d   : > { %v6219_v32 = vcombine.low %v5473_v60, %v10327_v50  ;;  %v6240_v25 = vrot.slane %v6218_v23, %v10066_v4 }
 0x36e   : > { %v6191_v11 = vrot.slane %v6169_v55, %v10066_v4  ;;  %v6198_v34 = vrot.slane %v7613_v40, %v10066_v4  ;;  %v6217_v22 = vcombine.low %v5425_v1, %v5449_v41  ;;  %v6226_v20 = vrot.slane %v6216_v46, %v10066_v4 }
 0x36f   : > { %v6247_v3 = vrot.slane %v6219_v32, %v10066_v4  ;;  %v6275_v32 = vrot.slane %v7614_v19, %v10066_v4 }
 0x370   : > { %v6200_v29 = vcombine.low %v6191_v11, %v6198_v34  ;;  %v6233_v63 = vrot.slane %v6217_v22, %v10066_v4 }
 0x371   : > { %v6249_v16 = vcombine.low %v6240_v25, %v6247_v3 }
 0x372   : > { %v6214_v27 = vrot.slane %v6200_v29, %v10066_v4  ;;  %v6248_v30 = vcombine.low %v6226_v20, %v6233_v63 }
 0x373   : > { %v6263_v28 = vrot.slane %v6249_v16, %v10066_v4 }
 0x374   : > { %v6215_v6 = vcombine.low %v6207_v38, %v6214_v27  ;;  %v6256_v7 = vrot.slane %v6248_v30, %v10066_v4 }
 0x376   : > { %7931 = vmatprep.mubr.msk.bf16.mxu0 %vm10590_vm13, %v6215_v6  ;;  %v6264_v53 = vcombine.low %v6256_v7, %v6263_v28  ;;  %vm10605_vm13 = vmmov %vm10581_vm0 }
 0x378   : > { %7932 = vmatmul.mubr.msk.bf16.gmra.mrb[32].mxu0 %vm10591_vm14, %v6264_v53  ;;  %vm10606_vm14 = vmmov %vm10581_vm0 }
 0x379   : > { %v7903_v56 = vpop.f32.mrb[68].mxu1 }
 0x37a   : > { %v4619_v26 = vadd.f32 %v8297_v59, %v7903_v56  ;;  %v4610_v10 = vpop.f32.mrb[69].mxu1 }
 0x37b   : > { %v4611_v8 = vadd.f32 %v8297_v59, %v4610_v10  ;;  %v7904_v45 = vpop.f32.mrb[70].mxu1  ;;  %v8280_v10 = vld [vmem:[%s10241_s21 + $0x8] sm:$0xff]  }
 0x37c   : > { %v4622_v17 = vadd.f32 %v8297_v59, %v7904_v45  ;;  %v4613_v37 = vpop.f32.mrb[71].mxu1  ;;  %v4659_v24 = vmax.f32 %v4619_v26, 0.0  ;;  %v8282_v45 = vld [vmem:[%s10241_s21 + $0x18] sm:$0xff]  }
 0x37d   : > { %v4614_v44 = vadd.f32 %v8297_v59, %v4613_v37  ;;  %v4657_v5 = vmax.f32 %v4611_v8, 0.0  ;;  %v8279_v59 = vld [vmem:[%s10241_s21] sm:$0xff]   ;;  %v8281_v8 = vld [vmem:[%s10241_s21 + $0x10] sm:$0xff]  }
 0x37e   : > { %v4660_v61 = vmax.f32 %v4622_v17, 0.0  ;;  %v8284_v17 = vld [vmem:[%s10241_s21 + $0x28] sm:$0xff]   ;;  %v8285_v37 = vld [vmem:[%s10241_s21 + $0x30] sm:$0xff]  }
 0x37f   : > { %v4658_v31 = vmax.f32 %v4614_v44, 0.0  ;;  %v8287_v44 = vld [vmem:[%s10241_s21 + $0x40] sm:$0xff]  }
 0x380   : > { %v4678_v0 = vpack.c.bf16 %v4660_v61, %v4659_v24  ;;  %v7598_v36 = vpack.c.bf16 %v4660_v61, %v4660_v61  ;;  %v8288_v24 = vld [vmem:[%s10241_s21 + $0x48] sm:$0xff]   ;;  %v8289_v61 = vld [vmem:[%s10241_s21 + $0x50] sm:$0xff]  }
 0x381   : > { %v4677_v57 = vpack.c.bf16 %v4658_v31, %v4657_v5  ;;  %v7597_v43 = vpack.c.bf16 %v4658_v31, %v4658_v31  ;;  %v8290_v5 = vld [vmem:[%s10241_s21 + $0x58] sm:$0xff]   ;;  %v8291_v31 = vld [vmem:[%s10241_s21 + $0x60] sm:$0xff]  }
 0x382   : > { %v5530_v2 = vrot.slane %v4678_v0, %v10066_v4  ;;  %v5537_v62 = vrot.slane %v7598_v36, %v10066_v4  ;;  %v8292_v0 = vld [vmem:[%s10241_s21 + $0x68] sm:$0xff]   ;;  %v8293_v36 = vld [vmem:[%s10241_s21 + $0x70] sm:$0xff]  }
 0x383   : > { %v5482_v58 = vrot.slane %v4677_v57, %v10066_v4  ;;  %v5489_v13 = vrot.slane %v7597_v43, %v10066_v4  ;;  %v10408_v57 = vld [vmem:[%s10567_s8] ss:$0 sm:$0xff] }
 0x384   : > { %v5538_v54 = vcombine.high %v5530_v2, %v5530_v2  ;;  %v5539_v14 = vcombine.high %v5537_v62, %v5537_v62  ;;  %v5546_v48 = vrot.slane %v5530_v2, %v10066_v4  ;;  %v5553_v41 = vrot.slane %v5537_v62, %v10066_v4  ;;  %v10413_v2 = vld [vmem:[%s10569_s10] ss:$0 sm:$0xff] }
 0x385   : > { %v5490_v15 = vcombine.high %v5482_v58, %v5482_v58  ;;  %v5491_v51 = vcombine.high %v5489_v13, %v5489_v13  ;;  %v5498_v35 = vrot.slane %v5482_v58, %v10066_v4  ;;  %v5505_v21 = vrot.slane %v5489_v13, %v10066_v4 }
 0x386   : > { %v5560_v9 = vrot.slane %v5538_v54, %v10066_v4  ;;  %v5567_v42 = vrot.slane %v5539_v14, %v10066_v4  ;;  %v5568_v47 = vcombine.high %v5546_v48, %v5546_v48  ;;  %v5569_v39 = vcombine.high %v5553_v41, %v5553_v41 }
 0x387   : > { %v5512_v52 = vrot.slane %v5490_v15, %v10066_v4  ;;  %v5519_v49 = vrot.slane %v5491_v51, %v10066_v4 }
 0x388   : > { %v5570_v60 = vcombine.high %v5560_v9, %v5560_v9  ;;  %v6315_v23 = vcombine.low %v5560_v9, %v5568_v47  ;;  %v6317_v1 = vcombine.low %v5567_v42, %v5569_v39 }
 0x389   : > { %v5522_v50 = vcombine.high %v5519_v49, %v5519_v49  ;;  %v6266_v55 = vcombine.low %v5498_v35, %v5512_v52  ;;  %v7615_v40 = vcombine.high %v5498_v35, %v5512_v52  ;;  %v6268_v46 = vcombine.low %v5505_v21, %v5519_v49 }
 0x38a   : > { %v6316_v11 = vcombine.low %v5570_v60, %v5553_v41  ;;  %v6345_v20 = vrot.slane %v6317_v1, %v10066_v4  ;;  %v6331_v29 = vrot.slane %v6315_v23, %v10066_v4 }
 0x38b   : > { %v6282_v34 = vrot.slane %v6266_v55, %v10066_v4  ;;  %v6289_v22 = vrot.slane %v7615_v40, %v10066_v4  ;;  %v6296_v12 = vrot.slane %v6268_v46, %v10066_v4  ;;  %v6314_v25 = vcombine.low %v5522_v50, %v5546_v48 }
 0x38c   : > { %v6338_v3 = vrot.slane %v6316_v11, %v10066_v4 }
 0x38d   : > { %v6297_v63 = vcombine.low %v6275_v32, %v6282_v34  ;;  %v6298_v16 = vcombine.low %v6289_v22, %v6296_v12  ;;  %v6324_v38 = vrot.slane %v6314_v25, %v10066_v4 }
 0x38e   : > { %v6347_v27 = vcombine.low %v6338_v3, %v6345_v20 }
 0x38f   : > { %v6305_v30 = vrot.slane %v6297_v63, %v10066_v4  ;;  %v6312_v28 = vrot.slane %v6298_v16, %v10066_v4  ;;  %v6346_v6 = vcombine.low %v6324_v38, %v6331_v29 }
 0x390   : > { %v6361_v7 = vrot.slane %v6347_v27, %v10066_v4 }
 0x391   : > { %v6313_v53 = vcombine.low %v6305_v30, %v6312_v28  ;;  %v6354_v56 = vrot.slane %v6346_v6, %v10066_v4  ;;  %v8283_v4 = vld [vmem:[%s10241_s21 + $0x20] sm:$0xff]  }
 0x393   : > { %7935 = vmatprep.mubr.msk.bf16.mxu0 %vm10592_vm15, %v6313_v53  ;;  %v6362_v26 = vcombine.low %v6354_v56, %v6361_v7  ;;  %vm10607_vm15 = vmmov %vm10581_vm0 }
 0x395   : > { %7936 = vmatmul.mubr.msk.bf16.gmra.mrb[36].mxu0 %vm10593_vm2, %v6362_v26  ;;  %vm10608_vm2 = vmmov %vm10581_vm0 }
 0x396   : > { %7941 = vmatprep.mubr.msk.bf16.mxu0 %vm10594_vm1, %v8279_v59  ;;  %vm7131_vm1 = vcmask 257024  }
 0x39d   : > { %7942 = vmatmul.mubr.msk.bf16.vlgmr.msra.gmra.mrb[8].mxu0 %vm10595_vm3, %v8280_v10 }
 0x39e   : > { %7945 = vmatprep.mubr.msk.bf16.mxu0 %vm10596_vm4, %v8281_v8 }
 0x3a5   : > { %7946 = vmatmul.mubr.msk.bf16.gmra.mrb[12].mxu0 %vm10581_vm0, %v8282_v45 }
 0x3a6   : > { %7949 = vmatprep.mubr.msk.bf16.mxu0 %vm10597_vm5, %v8283_v4 }
 0x3ad   : > { %7950 = vmatmul.mubr.msk.bf16.gmra.mrb[16].mxu0 %vm10598_vm6, %v8284_v17 }
 0x3ae   : > { %7953 = vmatprep.mubr.msk.bf16.mxu0 %vm10599_vm7, %v8285_v37 }
 0x3b5   : > { %7954 = vmatmul.mubr.msk.bf16.gmra.mrb[20].mxu0 %vm10600_vm8, %v8286_v33 }
 0x3b6   : > { %7957 = vmatprep.mubr.msk.bf16.mxu0 %vm10601_vm9, %v8287_v44 }
 0x3bd   : > { %7958 = vmatmul.mubr.msk.bf16.gmra.mrb[24].mxu0 %vm10602_vm10, %v8288_v24 }
 0x3be   : > { %7961 = vmatprep.mubr.msk.bf16.mxu0 %vm10603_vm11, %v8289_v61 }
 0x3c5   : > { %7962 = vmatmul.mubr.msk.bf16.gmra.mrb[28].mxu0 %vm10604_vm12, %v8290_v5 }
 0x3c6   : > { %7965 = vmatprep.mubr.msk.bf16.mxu0 %vm10605_vm13, %v8291_v31 }
 0x3cd   : > { %7966 = vmatmul.mubr.msk.bf16.gmra.mrb[32].mxu0 %vm10606_vm14, %v8292_v0 }
 0x3ce   : > { %7969 = vmatprep.mubr.msk.bf16.mxu0 %vm10607_vm15, %v8293_v36 }
 0x3d5   : > { %7970 = vmatmul.mubr.msk.bf16.gmra.mrb[36].mxu0 %vm10608_vm2, %v8294_v18 }
 0x470   : > { %v7943_v43 = vpop.f32.mrb[8].mxu0 }
 0x471   : > { %v7975_v62 = vadd.f32 %v7943_v43, %v10408_v57  ;;  %v6773_v58 = vpop.f32.mrb[9].mxu0 }
 0x472   : > { %v7976_v13 = vadd.f32 %v10408_v57, %v6773_v58  ;;  %v7944_v54 = vpop.f32.mrb[10].mxu0 }
 0x473   : > { %v6941_v14 = vadd.f32 %v7975_v62, %v10413_v2  ;;  %v7977_v48 = vadd.f32 %v7944_v54, %v10408_v57  ;;  %v6776_v41 = vpop.f32.mrb[11].mxu0 }
 0x474   : > { %v6939_v19 = vadd.f32 %v7976_v13, %v10413_v2  ;;  %v7978_v15 = vadd.f32 %v10408_v57, %v6776_v41 }
 0x475   : > { %v6973_v51 = vmax.f32 %v6941_v14, 0.0  ;;  %v6942_v9 = vadd.f32 %v7977_v48, %v10413_v2 }
 0x476   : > { %v6971_v42 = vmax.f32 %v6939_v19, 0.0  ;;  %v6940_v47 = vadd.f32 %v7978_v15, %v10413_v2 }
 0x477   : > { %v7703_v39 = vpack.c.bf16 %v6973_v51, %v6973_v51  ;;  %v6974_v35 = vmax.f32 %v6942_v9, 0.0 }
 0x478   : > { %v7701_v21 = vpack.c.bf16 %v6971_v42, %v6971_v42  ;;  %v6972_v52 = vmax.f32 %v6940_v47, 0.0  ;;  %v7947_v49 = vpop.f32.mrb[12].mxu0 }
 0x479   : > { %7134 = vst.msk [vmem:[%s10427_s13 + $0x8] sm:$0xf] %vm7131_vm1, %v7703_v39  ;;  %v7704_v60 = vpack.c.bf16 %v6974_v35, %v6974_v35  ;;  %v7979_v23 = vadd.f32 %v7947_v49, %v10408_v57  ;;  %v6789_v1 = vpop.f32.mrb[13].mxu0 }
 0x47a   : > { %7132 = vst.msk [vmem:[%s10427_s13] sm:$0xf] %vm7131_vm1, %v7701_v21  ;;  %v7702_v50 = vpack.c.bf16 %v6972_v52, %v6972_v52  ;;  %v7980_v55 = vadd.f32 %v10408_v57, %v6789_v1  ;;  %v7948_v40 = vpop.f32.mrb[14].mxu0 }
 0x47b   : > { %7135 = vst.msk [vmem:[%s10427_s13 + $0xc] sm:$0xf] %vm7131_vm1, %v7704_v60  ;;  %v6945_v46 = vadd.f32 %v7979_v23, %v10413_v2  ;;  %v7981_v32 = vadd.f32 %v7948_v40, %v10408_v57  ;;  %v6792_v11 = vpop.f32.mrb[15].mxu0 }
 0x47c   : > { %7133 = vst.msk [vmem:[%s10427_s13 + $0x4] sm:$0xf] %vm7131_vm1, %v7702_v50  ;;  %v6943_v34 = vadd.f32 %v7980_v55, %v10413_v2  ;;  %v7982_v22 = vadd.f32 %v10408_v57, %v6792_v11 }
 0x47d   : > { %v6977_v12 = vmax.f32 %v6945_v46, 0.0  ;;  %v6946_v25 = vadd.f32 %v7981_v32, %v10413_v2 }
 0x47e   : > { %v6975_v3 = vmax.f32 %v6943_v34, 0.0  ;;  %v6944_v20 = vadd.f32 %v7982_v22, %v10413_v2 }
 0x47f   : > { %v7707_v29 = vpack.c.bf16 %v6977_v12, %v6977_v12  ;;  %v6978_v63 = vmax.f32 %v6946_v25, 0.0 }
 0x480   : > { %v7705_v16 = vpack.c.bf16 %v6975_v3, %v6975_v3  ;;  %v6976_v38 = vmax.f32 %v6944_v20, 0.0  ;;  %v7951_v27 = vpop.f32.mrb[16].mxu0 }
 0x481   : > { %7138 = vst.msk [vmem:[%s10427_s13 + $0x18] sm:$0xf] %vm7131_vm1, %v7707_v29  ;;  %v7708_v30 = vpack.c.bf16 %v6978_v63, %v6978_v63  ;;  %v7983_v28 = vadd.f32 %v7951_v27, %v10408_v57  ;;  %v6805_v6 = vpop.f32.mrb[17].mxu0 }
 0x482   : > { %7136 = vst.msk [vmem:[%s10427_s13 + $0x10] sm:$0xf] %vm7131_vm1, %v7705_v16  ;;  %v7706_v7 = vpack.c.bf16 %v6976_v38, %v6976_v38  ;;  %v7984_v53 = vadd.f32 %v10408_v57, %v6805_v6  ;;  %v7952_v56 = vpop.f32.mrb[18].mxu0 }
 0x483   : > { %7139 = vst.msk [vmem:[%s10427_s13 + $0x1c] sm:$0xf] %vm7131_vm1, %v7708_v30  ;;  %v6949_v59 = vadd.f32 %v7983_v28, %v10413_v2  ;;  %v7985_v26 = vadd.f32 %v7952_v56, %v10408_v57  ;;  %v6808_v10 = vpop.f32.mrb[19].mxu0 }
 0x484   : > { %7137 = vst.msk [vmem:[%s10427_s13 + $0x14] sm:$0xf] %vm7131_vm1, %v7706_v7  ;;  %v6947_v8 = vadd.f32 %v7984_v53, %v10413_v2  ;;  %v7986_v45 = vadd.f32 %v10408_v57, %v6808_v10 }
 0x485   : > { %v6981_v4 = vmax.f32 %v6949_v59, 0.0  ;;  %v6950_v17 = vadd.f32 %v7985_v26, %v10413_v2 }
 0x486   : > { %v6979_v37 = vmax.f32 %v6947_v8, 0.0  ;;  %v6948_v33 = vadd.f32 %v7986_v45, %v10413_v2 }
 0x487   : > { %v7711_v44 = vpack.c.bf16 %v6981_v4, %v6981_v4  ;;  %v6982_v24 = vmax.f32 %v6950_v17, 0.0 }
 0x488   : > { %v7709_v61 = vpack.c.bf16 %v6979_v37, %v6979_v37  ;;  %v6980_v5 = vmax.f32 %v6948_v33, 0.0  ;;  %v7955_v31 = vpop.f32.mrb[20].mxu0 }
 0x489   : > { %7142 = vst.msk [vmem:[%s10427_s13 + $0x28] sm:$0xf] %vm7131_vm1, %v7711_v44  ;;  %v7712_v0 = vpack.c.bf16 %v6982_v24, %v6982_v24  ;;  %v7987_v36 = vadd.f32 %v7955_v31, %v10408_v57  ;;  %v6821_v18 = vpop.f32.mrb[21].mxu0 }
 0x48a   : > { %7140 = vst.msk [vmem:[%s10427_s13 + $0x20] sm:$0xf] %vm7131_vm1, %v7709_v61  ;;  %v7710_v43 = vpack.c.bf16 %v6980_v5, %v6980_v5  ;;  %v7988_v62 = vadd.f32 %v10408_v57, %v6821_v18  ;;  %v7956_v58 = vpop.f32.mrb[22].mxu0 }
 0x48b   : > { %7143 = vst.msk [vmem:[%s10427_s13 + $0x2c] sm:$0xf] %vm7131_vm1, %v7712_v0  ;;  %v6953_v13 = vadd.f32 %v7987_v36, %v10413_v2  ;;  %v7989_v54 = vadd.f32 %v7956_v58, %v10408_v57  ;;  %v6824_v14 = vpop.f32.mrb[23].mxu0 }
 0x48c   : > { %7141 = vst.msk [vmem:[%s10427_s13 + $0x24] sm:$0xf] %vm7131_vm1, %v7710_v43  ;;  %v6951_v48 = vadd.f32 %v7988_v62, %v10413_v2  ;;  %v7990_v41 = vadd.f32 %v10408_v57, %v6824_v14 }
 0x48d   : > { %v6985_v19 = vmax.f32 %v6953_v13, 0.0  ;;  %v6954_v15 = vadd.f32 %v7989_v54, %v10413_v2 }
 0x48e   : > { %v6983_v51 = vmax.f32 %v6951_v48, 0.0  ;;  %v6952_v9 = vadd.f32 %v7990_v41, %v10413_v2 }
 0x48f   : > { %v7715_v42 = vpack.c.bf16 %v6985_v19, %v6985_v19  ;;  %v6986_v47 = vmax.f32 %v6954_v15, 0.0 }
 0x490   : > { %v7713_v39 = vpack.c.bf16 %v6983_v51, %v6983_v51  ;;  %v6984_v35 = vmax.f32 %v6952_v9, 0.0  ;;  %v7959_v21 = vpop.f32.mrb[24].mxu0 }
 0x491   : > { %7146 = vst.msk [vmem:[%s10427_s13 + $0x38] sm:$0xf] %vm7131_vm1, %v7715_v42  ;;  %v7716_v52 = vpack.c.bf16 %v6986_v47, %v6986_v47  ;;  %v7991_v49 = vadd.f32 %v7959_v21, %v10408_v57  ;;  %v6837_v60 = vpop.f32.mrb[25].mxu0 }
 0x492   : > { %7144 = vst.msk [vmem:[%s10427_s13 + $0x30] sm:$0xf] %vm7131_vm1, %v7713_v39  ;;  %v7714_v23 = vpack.c.bf16 %v6984_v35, %v6984_v35  ;;  %v7992_v1 = vadd.f32 %v10408_v57, %v6837_v60  ;;  %v7960_v50 = vpop.f32.mrb[26].mxu0 }
 0x493   : > { %7147 = vst.msk [vmem:[%s10427_s13 + $0x3c] sm:$0xf] %vm7131_vm1, %v7716_v52  ;;  %v6957_v55 = vadd.f32 %v7991_v49, %v10413_v2  ;;  %v7993_v40 = vadd.f32 %v7960_v50, %v10408_v57  ;;  %v6840_v46 = vpop.f32.mrb[27].mxu0 }
 0x494   : > { %7145 = vst.msk [vmem:[%s10427_s13 + $0x34] sm:$0xf] %vm7131_vm1, %v7714_v23  ;;  %v6955_v32 = vadd.f32 %v7992_v1, %v10413_v2  ;;  %v7994_v11 = vadd.f32 %v10408_v57, %v6840_v46 }
 0x495   : > { %v6989_v34 = vmax.f32 %v6957_v55, 0.0  ;;  %v6958_v22 = vadd.f32 %v7993_v40, %v10413_v2 }
 0x496   : > { %v6987_v12 = vmax.f32 %v6955_v32, 0.0  ;;  %v6956_v25 = vadd.f32 %v7994_v11, %v10413_v2 }
 0x497   : > { %v7719_v3 = vpack.c.bf16 %v6989_v34, %v6989_v34  ;;  %v6990_v20 = vmax.f32 %v6958_v22, 0.0 }
 0x498   : > { %v7717_v29 = vpack.c.bf16 %v6987_v12, %v6987_v12  ;;  %v6988_v63 = vmax.f32 %v6956_v25, 0.0  ;;  %v7963_v16 = vpop.f32.mrb[28].mxu0 }
 0x499   : > { %7150 = vst.msk [vmem:[%s10427_s13 + $0x48] sm:$0xf] %vm7131_vm1, %v7719_v3  ;;  %v7720_v38 = vpack.c.bf16 %v6990_v20, %v6990_v20  ;;  %v7995_v27 = vadd.f32 %v7963_v16, %v10408_v57  ;;  %v6853_v30 = vpop.f32.mrb[29].mxu0 }
 0x49a   : > { %7148 = vst.msk [vmem:[%s10427_s13 + $0x40] sm:$0xf] %vm7131_vm1, %v7717_v29  ;;  %v7718_v28 = vpack.c.bf16 %v6988_v63, %v6988_v63  ;;  %v7996_v6 = vadd.f32 %v10408_v57, %v6853_v30  ;;  %v7964_v7 = vpop.f32.mrb[30].mxu0 }
 0x49b   : > { %7151 = vst.msk [vmem:[%s10427_s13 + $0x4c] sm:$0xf] %vm7131_vm1, %v7720_v38  ;;  %v6961_v53 = vadd.f32 %v7995_v27, %v10413_v2  ;;  %v7997_v56 = vadd.f32 %v7964_v7, %v10408_v57  ;;  %v6856_v59 = vpop.f32.mrb[31].mxu0 }
 0x49c   : > { %7149 = vst.msk [vmem:[%s10427_s13 + $0x44] sm:$0xf] %vm7131_vm1, %v7718_v28  ;;  %v6959_v26 = vadd.f32 %v7996_v6, %v10413_v2  ;;  %v7998_v10 = vadd.f32 %v10408_v57, %v6856_v59 }
 0x49d   : > { %v6993_v8 = vmax.f32 %v6961_v53, 0.0  ;;  %v6962_v45 = vadd.f32 %v7997_v56, %v10413_v2 }
 0x49e   : > { %v6991_v4 = vmax.f32 %v6959_v26, 0.0  ;;  %v6960_v17 = vadd.f32 %v7998_v10, %v10413_v2 }
 0x49f   : > { %v7723_v37 = vpack.c.bf16 %v6993_v8, %v6993_v8  ;;  %v6994_v33 = vmax.f32 %v6962_v45, 0.0 }
 0x4a0   : > { %v7721_v44 = vpack.c.bf16 %v6991_v4, %v6991_v4  ;;  %v6992_v24 = vmax.f32 %v6960_v17, 0.0  ;;  %v7967_v61 = vpop.f32.mrb[32].mxu0 }
 0x4a1   : > { %7154 = vst.msk [vmem:[%s10427_s13 + $0x58] sm:$0xf] %vm7131_vm1, %v7723_v37  ;;  %v7724_v5 = vpack.c.bf16 %v6994_v33, %v6994_v33  ;;  %v7999_v31 = vadd.f32 %v7967_v61, %v10408_v57  ;;  %v6869_v0 = vpop.f32.mrb[33].mxu0 }
 0x4a2   : > { %7152 = vst.msk [vmem:[%s10427_s13 + $0x50] sm:$0xf] %vm7131_vm1, %v7721_v44  ;;  %v7722_v36 = vpack.c.bf16 %v6992_v24, %v6992_v24  ;;  %v8000_v18 = vadd.f32 %v10408_v57, %v6869_v0  ;;  %v7968_v43 = vpop.f32.mrb[34].mxu0 }
 0x4a3   : > { %7155 = vst.msk [vmem:[%s10427_s13 + $0x5c] sm:$0xf] %vm7131_vm1, %v7724_v5  ;;  %v6965_v62 = vadd.f32 %v7999_v31, %v10413_v2  ;;  %v8001_v58 = vadd.f32 %v7968_v43, %v10408_v57  ;;  %v6872_v13 = vpop.f32.mrb[35].mxu0 }
 0x4a4   : > { %7153 = vst.msk [vmem:[%s10427_s13 + $0x54] sm:$0xf] %vm7131_vm1, %v7722_v36  ;;  %v6963_v54 = vadd.f32 %v8000_v18, %v10413_v2  ;;  %v8002_v14 = vadd.f32 %v10408_v57, %v6872_v13 }
 0x4a5   : > { %v6997_v48 = vmax.f32 %v6965_v62, 0.0  ;;  %v6966_v41 = vadd.f32 %v8001_v58, %v10413_v2 }
 0x4a6   : > { %v6995_v19 = vmax.f32 %v6963_v54, 0.0  ;;  %v6964_v15 = vadd.f32 %v8002_v14, %v10413_v2 }
 0x4a7   : > { %v7727_v51 = vpack.c.bf16 %v6997_v48, %v6997_v48  ;;  %v6998_v9 = vmax.f32 %v6966_v41, 0.0 }
 0x4a8   : > { %v7725_v42 = vpack.c.bf16 %v6995_v19, %v6995_v19  ;;  %v6996_v47 = vmax.f32 %v6964_v15, 0.0  ;;  %v7971_v39 = vpop.f32.mrb[36].mxu0 }
 0x4a9   : > { %7158 = vst.msk [vmem:[%s10427_s13 + $0x68] sm:$0xf] %vm7131_vm1, %v7727_v51  ;;  %v7728_v35 = vpack.c.bf16 %v6998_v9, %v6998_v9  ;;  %v8003_v21 = vadd.f32 %v7971_v39, %v10408_v57  ;;  %v6885_v52 = vpop.f32.mrb[37].mxu0 }
 0x4aa   : > { %7156 = vst.msk [vmem:[%s10427_s13 + $0x60] sm:$0xf] %vm7131_vm1, %v7725_v42  ;;  %v7726_v49 = vpack.c.bf16 %v6996_v47, %v6996_v47  ;;  %v8004_v60 = vadd.f32 %v10408_v57, %v6885_v52  ;;  %v7972_v23 = vpop.f32.mrb[38].mxu0 }
 0x4ab   : > { %7159 = vst.msk [vmem:[%s10427_s13 + $0x6c] sm:$0xf] %vm7131_vm1, %v7728_v35  ;;  %v6969_v1 = vadd.f32 %v8003_v21, %v10413_v2  ;;  %v8005_v50 = vadd.f32 %v7972_v23, %v10408_v57  ;;  %v6888_v55 = vpop.f32.mrb[39].mxu0 }
 0x4ac   : > { %7157 = vst.msk [vmem:[%s10427_s13 + $0x64] sm:$0xf] %vm7131_vm1, %v7726_v49  ;;  %v6967_v40 = vadd.f32 %v8004_v60, %v10413_v2  ;;  %v8006_v46 = vadd.f32 %v10408_v57, %v6888_v55 }
 0x4ad   : > { %v7001_v32 = vmax.f32 %v6969_v1, 0.0  ;;  %v6970_v11 = vadd.f32 %v8005_v50, %v10413_v2 }
 0x4ae   : > { %v6999_v34 = vmax.f32 %v6967_v40, 0.0  ;;  %v6968_v22 = vadd.f32 %v8006_v46, %v10413_v2 }
 0x4af   : > { %v7731_v12 = vpack.c.bf16 %v7001_v32, %v7001_v32  ;;  %v7002_v25 = vmax.f32 %v6970_v11, 0.0 }
 0x4b0   : > { %v7729_v3 = vpack.c.bf16 %v6999_v34, %v6999_v34  ;;  %v7000_v20 = vmax.f32 %v6968_v22, 0.0 }
 0x4b1   : > { %7162 = vst.msk [vmem:[%s10427_s13 + $0x78] sm:$0xf] %vm7131_vm1, %v7731_v12  ;;  %v7732_v29 = vpack.c.bf16 %v7002_v25, %v7002_v25 }
 0x4b2   : > { %7160 = vst.msk [vmem:[%s10427_s13 + $0x70] sm:$0xf] %vm7131_vm1, %v7729_v3  ;;  %v7730_v63 = vpack.c.bf16 %v7000_v20, %v7000_v20 }
 0x4b3   : > { %7163 = vst.msk [vmem:[%s10427_s13 + $0x7c] sm:$0xf] %vm7131_vm1, %v7732_v29 }
 0x4b4   : > { %7161 = vst.msk [vmem:[%s10427_s13 + $0x74] sm:$0xf] %vm7131_vm1, %v7730_v63 }
 0x4b5 PF: > { %s21_s19 = sadd.s32 1, %s8320_s19   ;;  %s10609_s17 = smov %s8316_s18 }
 0x4b6   : > { %p18_p5 = scmp.ge.s32.totalorder %s21_s19, 4   ;;  %s10610_s18 = smov %s10612_s20 }
 0x4b8   :  { %20 = sbr.rel (!%p18_p5) target bundleno = 2 (0x2), region = 99 }

</bundles_post_ra>
